<compile_context>
chip_gen: v7x
topology: tpu7x:2x2x1
jax: 0.10.0
libtpu: 0.0.40
codegen_flags: <defaults>
</compile_context>

<pallas_src>
import functools
import math

import jax
import jax.numpy as jnp
from jax import lax
from jax.experimental import pallas as pl
from jax.experimental.pallas import tpu as pltpu


# ----------------------------------------------------------------------------
# Fused Pallas kernel.
# Internal layout: channels-last, spatial flattened to rows (HW, C).
# The scratch buffers hold the spatially padded activations with the H x W
# interior starting at sublane-aligned column _C0 (so all stores are aligned).
# ----------------------------------------------------------------------------
_CP = 7          # column of the 1-pixel left "ring" inside the scratch buffers
_C0 = _CP + 1    # sublane-aligned (8) column where the H x W interior starts


def _fused_block_kernel(x_ref, mask_ref,
                        w1_ref, b1_ref, w2_ref, b2_ref, w3_ref, b3_ref,
                        w4_ref, b4_ref, wsk_ref, bsk_ref,
                        o_ref, o1b_ref, o2b_ref, *, H, W, WBUF):
    HW = H * W
    f32 = jnp.float32
    bf16 = jnp.bfloat16

    x2d = x_ref[...]                                        # (HW, Cin) f32

    # ---- conv1: 1x1, padding=1, + bn1 + relu --------------------------------
    # Interior (original H x W grid) is a per-pixel matmul; the one-pixel ring
    # created by padding=1 is the constant relu(b1) (zero input * w + bias).
    o1_in = jnp.maximum(
        jnp.dot(x2d, w1_ref[...], preferred_element_type=f32) + b1_ref[...],
        0.0)                                                # (HW, 64)
    ring1 = jnp.maximum(b1_ref[...], 0.0).reshape(1, 1, 64)
    o1b_ref[...] = jnp.broadcast_to(ring1, (H + 2, WBUF, 64))
    o1b_ref[1:H + 1, _C0:_C0 + W, :] = o1_in.reshape(H, W, 64)

    # ---- 3x3 valid conv over a padded VMEM buffer: 9 shifted MXU matmuls ----
    def conv3x3(buf_ref, w_ref, cout):
        acc = jnp.zeros((HW, cout), f32)
        for t in range(9):
            dy, dx = divmod(t, 3)
            win = buf_ref[dy:dy + H, _CP + dx:_CP + dx + W, :]   # (H, W, 64)
            acc = acc + jnp.dot(win.reshape(HW, 64).astype(bf16), w_ref[t],
                                preferred_element_type=f32)
        return acc

    # ---- conv2: 3x3, padding=0, + bn2 + relu --------------------------------
    o2 = jnp.maximum(conv3x3(o1b_ref, w2_ref, 64) + b2_ref[...], 0.0)
    o2b_ref[...] = jnp.zeros((H + 2, WBUF, 64), f32)    # zero ring for conv3
    o2b_ref[1:H + 1, _C0:_C0 + W, :] = o2.reshape(H, W, 64)

    # ---- conv3: 3x3, padding=0, + bn3 + relu, then zero-pad by 1 ------------
    # The interior of the "same"-style result equals the valid conv; the ring
    # is masked to zero, which is exactly what conv4's padding=1 consumes.
    y3 = conv3x3(o2b_ref, w3_ref, 128) + b3_ref[...]
    o3p = mask_ref[...] * jnp.maximum(y3, 0.0)              # (HW, 128)

    # ---- conv4: 1x1 (padding handled by the zero ring) + bn4 + relu ---------
    o4 = jnp.maximum(
        jnp.dot(o3p.astype(bf16), w4_ref[...], preferred_element_type=f32)
        + b4_ref[...], 0.0)                                 # (HW, 256)

    # ---- skip branch: 1x1 conv + bnsk, residual add, final relu -------------
    skip = (jnp.dot(x2d, wsk_ref[...], preferred_element_type=f32)
            + bsk_ref[...])                                 # (HW, 256)
    o_ref[...] = jnp.maximum(o4 + skip, 0.0)


# ----------------------------------------------------------------------------
# Wrapper: parameter folding + single pallas_call
# ----------------------------------------------------------------------------
def _fold_bn(gamma, beta, mean, var, eps=1e-5):
    scale = gamma / jnp.sqrt(var + eps)
    bias = beta - mean * scale
    return scale, bias


def residual_block_4_forward(x_nchw, params):
    """Fused Pallas forward. x_nchw: (N, Cin, H, W) f32 -> (N, 256, H, W) f32."""
    p = params
    x = jnp.transpose(x_nchw, (0, 2, 3, 1)).astype(jnp.float32)   # NHWC
    n, h, w, cin = x.shape
    assert h >= 3 and w >= 3 and w % 8 == 0, "kernel assumes w % 8 == 0"
    hw = h * w
    wbuf = ((w + 9 + 7) // 8) * 8          # >= _CP + (w + 2), multiple of 8

    s1, b1 = _fold_bn(*p["bn1"])
    s2, b2 = _fold_bn(*p["bn2"])
    s3, b3 = _fold_bn(*p["bn3"])
    s4, b4 = _fold_bn(*p["bn4"])
    ssk, bsk = _fold_bn(*p["bnsk"])

    # Fold BN scale into the conv weights (matmul layout).  Heavy matmuls in
    # bf16 (MXU-native); the tiny K=cin matmuls stay f32.
    w1f = p["w1"].reshape(cin, 64) * s1[None, :]
    w2f = (p["w2"].reshape(9, 64, 64) * s2[None, None, :]).astype(jnp.bfloat16)
    w3f = (p["w3"].reshape(9, 64, 128) * s3[None, None, :]).astype(jnp.bfloat16)
    w4f = (p["w4"].reshape(128, 256) * s4[None, :]).astype(jnp.bfloat16)
    wskf = p["wsk"].reshape(cin, 256) * ssk[None, :]

    # 0/1 mask selecting the interior (h-2, w-2) region (= conv4's zero pad).
    ii, jj = jnp.meshgrid(jnp.arange(h), jnp.arange(w), indexing="ij")
    mask = (((ii > 0) & (ii < h - 1) & (jj > 0) & (jj < w - 1))
            .astype(jnp.float32).reshape(hw, 1))

    x_flat = x.reshape(n, hw, cin)
    kernel = functools.partial(_fused_block_kernel, H=h, W=w, WBUF=wbuf)

    out_flat = pl.pallas_call(
        kernel,
        out_shape=jax.ShapeDtypeStruct((n, hw, 256), jnp.float32),
        grid_spec=pltpu.PrefetchScalarGridSpec(
            num_scalar_prefetch=0,
            grid=(n,),
            in_specs=[
                pl.BlockSpec((None, hw, cin), lambda b: (b, 0, 0)),
                pl.BlockSpec((hw, 1), lambda b: (0, 0)),
                pl.BlockSpec((cin, 64), lambda b: (0, 0)),
                pl.BlockSpec((1, 64), lambda b: (0, 0)),
                pl.BlockSpec((9, 64, 64), lambda b: (0, 0, 0)),
                pl.BlockSpec((1, 64), lambda b: (0, 0)),
                pl.BlockSpec((9, 64, 128), lambda b: (0, 0, 0)),
                pl.BlockSpec((1, 128), lambda b: (0, 0)),
                pl.BlockSpec((128, 256), lambda b: (0, 0)),
                pl.BlockSpec((1, 256), lambda b: (0, 0)),
                pl.BlockSpec((cin, 256), lambda b: (0, 0)),
                pl.BlockSpec((1, 256), lambda b: (0, 0)),
            ],
            out_specs=pl.BlockSpec((None, hw, 256), lambda b: (b, 0, 0)),
            scratch_shapes=[
                pltpu.VMEM((h + 2, wbuf, 64), jnp.float32),   # padded o1
                pltpu.VMEM((h + 2, wbuf, 64), jnp.float32),   # padded o2
            ],
        ),
        compiler_params=pltpu.CompilerParams(dimension_semantics=("parallel",)),
    )(x_flat, mask,
      w1f, b1.reshape(1, 64), w2f, b2.reshape(1, 64),
      w3f, b3.reshape(1, 128), w4f, b4.reshape(1, 256),
      wskf, bsk.reshape(1, 256))

    out = out_flat.reshape(n, h, w, 256)
    return jnp.transpose(out, (0, 3, 1, 2))                   # back to NCHW


# ----------------------------------------------------------------------------
# Pure-JAX reference (lax convs, f32) for correctness checking
# ----------------------------------------------------------------------------
def _conv_ref(x, w_hwio, pad):
    return lax.conv_general_dilated(
        x, w_hwio, window_strides=(1, 1),
        padding=[(pad, pad), (pad, pad)],
        dimension_numbers=("NHWC", "HWIO", "NHWC"))


def reference_forward(x_nchw, p):
    x = jnp.transpose(x_nchw, (0, 2, 3, 1)).astype(jnp.float32)

    def bn(y, bnp):
        s, b = _fold_bn(*bnp)
        return y * s + b

    o = jax.nn.relu(bn(_conv_ref(x, p["w1"], 1), p["bn1"]))
    o = jax.nn.relu(bn(_conv_ref(o, p["w2"], 0), p["bn2"]))
    o = jax.nn.relu(bn(_conv_ref(o, p["w3"], 0), p["bn3"]))
    o = jax.nn.relu(bn(_conv_ref(o, p["w4"], 1), p["bn4"]))
    o = o + bn(_conv_ref(x, p["wsk"], 0), p["bnsk"])
    o = jax.nn.relu(o)
    return jnp.transpose(o, (0, 3, 1, 2))


# ----------------------------------------------------------------------------
# Deterministic parameter init (shapes from the nn.Module __init__)
# ----------------------------------------------------------------------------
def init_params(key, in_channels):
    ks = jax.random.split(key, 16)

    def conv_w(k, kh, kw, cin, cout):
        fan_in = kh * kw * cin
        return (jax.random.normal(k, (kh, kw, cin, cout), jnp.float32)
                / math.sqrt(fan_in))

    def bn_p(k, c):
        k1, k2, k3, k4 = jax.random.split(k, 4)
        gamma = 1.0 + 0.1 * jax.random.normal(k1, (c,), jnp.float32)
        beta = 0.1 * jax.random.normal(k2, (c,), jnp.float32)
        mean = 0.1 * jax.random.normal(k3, (c,), jnp.float32)
        var = jax.random.uniform(k4, (c,), jnp.float32, 0.5, 1.5)
        return (gamma, beta, mean, var)

    return {
        "w1": conv_w(ks[0], 1, 1, in_channels, 64),
        "w2": conv_w(ks[1], 3, 3, 64, 64),
        "w3": conv_w(ks[2], 3, 3, 64, 128),
        "w4": conv_w(ks[3], 1, 1, 128, 256),
        "wsk": conv_w(ks[4], 1, 1, in_channels, 256),
        "bn1": bn_p(ks[5], 64),
        "bn2": bn_p(ks[6], 64),
        "bn3": bn_p(ks[7], 128),
        "bn4": bn_p(ks[8], 256),
        "bnsk": bn_p(ks[9], 256),
    }


# ----------------------------------------------------------------------------
if __name__ == "__main__":
    key = jax.random.PRNGKey(0)
    k_x, k_p = jax.random.split(key)

    N, C_IN, H, W = 2, 4, 16, 16
    x = jax.random.normal(k_x, (N, C_IN, H, W), jnp.float32)
    params = init_params(k_p, C_IN)

    fwd = jax.jit(functools.partial(residual_block_4_forward, params=params))
    out = jax.block_until_ready(fwd(x))

    assert out.shape == (N, 256, H, W), out.shape

    ref = jax.block_until_ready(reference_forward(x, params))
    err = float(jnp.max(jnp.abs(out - ref)))
    # bf16 MXU operands vs. f32 reference -> loosened tolerance (review note).
    assert err < 1e-1, f"max abs err vs reference: {err}"

    print("KERNEL_OK")
</pallas_src>

<mosaic_0001>
module attributes {stable_mosaic.version = 11 : i64} {
  func.func @_fused_block_kernel(%arg0: i32, %arg1: memref<1x256x4xf32, #tpu.memory_space<vmem>>, %arg2: memref<256x1xf32, #tpu.memory_space<vmem>>, %arg3: memref<4x64xf32, #tpu.memory_space<vmem>>, %arg4: memref<1x64xf32, #tpu.memory_space<vmem>>, %arg5: memref<9x64x64xbf16, #tpu.memory_space<vmem>>, %arg6: memref<1x64xf32, #tpu.memory_space<vmem>>, %arg7: memref<9x64x128xbf16, #tpu.memory_space<vmem>>, %arg8: memref<1x128xf32, #tpu.memory_space<vmem>>, %arg9: memref<128x256xbf16, #tpu.memory_space<vmem>>, %arg10: memref<1x256xf32, #tpu.memory_space<vmem>>, %arg11: memref<4x256xf32, #tpu.memory_space<vmem>>, %arg12: memref<1x256xf32, #tpu.memory_space<vmem>>, %arg13: memref<1x256x256xf32, #tpu.memory_space<vmem>>, %arg14: memref<18x32x64xf32, #tpu.memory_space<vmem>>, %arg15: memref<18x32x64xf32, #tpu.memory_space<vmem>>) attributes {dimension_semantics = [#tpu.dimension_semantics<parallel>], iteration_bounds = array<i64: 2>, scalar_prefetch = 0 : i64, scratch_operands = 2 : i64, tpu.core_type = #tpu.core_type<tc>, window_params = [{transform_indices = @transform_0, window_bounds = array<i64: 1, 256, 4>}, {pipeline_mode = #tpu.pipeline_mode<synchronous>, transform_indices = @transform_1, window_bounds = array<i64: 256, 1>}, {pipeline_mode = #tpu.pipeline_mode<synchronous>, transform_indices = @transform_2, window_bounds = array<i64: 4, 64>}, {pipeline_mode = #tpu.pipeline_mode<synchronous>, transform_indices = @transform_3, window_bounds = array<i64: 1, 64>}, {pipeline_mode = #tpu.pipeline_mode<synchronous>, transform_indices = @transform_4, window_bounds = array<i64: 9, 64, 64>}, {pipeline_mode = #tpu.pipeline_mode<synchronous>, transform_indices = @transform_5, window_bounds = array<i64: 1, 64>}, {pipeline_mode = #tpu.pipeline_mode<synchronous>, transform_indices = @transform_6, window_bounds = array<i64: 9, 64, 128>}, {pipeline_mode = #tpu.pipeline_mode<synchronous>, transform_indices = @transform_7, window_bounds = array<i64: 1, 128>}, {pipeline_mode = #tpu.pipeline_mode<synchronous>, transform_indices = @transform_8, window_bounds = array<i64: 128, 256>}, {pipeline_mode = #tpu.pipeline_mode<synchronous>, transform_indices = @transform_9, window_bounds = array<i64: 1, 256>}, {pipeline_mode = #tpu.pipeline_mode<synchronous>, transform_indices = @transform_10, window_bounds = array<i64: 4, 256>}, {pipeline_mode = #tpu.pipeline_mode<synchronous>, transform_indices = @transform_11, window_bounds = array<i64: 1, 256>}, {transform_indices = @transform_12, window_bounds = array<i64: 1, 256, 256>}]} {
    %c0 = arith.constant 0 : index
    %c0_0 = arith.constant 0 : index
    %c0_1 = arith.constant 0 : index
    %0 = vector.load %arg1[%c0, %c0_0, %c0_1] : memref<1x256x4xf32, #tpu.memory_space<vmem>>, vector<1x256x4xf32>
    %1 = vector.shape_cast %0 : vector<1x256x4xf32> to vector<256x4xf32>
    %c0_2 = arith.constant 0 : index
    %c0_3 = arith.constant 0 : index
    %2 = vector.load %arg3[%c0_2, %c0_3] : memref<4x64xf32, #tpu.memory_space<vmem>>, vector<4x64xf32>
    %cst = arith.constant dense<0.000000e+00> : vector<256x64xf32>
    %3 = tpu.matmul %1, %2, %cst {dimension_numbers = #tpu.dot_dimension_numbers<[1], [0], [0], [1], [0, 0, 1, 1], [], []>} : vector<256x4xf32>, vector<4x64xf32>, vector<256x64xf32> -> vector<256x64xf32>
    %c0_4 = arith.constant 0 : index
    %c0_5 = arith.constant 0 : index
    %4 = vector.load %arg4[%c0_4, %c0_5] : memref<1x64xf32, #tpu.memory_space<vmem>>, vector<1x64xf32>
    %5 = vector.broadcast %4 : vector<1x64xf32> to vector<256x64xf32>
    %6 = arith.addf %3, %5 : vector<256x64xf32>
    %cst_6 = arith.constant 0.000000e+00 : f32
    %7 = vector.broadcast %cst_6 : f32 to vector<256x64xf32>
    %8 = arith.maximumf %6, %7 : vector<256x64xf32>
    %c0_7 = arith.constant 0 : index
    %c0_8 = arith.constant 0 : index
    %9 = vector.load %arg4[%c0_7, %c0_8] : memref<1x64xf32, #tpu.memory_space<vmem>>, vector<1x64xf32>
    %cst_9 = arith.constant 0.000000e+00 : f32
    %10 = vector.broadcast %cst_9 : f32 to vector<1x64xf32>
    %11 = arith.maximumf %9, %10 : vector<1x64xf32>
    %12 = vector.shape_cast %11 : vector<1x64xf32> to vector<1x1x64xf32>
    %13 = vector.shape_cast %12 : vector<1x1x64xf32> to vector<1x1x64xf32>
    %14 = vector.broadcast %13 : vector<1x1x64xf32> to vector<18x32x64xf32>
    %c0_10 = arith.constant 0 : index
    %c0_11 = arith.constant 0 : index
    %c0_12 = arith.constant 0 : index
    %15 = vector.load %arg14[%c0_10, %c0_11, %c0_12] : memref<18x32x64xf32, #tpu.memory_space<vmem>>, vector<18x32x64xf32>
    tpu.vector_store %arg14[%c0_10, %c0_11, %c0_12], %14 {strides = array<i32>} : memref<18x32x64xf32, #tpu.memory_space<vmem>>, vector<18x32x64xf32>,
    %16 = vector.shape_cast %8 : vector<256x64xf32> to vector<16x16x64xf32>
    %c1 = arith.constant 1 : index
    %c8 = arith.constant 8 : index
    %c0_13 = arith.constant 0 : index
    %17 = vector.load %arg14[%c1, %c8, %c0_13] : memref<18x32x64xf32, #tpu.memory_space<vmem>>, vector<16x16x64xf32>
    tpu.vector_store %arg14[%c1, %c8, %c0_13], %16 {strides = array<i32>} : memref<18x32x64xf32, #tpu.memory_space<vmem>>, vector<16x16x64xf32>,
    %cst_14 = arith.constant 0.000000e+00 : f32
    %18 = vector.broadcast %cst_14 : f32 to vector<256x64xf32>
    %c0_15 = arith.constant 0 : index
    %c7 = arith.constant 7 : index
    %c0_16 = arith.constant 0 : index
    %19 = vector.load %arg14[%c0_15, %c7, %c0_16] : memref<18x32x64xf32, #tpu.memory_space<vmem>>, vector<16x16x64xf32>
    %20 = vector.shape_cast %19 : vector<16x16x64xf32> to vector<256x64xf32>
    %21 = arith.truncf %20 : vector<256x64xf32> to vector<256x64xbf16>
    %c0_17 = arith.constant 0 : index
    %c0_18 = arith.constant 0 : index
    %c0_19 = arith.constant 0 : index
    %22 = vector.load %arg5[%c0_17, %c0_18, %c0_19] : memref<9x64x64xbf16, #tpu.memory_space<vmem>>, vector<1x64x64xbf16>
    %23 = vector.shape_cast %22 : vector<1x64x64xbf16> to vector<64x64xbf16>
    %cst_20 = arith.constant dense<0.000000e+00> : vector<256x64xf32>
    %24 = tpu.matmul %21, %23, %cst_20 {dimension_numbers = #tpu.dot_dimension_numbers<[1], [0], [0], [1], [0, 0, 1, 1], [], []>} : vector<256x64xbf16>, vector<64x64xbf16>, vector<256x64xf32> -> vector<256x64xf32>
    %25 = arith.addf %18, %24 : vector<256x64xf32>
    %c0_21 = arith.constant 0 : index
    %c8_22 = arith.constant 8 : index
    %c0_23 = arith.constant 0 : index
    %26 = vector.load %arg14[%c0_21, %c8_22, %c0_23] : memref<18x32x64xf32, #tpu.memory_space<vmem>>, vector<16x16x64xf32>
    %27 = vector.shape_cast %26 : vector<16x16x64xf32> to vector<256x64xf32>
    %28 = arith.truncf %27 : vector<256x64xf32> to vector<256x64xbf16>
    %c1_24 = arith.constant 1 : index
    %c0_25 = arith.constant 0 : index
    %c0_26 = arith.constant 0 : index
    %29 = vector.load %arg5[%c1_24, %c0_25, %c0_26] : memref<9x64x64xbf16, #tpu.memory_space<vmem>>, vector<1x64x64xbf16>
    %30 = vector.shape_cast %29 : vector<1x64x64xbf16> to vector<64x64xbf16>
    %cst_27 = arith.constant dense<0.000000e+00> : vector<256x64xf32>
    %31 = tpu.matmul %28, %30, %cst_27 {dimension_numbers = #tpu.dot_dimension_numbers<[1], [0], [0], [1], [0, 0, 1, 1], [], []>} : vector<256x64xbf16>, vector<64x64xbf16>, vector<256x64xf32> -> vector<256x64xf32>
    %32 = arith.addf %25, %31 : vector<256x64xf32>
    %c0_28 = arith.constant 0 : index
    %c9 = arith.constant 9 : index
    %c0_29 = arith.constant 0 : index
    %33 = vector.load %arg14[%c0_28, %c9, %c0_29] : memref<18x32x64xf32, #tpu.memory_space<vmem>>, vector<16x16x64xf32>
    %34 = vector.shape_cast %33 : vector<16x16x64xf32> to vector<256x64xf32>
    %35 = arith.truncf %34 : vector<256x64xf32> to vector<256x64xbf16>
    %c2 = arith.constant 2 : index
    %c0_30 = arith.constant 0 : index
    %c0_31 = arith.constant 0 : index
    %36 = vector.load %arg5[%c2, %c0_30, %c0_31] : memref<9x64x64xbf16, #tpu.memory_space<vmem>>, vector<1x64x64xbf16>
    %37 = vector.shape_cast %36 : vector<1x64x64xbf16> to vector<64x64xbf16>
    %cst_32 = arith.constant dense<0.000000e+00> : vector<256x64xf32>
    %38 = tpu.matmul %35, %37, %cst_32 {dimension_numbers = #tpu.dot_dimension_numbers<[1], [0], [0], [1], [0, 0, 1, 1], [], []>} : vector<256x64xbf16>, vector<64x64xbf16>, vector<256x64xf32> -> vector<256x64xf32>
    %39 = arith.addf %32, %38 : vector<256x64xf32>
    %c1_33 = arith.constant 1 : index
    %c7_34 = arith.constant 7 : index
    %c0_35 = arith.constant 0 : index
    %40 = vector.load %arg14[%c1_33, %c7_34, %c0_35] : memref<18x32x64xf32, #tpu.memory_space<vmem>>, vector<16x16x64xf32>
    %41 = vector.shape_cast %40 : vector<16x16x64xf32> to vector<256x64xf32>
    %42 = arith.truncf %41 : vector<256x64xf32> to vector<256x64xbf16>
    %c3 = arith.constant 3 : index
    %c0_36 = arith.constant 0 : index
    %c0_37 = arith.constant 0 : index
    %43 = vector.load %arg5[%c3, %c0_36, %c0_37] : memref<9x64x64xbf16, #tpu.memory_space<vmem>>, vector<1x64x64xbf16>
    %44 = vector.shape_cast %43 : vector<1x64x64xbf16> to vector<64x64xbf16>
    %cst_38 = arith.constant dense<0.000000e+00> : vector<256x64xf32>
    %45 = tpu.matmul %42, %44, %cst_38 {dimension_numbers = #tpu.dot_dimension_numbers<[1], [0], [0], [1], [0, 0, 1, 1], [], []>} : vector<256x64xbf16>, vector<64x64xbf16>, vector<256x64xf32> -> vector<256x64xf32>
    %46 = arith.addf %39, %45 : vector<256x64xf32>
    %c1_39 = arith.constant 1 : index
    %c8_40 = arith.constant 8 : index
    %c0_41 = arith.constant 0 : index
    %47 = vector.load %arg14[%c1_39, %c8_40, %c0_41] : memref<18x32x64xf32, #tpu.memory_space<vmem>>, vector<16x16x64xf32>
    %48 = vector.shape_cast %47 : vector<16x16x64xf32> to vector<256x64xf32>
    %49 = arith.truncf %48 : vector<256x64xf32> to vector<256x64xbf16>
    %c4 = arith.constant 4 : index
    %c0_42 = arith.constant 0 : index
    %c0_43 = arith.constant 0 : index
    %50 = vector.load %arg5[%c4, %c0_42, %c0_43] : memref<9x64x64xbf16, #tpu.memory_space<vmem>>, vector<1x64x64xbf16>
    %51 = vector.shape_cast %50 : vector<1x64x64xbf16> to vector<64x64xbf16>
    %cst_44 = arith.constant dense<0.000000e+00> : vector<256x64xf32>
    %52 = tpu.matmul %49, %51, %cst_44 {dimension_numbers = #tpu.dot_dimension_numbers<[1], [0], [0], [1], [0, 0, 1, 1], [], []>} : vector<256x64xbf16>, vector<64x64xbf16>, vector<256x64xf32> -> vector<256x64xf32>
    %53 = arith.addf %46, %52 : vector<256x64xf32>
    %c1_45 = arith.constant 1 : index
    %c9_46 = arith.constant 9 : index
    %c0_47 = arith.constant 0 : index
    %54 = vector.load %arg14[%c1_45, %c9_46, %c0_47] : memref<18x32x64xf32, #tpu.memory_space<vmem>>, vector<16x16x64xf32>
    %55 = vector.shape_cast %54 : vector<16x16x64xf32> to vector<256x64xf32>
    %56 = arith.truncf %55 : vector<256x64xf32> to vector<256x64xbf16>
    %c5 = arith.constant 5 : index
    %c0_48 = arith.constant 0 : index
    %c0_49 = arith.constant 0 : index
    %57 = vector.load %arg5[%c5, %c0_48, %c0_49] : memref<9x64x64xbf16, #tpu.memory_space<vmem>>, vector<1x64x64xbf16>
    %58 = vector.shape_cast %57 : vector<1x64x64xbf16> to vector<64x64xbf16>
    %cst_50 = arith.constant dense<0.000000e+00> : vector<256x64xf32>
    %59 = tpu.matmul %56, %58, %cst_50 {dimension_numbers = #tpu.dot_dimension_numbers<[1], [0], [0], [1], [0, 0, 1, 1], [], []>} : vector<256x64xbf16>, vector<64x64xbf16>, vector<256x64xf32> -> vector<256x64xf32>
    %60 = arith.addf %53, %59 : vector<256x64xf32>
    %c2_51 = arith.constant 2 : index
    %c7_52 = arith.constant 7 : index
    %c0_53 = arith.constant 0 : index
    %61 = vector.load %arg14[%c2_51, %c7_52, %c0_53] : memref<18x32x64xf32, #tpu.memory_space<vmem>>, vector<16x16x64xf32>
    %62 = vector.shape_cast %61 : vector<16x16x64xf32> to vector<256x64xf32>
    %63 = arith.truncf %62 : vector<256x64xf32> to vector<256x64xbf16>
    %c6 = arith.constant 6 : index
    %c0_54 = arith.constant 0 : index
    %c0_55 = arith.constant 0 : index
    %64 = vector.load %arg5[%c6, %c0_54, %c0_55] : memref<9x64x64xbf16, #tpu.memory_space<vmem>>, vector<1x64x64xbf16>
    %65 = vector.shape_cast %64 : vector<1x64x64xbf16> to vector<64x64xbf16>
    %cst_56 = arith.constant dense<0.000000e+00> : vector<256x64xf32>
    %66 = tpu.matmul %63, %65, %cst_56 {dimension_numbers = #tpu.dot_dimension_numbers<[1], [0], [0], [1], [0, 0, 1, 1], [], []>} : vector<256x64xbf16>, vector<64x64xbf16>, vector<256x64xf32> -> vector<256x64xf32>
    %67 = arith.addf %60, %66 : vector<256x64xf32>
    %c2_57 = arith.constant 2 : index
    %c8_58 = arith.constant 8 : index
    %c0_59 = arith.constant 0 : index
    %68 = vector.load %arg14[%c2_57, %c8_58, %c0_59] : memref<18x32x64xf32, #tpu.memory_space<vmem>>, vector<16x16x64xf32>
    %69 = vector.shape_cast %68 : vector<16x16x64xf32> to vector<256x64xf32>
    %70 = arith.truncf %69 : vector<256x64xf32> to vector<256x64xbf16>
    %c7_60 = arith.constant 7 : index
    %c0_61 = arith.constant 0 : index
    %c0_62 = arith.constant 0 : index
    %71 = vector.load %arg5[%c7_60, %c0_61, %c0_62] : memref<9x64x64xbf16, #tpu.memory_space<vmem>>, vector<1x64x64xbf16>
    %72 = vector.shape_cast %71 : vector<1x64x64xbf16> to vector<64x64xbf16>
    %cst_63 = arith.constant dense<0.000000e+00> : vector<256x64xf32>
    %73 = tpu.matmul %70, %72, %cst_63 {dimension_numbers = #tpu.dot_dimension_numbers<[1], [0], [0], [1], [0, 0, 1, 1], [], []>} : vector<256x64xbf16>, vector<64x64xbf16>, vector<256x64xf32> -> vector<256x64xf32>
    %74 = arith.addf %67, %73 : vector<256x64xf32>
    %c2_64 = arith.constant 2 : index
    %c9_65 = arith.constant 9 : index
    %c0_66 = arith.constant 0 : index
    %75 = vector.load %arg14[%c2_64, %c9_65, %c0_66] : memref<18x32x64xf32, #tpu.memory_space<vmem>>, vector<16x16x64xf32>
    %76 = vector.shape_cast %75 : vector<16x16x64xf32> to vector<256x64xf32>
    %77 = arith.truncf %76 : vector<256x64xf32> to vector<256x64xbf16>
    %c8_67 = arith.constant 8 : index
    %c0_68 = arith.constant 0 : index
    %c0_69 = arith.constant 0 : index
    %78 = vector.load %arg5[%c8_67, %c0_68, %c0_69] : memref<9x64x64xbf16, #tpu.memory_space<vmem>>, vector<1x64x64xbf16>
    %79 = vector.shape_cast %78 : vector<1x64x64xbf16> to vector<64x64xbf16>
    %cst_70 = arith.constant dense<0.000000e+00> : vector<256x64xf32>
    %80 = tpu.matmul %77, %79, %cst_70 {dimension_numbers = #tpu.dot_dimension_numbers<[1], [0], [0], [1], [0, 0, 1, 1], [], []>} : vector<256x64xbf16>, vector<64x64xbf16>, vector<256x64xf32> -> vector<256x64xf32>
    %81 = arith.addf %74, %80 : vector<256x64xf32>
    %c0_71 = arith.constant 0 : index
    %c0_72 = arith.constant 0 : index
    %82 = vector.load %arg6[%c0_71, %c0_72] : memref<1x64xf32, #tpu.memory_space<vmem>>, vector<1x64xf32>
    %83 = vector.broadcast %82 : vector<1x64xf32> to vector<256x64xf32>
    %84 = arith.addf %81, %83 : vector<256x64xf32>
    %cst_73 = arith.constant 0.000000e+00 : f32
    %85 = vector.broadcast %cst_73 : f32 to vector<256x64xf32>
    %86 = arith.maximumf %84, %85 : vector<256x64xf32>
    %cst_74 = arith.constant 0.000000e+00 : f32
    %87 = vector.broadcast %cst_74 : f32 to vector<18x32x64xf32>
    %c0_75 = arith.constant 0 : index
    %c0_76 = arith.constant 0 : index
    %c0_77 = arith.constant 0 : index
    %88 = vector.load %arg15[%c0_75, %c0_76, %c0_77] : memref<18x32x64xf32, #tpu.memory_space<vmem>>, vector<18x32x64xf32>
    tpu.vector_store %arg15[%c0_75, %c0_76, %c0_77], %87 {strides = array<i32>} : memref<18x32x64xf32, #tpu.memory_space<vmem>>, vector<18x32x64xf32>,
    %89 = vector.shape_cast %86 : vector<256x64xf32> to vector<16x16x64xf32>
    %c1_78 = arith.constant 1 : index
    %c8_79 = arith.constant 8 : index
    %c0_80 = arith.constant 0 : index
    %90 = vector.load %arg15[%c1_78, %c8_79, %c0_80] : memref<18x32x64xf32, #tpu.memory_space<vmem>>, vector<16x16x64xf32>
    tpu.vector_store %arg15[%c1_78, %c8_79, %c0_80], %89 {strides = array<i32>} : memref<18x32x64xf32, #tpu.memory_space<vmem>>, vector<16x16x64xf32>,
    %cst_81 = arith.constant 0.000000e+00 : f32
    %91 = vector.broadcast %cst_81 : f32 to vector<256x128xf32>
    %c0_82 = arith.constant 0 : index
    %c7_83 = arith.constant 7 : index
    %c0_84 = arith.constant 0 : index
    %92 = vector.load %arg15[%c0_82, %c7_83, %c0_84] : memref<18x32x64xf32, #tpu.memory_space<vmem>>, vector<16x16x64xf32>
    %93 = vector.shape_cast %92 : vector<16x16x64xf32> to vector<256x64xf32>
    %94 = arith.truncf %93 : vector<256x64xf32> to vector<256x64xbf16>
    %c0_85 = arith.constant 0 : index
    %c0_86 = arith.constant 0 : index
    %c0_87 = arith.constant 0 : index
    %95 = vector.load %arg7[%c0_85, %c0_86, %c0_87] : memref<9x64x128xbf16, #tpu.memory_space<vmem>>, vector<1x64x128xbf16>
    %96 = vector.shape_cast %95 : vector<1x64x128xbf16> to vector<64x128xbf16>
    %cst_88 = arith.constant dense<0.000000e+00> : vector<256x128xf32>
    %97 = tpu.matmul %94, %96, %cst_88 {dimension_numbers = #tpu.dot_dimension_numbers<[1], [0], [0], [1], [0, 0, 1, 1], [], []>} : vector<256x64xbf16>, vector<64x128xbf16>, vector<256x128xf32> -> vector<256x128xf32>
    %98 = arith.addf %91, %97 : vector<256x128xf32>
    %c0_89 = arith.constant 0 : index
    %c8_90 = arith.constant 8 : index
    %c0_91 = arith.constant 0 : index
    %99 = vector.load %arg15[%c0_89, %c8_90, %c0_91] : memref<18x32x64xf32, #tpu.memory_space<vmem>>, vector<16x16x64xf32>
    %100 = vector.shape_cast %99 : vector<16x16x64xf32> to vector<256x64xf32>
    %101 = arith.truncf %100 : vector<256x64xf32> to vector<256x64xbf16>
    %c1_92 = arith.constant 1 : index
    %c0_93 = arith.constant 0 : index
    %c0_94 = arith.constant 0 : index
    %102 = vector.load %arg7[%c1_92, %c0_93, %c0_94] : memref<9x64x128xbf16, #tpu.memory_space<vmem>>, vector<1x64x128xbf16>
    %103 = vector.shape_cast %102 : vector<1x64x128xbf16> to vector<64x128xbf16>
    %cst_95 = arith.constant dense<0.000000e+00> : vector<256x128xf32>
    %104 = tpu.matmul %101, %103, %cst_95 {dimension_numbers = #tpu.dot_dimension_numbers<[1], [0], [0], [1], [0, 0, 1, 1], [], []>} : vector<256x64xbf16>, vector<64x128xbf16>, vector<256x128xf32> -> vector<256x128xf32>
    %105 = arith.addf %98, %104 : vector<256x128xf32>
    %c0_96 = arith.constant 0 : index
    %c9_97 = arith.constant 9 : index
    %c0_98 = arith.constant 0 : index
    %106 = vector.load %arg15[%c0_96, %c9_97, %c0_98] : memref<18x32x64xf32, #tpu.memory_space<vmem>>, vector<16x16x64xf32>
    %107 = vector.shape_cast %106 : vector<16x16x64xf32> to vector<256x64xf32>
    %108 = arith.truncf %107 : vector<256x64xf32> to vector<256x64xbf16>
    %c2_99 = arith.constant 2 : index
    %c0_100 = arith.constant 0 : index
    %c0_101 = arith.constant 0 : index
    %109 = vector.load %arg7[%c2_99, %c0_100, %c0_101] : memref<9x64x128xbf16, #tpu.memory_space<vmem>>, vector<1x64x128xbf16>
    %110 = vector.shape_cast %109 : vector<1x64x128xbf16> to vector<64x128xbf16>
    %cst_102 = arith.constant dense<0.000000e+00> : vector<256x128xf32>
    %111 = tpu.matmul %108, %110, %cst_102 {dimension_numbers = #tpu.dot_dimension_numbers<[1], [0], [0], [1], [0, 0, 1, 1], [], []>} : vector<256x64xbf16>, vector<64x128xbf16>, vector<256x128xf32> -> vector<256x128xf32>
    %112 = arith.addf %105, %111 : vector<256x128xf32>
    %c1_103 = arith.constant 1 : index
    %c7_104 = arith.constant 7 : index
    %c0_105 = arith.constant 0 : index
    %113 = vector.load %arg15[%c1_103, %c7_104, %c0_105] : memref<18x32x64xf32, #tpu.memory_space<vmem>>, vector<16x16x64xf32>
    %114 = vector.shape_cast %113 : vector<16x16x64xf32> to vector<256x64xf32>
    %115 = arith.truncf %114 : vector<256x64xf32> to vector<256x64xbf16>
    %c3_106 = arith.constant 3 : index
    %c0_107 = arith.constant 0 : index
    %c0_108 = arith.constant 0 : index
    %116 = vector.load %arg7[%c3_106, %c0_107, %c0_108] : memref<9x64x128xbf16, #tpu.memory_space<vmem>>, vector<1x64x128xbf16>
    %117 = vector.shape_cast %116 : vector<1x64x128xbf16> to vector<64x128xbf16>
    %cst_109 = arith.constant dense<0.000000e+00> : vector<256x128xf32>
    %118 = tpu.matmul %115, %117, %cst_109 {dimension_numbers = #tpu.dot_dimension_numbers<[1], [0], [0], [1], [0, 0, 1, 1], [], []>} : vector<256x64xbf16>, vector<64x128xbf16>, vector<256x128xf32> -> vector<256x128xf32>
    %119 = arith.addf %112, %118 : vector<256x128xf32>
    %c1_110 = arith.constant 1 : index
    %c8_111 = arith.constant 8 : index
    %c0_112 = arith.constant 0 : index
    %120 = vector.load %arg15[%c1_110, %c8_111, %c0_112] : memref<18x32x64xf32, #tpu.memory_space<vmem>>, vector<16x16x64xf32>
    %121 = vector.shape_cast %120 : vector<16x16x64xf32> to vector<256x64xf32>
    %122 = arith.truncf %121 : vector<256x64xf32> to vector<256x64xbf16>
    %c4_113 = arith.constant 4 : index
    %c0_114 = arith.constant 0 : index
    %c0_115 = arith.constant 0 : index
    %123 = vector.load %arg7[%c4_113, %c0_114, %c0_115] : memref<9x64x128xbf16, #tpu.memory_space<vmem>>, vector<1x64x128xbf16>
    %124 = vector.shape_cast %123 : vector<1x64x128xbf16> to vector<64x128xbf16>
    %cst_116 = arith.constant dense<0.000000e+00> : vector<256x128xf32>
    %125 = tpu.matmul %122, %124, %cst_116 {dimension_numbers = #tpu.dot_dimension_numbers<[1], [0], [0], [1], [0, 0, 1, 1], [], []>} : vector<256x64xbf16>, vector<64x128xbf16>, vector<256x128xf32> -> vector<256x128xf32>
    %126 = arith.addf %119, %125 : vector<256x128xf32>
    %c1_117 = arith.constant 1 : index
    %c9_118 = arith.constant 9 : index
    %c0_119 = arith.constant 0 : index
    %127 = vector.load %arg15[%c1_117, %c9_118, %c0_119] : memref<18x32x64xf32, #tpu.memory_space<vmem>>, vector<16x16x64xf32>
    %128 = vector.shape_cast %127 : vector<16x16x64xf32> to vector<256x64xf32>
    %129 = arith.truncf %128 : vector<256x64xf32> to vector<256x64xbf16>
    %c5_120 = arith.constant 5 : index
    %c0_121 = arith.constant 0 : index
    %c0_122 = arith.constant 0 : index
    %130 = vector.load %arg7[%c5_120, %c0_121, %c0_122] : memref<9x64x128xbf16, #tpu.memory_space<vmem>>, vector<1x64x128xbf16>
    %131 = vector.shape_cast %130 : vector<1x64x128xbf16> to vector<64x128xbf16>
    %cst_123 = arith.constant dense<0.000000e+00> : vector<256x128xf32>
    %132 = tpu.matmul %129, %131, %cst_123 {dimension_numbers = #tpu.dot_dimension_numbers<[1], [0], [0], [1], [0, 0, 1, 1], [], []>} : vector<256x64xbf16>, vector<64x128xbf16>, vector<256x128xf32> -> vector<256x128xf32>
    %133 = arith.addf %126, %132 : vector<256x128xf32>
    %c2_124 = arith.constant 2 : index
    %c7_125 = arith.constant 7 : index
    %c0_126 = arith.constant 0 : index
    %134 = vector.load %arg15[%c2_124, %c7_125, %c0_126] : memref<18x32x64xf32, #tpu.memory_space<vmem>>, vector<16x16x64xf32>
    %135 = vector.shape_cast %134 : vector<16x16x64xf32> to vector<256x64xf32>
    %136 = arith.truncf %135 : vector<256x64xf32> to vector<256x64xbf16>
    %c6_127 = arith.constant 6 : index
    %c0_128 = arith.constant 0 : index
    %c0_129 = arith.constant 0 : index
    %137 = vector.load %arg7[%c6_127, %c0_128, %c0_129] : memref<9x64x128xbf16, #tpu.memory_space<vmem>>, vector<1x64x128xbf16>
    %138 = vector.shape_cast %137 : vector<1x64x128xbf16> to vector<64x128xbf16>
    %cst_130 = arith.constant dense<0.000000e+00> : vector<256x128xf32>
    %139 = tpu.matmul %136, %138, %cst_130 {dimension_numbers = #tpu.dot_dimension_numbers<[1], [0], [0], [1], [0, 0, 1, 1], [], []>} : vector<256x64xbf16>, vector<64x128xbf16>, vector<256x128xf32> -> vector<256x128xf32>
    %140 = arith.addf %133, %139 : vector<256x128xf32>
    %c2_131 = arith.constant 2 : index
    %c8_132 = arith.constant 8 : index
    %c0_133 = arith.constant 0 : index
    %141 = vector.load %arg15[%c2_131, %c8_132, %c0_133] : memref<18x32x64xf32, #tpu.memory_space<vmem>>, vector<16x16x64xf32>
    %142 = vector.shape_cast %141 : vector<16x16x64xf32> to vector<256x64xf32>
    %143 = arith.truncf %142 : vector<256x64xf32> to vector<256x64xbf16>
    %c7_134 = arith.constant 7 : index
    %c0_135 = arith.constant 0 : index
    %c0_136 = arith.constant 0 : index
    %144 = vector.load %arg7[%c7_134, %c0_135, %c0_136] : memref<9x64x128xbf16, #tpu.memory_space<vmem>>, vector<1x64x128xbf16>
    %145 = vector.shape_cast %144 : vector<1x64x128xbf16> to vector<64x128xbf16>
    %cst_137 = arith.constant dense<0.000000e+00> : vector<256x128xf32>
    %146 = tpu.matmul %143, %145, %cst_137 {dimension_numbers = #tpu.dot_dimension_numbers<[1], [0], [0], [1], [0, 0, 1, 1], [], []>} : vector<256x64xbf16>, vector<64x128xbf16>, vector<256x128xf32> -> vector<256x128xf32>
    %147 = arith.addf %140, %146 : vector<256x128xf32>
    %c2_138 = arith.constant 2 : index
    %c9_139 = arith.constant 9 : index
    %c0_140 = arith.constant 0 : index
    %148 = vector.load %arg15[%c2_138, %c9_139, %c0_140] : memref<18x32x64xf32, #tpu.memory_space<vmem>>, vector<16x16x64xf32>
    %149 = vector.shape_cast %148 : vector<16x16x64xf32> to vector<256x64xf32>
    %150 = arith.truncf %149 : vector<256x64xf32> to vector<256x64xbf16>
    %c8_141 = arith.constant 8 : index
    %c0_142 = arith.constant 0 : index
    %c0_143 = arith.constant 0 : index
    %151 = vector.load %arg7[%c8_141, %c0_142, %c0_143] : memref<9x64x128xbf16, #tpu.memory_space<vmem>>, vector<1x64x128xbf16>
    %152 = vector.shape_cast %151 : vector<1x64x128xbf16> to vector<64x128xbf16>
    %cst_144 = arith.constant dense<0.000000e+00> : vector<256x128xf32>
    %153 = tpu.matmul %150, %152, %cst_144 {dimension_numbers = #tpu.dot_dimension_numbers<[1], [0], [0], [1], [0, 0, 1, 1], [], []>} : vector<256x64xbf16>, vector<64x128xbf16>, vector<256x128xf32> -> vector<256x128xf32>
    %154 = arith.addf %147, %153 : vector<256x128xf32>
    %c0_145 = arith.constant 0 : index
    %c0_146 = arith.constant 0 : index
    %155 = vector.load %arg8[%c0_145, %c0_146] : memref<1x128xf32, #tpu.memory_space<vmem>>, vector<1x128xf32>
    %156 = vector.broadcast %155 : vector<1x128xf32> to vector<256x128xf32>
    %157 = arith.addf %154, %156 : vector<256x128xf32>
    %c0_147 = arith.constant 0 : index
    %c0_148 = arith.constant 0 : index
    %158 = vector.load %arg2[%c0_147, %c0_148] : memref<256x1xf32, #tpu.memory_space<vmem>>, vector<256x1xf32>
    %cst_149 = arith.constant 0.000000e+00 : f32
    %159 = vector.broadcast %cst_149 : f32 to vector<256x128xf32>
    %160 = arith.maximumf %157, %159 : vector<256x128xf32>
    %161 = vector.broadcast %158 : vector<256x1xf32> to vector<256x128xf32>
    %162 = arith.mulf %161, %160 : vector<256x128xf32>
    %163 = arith.truncf %162 : vector<256x128xf32> to vector<256x128xbf16>
    %c0_150 = arith.constant 0 : index
    %c0_151 = arith.constant 0 : index
    %164 = vector.load %arg9[%c0_150, %c0_151] : memref<128x256xbf16, #tpu.memory_space<vmem>>, vector<128x256xbf16>
    %cst_152 = arith.constant dense<0.000000e+00> : vector<256x256xf32>
    %165 = tpu.matmul %163, %164, %cst_152 {dimension_numbers = #tpu.dot_dimension_numbers<[1], [0], [0], [1], [0, 0, 1, 1], [], []>} : vector<256x128xbf16>, vector<128x256xbf16>, vector<256x256xf32> -> vector<256x256xf32>
    %c0_153 = arith.constant 0 : index
    %c0_154 = arith.constant 0 : index
    %166 = vector.load %arg10[%c0_153, %c0_154] : memref<1x256xf32, #tpu.memory_space<vmem>>, vector<1x256xf32>
    %167 = vector.broadcast %166 : vector<1x256xf32> to vector<256x256xf32>
    %168 = arith.addf %165, %167 : vector<256x256xf32>
    %cst_155 = arith.constant 0.000000e+00 : f32
    %169 = vector.broadcast %cst_155 : f32 to vector<256x256xf32>
    %170 = arith.maximumf %168, %169 : vector<256x256xf32>
    %c0_156 = arith.constant 0 : index
    %c0_157 = arith.constant 0 : index
    %171 = vector.load %arg11[%c0_156, %c0_157] : memref<4x256xf32, #tpu.memory_space<vmem>>, vector<4x256xf32>
    %cst_158 = arith.constant dense<0.000000e+00> : vector<256x256xf32>
    %172 = tpu.matmul %1, %171, %cst_158 {dimension_numbers = #tpu.dot_dimension_numbers<[1], [0], [0], [1], [0, 0, 1, 1], [], []>} : vector<256x4xf32>, vector<4x256xf32>, vector<256x256xf32> -> vector<256x256xf32>
    %c0_159 = arith.constant 0 : index
    %c0_160 = arith.constant 0 : index
    %173 = vector.load %arg12[%c0_159, %c0_160] : memref<1x256xf32, #tpu.memory_space<vmem>>, vector<1x256xf32>
    %174 = vector.broadcast %173 : vector<1x256xf32> to vector<256x256xf32>
    %175 = arith.addf %172, %174 : vector<256x256xf32>
    %176 = arith.addf %170, %175 : vector<256x256xf32>
    %cst_161 = arith.constant 0.000000e+00 : f32
    %177 = vector.broadcast %cst_161 : f32 to vector<256x256xf32>
    %178 = arith.maximumf %176, %177 : vector<256x256xf32>
    %c0_162 = arith.constant 0 : index
    %c0_163 = arith.constant 0 : index
    %c0_164 = arith.constant 0 : index
    %179 = vector.load %arg13[%c0_162, %c0_163, %c0_164] : memref<1x256x256xf32, #tpu.memory_space<vmem>>, vector<1x256x256xf32>
    %180 = vector.shape_cast %179 : vector<1x256x256xf32> to vector<256x256xf32>
    %181 = vector.shape_cast %178 : vector<256x256xf32> to vector<1x256x256xf32>
    tpu.vector_store %arg13[%c0_162, %c0_163, %c0_164], %181 {strides = array<i32>} : memref<1x256x256xf32, #tpu.memory_space<vmem>>, vector<1x256x256xf32>,
    return
  }
  func.func @transform_0(%arg0: i32) -> (i32, i32, i32) {
    %c0_i32 = arith.constant 0 : i32
    %c0_i32_0 = arith.constant 0 : i32
    %c0_i32_1 = arith.constant 0 : i32
    return %arg0, %c0_i32, %c0_i32_0 : i32, i32, i32
  }
  func.func @transform_1(%arg0: i32) -> (i32, i32) {
    %c0_i32 = arith.constant 0 : i32
    %c0_i32_0 = arith.constant 0 : i32
    %c0_i32_1 = arith.constant 0 : i32
    return %c0_i32, %c0_i32_0 : i32, i32
  }
  func.func @transform_2(%arg0: i32) -> (i32, i32) {
    %c0_i32 = arith.constant 0 : i32
    %c0_i32_0 = arith.constant 0 : i32
    %c0_i32_1 = arith.constant 0 : i32
    return %c0_i32, %c0_i32_0 : i32, i32
  }
  func.func @transform_3(%arg0: i32) -> (i32, i32) {
    %c0_i32 = arith.constant 0 : i32
    %c0_i32_0 = arith.constant 0 : i32
    %c0_i32_1 = arith.constant 0 : i32
    return %c0_i32, %c0_i32_0 : i32, i32
  }
  func.func @transform_4(%arg0: i32) -> (i32, i32, i32) {
    %c0_i32 = arith.constant 0 : i32
    %c0_i32_0 = arith.constant 0 : i32
    %c0_i32_1 = arith.constant 0 : i32
    %c0_i32_2 = arith.constant 0 : i32
    return %c0_i32, %c0_i32_0, %c0_i32_1 : i32, i32, i32
  }
  func.func @transform_5(%arg0: i32) -> (i32, i32) {
    %c0_i32 = arith.constant 0 : i32
    %c0_i32_0 = arith.constant 0 : i32
    %c0_i32_1 = arith.constant 0 : i32
    return %c0_i32, %c0_i32_0 : i32, i32
  }
  func.func @transform_6(%arg0: i32) -> (i32, i32, i32) {
    %c0_i32 = arith.constant 0 : i32
    %c0_i32_0 = arith.constant 0 : i32
    %c0_i32_1 = arith.constant 0 : i32
    %c0_i32_2 = arith.constant 0 : i32
    return %c0_i32, %c0_i32_0, %c0_i32_1 : i32, i32, i32
  }
  func.func @transform_7(%arg0: i32) -> (i32, i32) {
    %c0_i32 = arith.constant 0 : i32
    %c0_i32_0 = arith.constant 0 : i32
    %c0_i32_1 = arith.constant 0 : i32
    return %c0_i32, %c0_i32_0 : i32, i32
  }
  func.func @transform_8(%arg0: i32) -> (i32, i32) {
    %c0_i32 = arith.constant 0 : i32
    %c0_i32_0 = arith.constant 0 : i32
    %c0_i32_1 = arith.constant 0 : i32
    return %c0_i32, %c0_i32_0 : i32, i32
  }
  func.func @transform_9(%arg0: i32) -> (i32, i32) {
    %c0_i32 = arith.constant 0 : i32
    %c0_i32_0 = arith.constant 0 : i32
    %c0_i32_1 = arith.constant 0 : i32
    return %c0_i32, %c0_i32_0 : i32, i32
  }
  func.func @transform_10(%arg0: i32) -> (i32, i32) {
    %c0_i32 = arith.constant 0 : i32
    %c0_i32_0 = arith.constant 0 : i32
    %c0_i32_1 = arith.constant 0 : i32
    return %c0_i32, %c0_i32_0 : i32, i32
  }
  func.func @transform_11(%arg0: i32) -> (i32, i32) {
    %c0_i32 = arith.constant 0 : i32
    %c0_i32_0 = arith.constant 0 : i32
    %c0_i32_1 = arith.constant 0 : i32
    return %c0_i32, %c0_i32_0 : i32, i32
  }
  func.func @transform_12(%arg0: i32) -> (i32, i32, i32) {
    %c0_i32 = arith.constant 0 : i32
    %c0_i32_0 = arith.constant 0 : i32
    %c0_i32_1 = arith.constant 0 : i32
    return %arg0, %c0_i32, %c0_i32_0 : i32, i32, i32
  }
}

</mosaic_0001>

<bundles_post_ra>
// kernel: residual_block_4_forward.1
= control target key start
LH: loop header
LB: loop body
LE: loop exit
PB: predicated region body
PF: predicated region fallthrough
CT: control target
= control target key end

     0   :  { %s12909_s0 = inlined_call_operand.vmem [shape: f32[2,256,4], index: 0, kind: input, shape index: {}]   ;;  %s12910_s1 = inlined_call_operand.vmem [shape: f32[256,1], index: 1, kind: input, shape index: {}]   ;;  %s12911_s2 = inlined_call_operand.vmem [shape: f32[4,64], index: 2, kind: input, shape index: {}]   ;;  %s12912_s3 = inlined_call_operand.vmem [shape: f32[1,64], index: 3, kind: input, shape index: {}]   ;;  %s12913_s4 = inlined_call_operand.vmem [shape: bf16[9,64,64], index: 4, kind: input, shape index: {}]   ;;  %s12914_s5 = inlined_call_operand.vmem [shape: f32[1,64], index: 5, kind: input, shape index: {}]   ;;  %s12915_s6 = inlined_call_operand.vmem [shape: bf16[9,64,128], index: 6, kind: input, shape index: {}]   ;;  %s12916_s7 = inlined_call_operand.vmem [shape: f32[1,128], index: 7, kind: input, shape index: {}]   ;;  %s12917_s8 = inlined_call_operand.vmem [shape: bf16[128,256], index: 8, kind: input, shape index: {}]   ;;  %s12918_s9 = inlined_call_operand.vmem [shape: f32[1,256], index: 9, kind: input, shape index: {}]   ;;  %s12919_s10 = inlined_call_operand.vmem [shape: f32[4,256], index: 10, kind: input, shape index: {}]   ;;  %s12920_s11 = inlined_call_operand.vmem [shape: f32[1,256], index: 11, kind: input, shape index: {}]   ;;  %s12921_s12 = inlined_call_operand.hbm [shape: f32[2,256,256], index: 12, kind: output, shape index: {}]  }
   0x1   :  { %12922 = sst [smem:[#allocation28_spill]] %s12909_s0 }
   0x2   :  { %17 = vsyncpa [#allocation5], 0 }
   0x3   :  { %19 = vsyncpa [#allocation5 + $0x1], 0  ;;  %s10560_s21 = smov 0   ;;  %s10562_s22 = smov 0  }
   0x4   :  { %s10564_s23 = smov 0   ;;  %s10566_s24 = smov 0  }
   0x5 LB: > { %s10581_s25 = sadd.s32 4294967295, %s10488_s24   ;;  %s7988_s26 = sadd.s32 4294967294, %s10488_s24   ;;  %s10488_s24 = sphi %s10566_s24, %s12971_s24   ;;  %s10484_s23 = sphi %s10564_s23, %s12970_s23   ;;  %s10480_s22 = sphi %s10562_s22, %s12969_s22   ;;  %s10476_s21 = sphi %s10560_s21, %s12968_s21  }
   0x6   : > { %s10585_s27 = sadd.s32 1, %s10488_s24   ;;  %s289_s28 = sadd.s32 1, %s10484_s23 }
   0x7   : > { %s286_s29 = ssub.s32 %s10488_s24, %s10585_s27  ;;  %p299_p0 = scmp.ne.s32.totalorder %s10484_s23, %s10480_s22 }
   0x8   : > { %p287_p1 = scmp.eq.s32.totalorder %s286_s29, 0  ;;  %p300_p2 = scmp.eq.s32.totalorder %s10581_s25, 1 }
   0x9   : > { %p305_p3 = scmp.ne.s32.totalorder %s10480_s22, %s10476_s21  ;;  %p306_p4 = scmp.eq.s32.totalorder %s7988_s26, 1 }
   0xa   : > { %s10596_s30 = scalar_select %p287_p1, %s10484_s23, %s289_s28  }
   0xb   : > { %p10598_p5 = por %p300_p2, %p299_p0  ;;  %p10602_p6 = por %p306_p4, %p305_p3 }
   0xc   : > { %p7991_p7 = scmp.ge.s32.totalorder %s10488_s24, 1  ;;  %p365_p8 = scmp.lt.s32.totalorder %s10488_s24, 3 }
   0xe   : > { %p366_p9 = pnand %p7991_p7, %p365_p8 }
  0x10   : > { %369 = sbr.rel (%p366_p9) target bundleno = 2093 (0x82d), region = 68 }
  0x17   : > { %v445_v0 = vld [vmem:[%s12911_s2] sm:$0xf]  ;;  %vm550_vm0 = vcmask 1043456   ;;  %p407_p10 = scmp.lt.s32.totalorder %s10581_s25, 1  ;;  %vm453_vm1 = vcmask 31744   ;;  %s12925_s0 = sld [smem:[#allocation28_spill]]  ;;  %v448_v34 = vlaneseq }
  0x18   : > { %v10297_v1 = vld [vmem:[%s12913_s4 + $0x20] sm:$0xff]   ;;  %8968 = vmatprep.subr.msk.mxu0 %vm550_vm0, %v445_v0  ;;  %9738 = vmatprep.subr.msk.mxu1 %vm550_vm0, %v445_v0  ;;  %v10298_v9 = vld [vmem:[%s12913_s4 + $0x28] sm:$0xff]   ;;  %v10299_v16 = vld [vmem:[%s12913_s4 + $0x30] sm:$0xff]   ;;  %vm818_vm2 = vcmask 523264   ;;  %s404_s16 = sand.u32 1, %s10480_s22   ;;  %s10492_s15 = smov [#allocation4]  }
  0x19   : > { %8969 = vmatpush3.msk.msra.mxu0 %vm550_vm0, %v445_v0  ;;  %s408_s19 = scalar_select %p407_p10, %s10581_s25, 1  ;;  %9739 = vmatpush3.msk.msra.mxu1 %vm550_vm0, %v445_v0  ;;  %v10691_v35 = vshrl.u32 %v448_v34, 7  ;;  %v10696_v36 = vld [vmem:[%s12912_s3] sm:$0x1]  ;;  %v10300_v41 = vld [vmem:[%s12913_s4 + $0x38] sm:$0xff]  }
  0x1a   : > { %9018 = vmatprep.subr.bf16.mxu1 %v10297_v1  ;;  %v811_v38 = vmax.f32 %v10696_v36, 0.0  ;;  %v10860_v46 = vld [vmem:[%s12913_s4] sm:$0xff]   ;;  %s7992_s17 = sshll.u32 %s404_s16, 9 }
  0x1b   : > { %s8573_s20 = sshll.u32 %s408_s19, 8  ;;  %v10699_v37 = vsub.s32 0, %v10691_v35  ;;  %s12611_s18 = scalar_lea.vmem [#allocation4], %s7992_s17 }
  0x1c   : > { %s8574_s19 = sshll.u32 %s10581_s25, 13  ;;  %s12868_s25 = scalar_lea.sflag [#allocation5], %s404_s16 }
  0x1d   : > { %s10623_s29 = scalar_lea.vmem %s12925_s0, %s8573_s20  ;;  %v10703_v39 = vrot.slane %v811_v38, %v10699_v37  ;;  %v10865_v47 = vrot.slane %v10696_v36, %v10699_v37  ;;  %s7926_s20 = sshll.u32 %s12611_s18, 4  ;;  %s12861_s20 = int_to_ptr.vmem [resolvable:$true] %s7926_s20 }
  0x1e   : > { %v413_v2 = vld [vmem:[%s10623_s29] sm:$0xff]  ;;  %v414_v3 = vld [vmem:[%s10623_s29 + $0x8] sm:$0xff]  ;;  %v415_v4 = vld [vmem:[%s10623_s29 + $0x10] sm:$0xff]  ;;  %s12859_s26 = scalar_lea.hbm %s12921_s12, %s8574_s19  ;;  %s10426_s28 = scalar_lea.vmem %s12861_s20, 8192 }
  0x1f   : > { %8970 = vmatprep.mubr.msk.f32.mxu0 %vm453_vm1, %v413_v2  ;;  %v416_v5 = vld [vmem:[%s10623_s29 + $0x18] sm:$0xff]  ;;  %v417_v6 = vld [vmem:[%s10623_s29 + $0x20] sm:$0xff]  ;;  %v430_v8 = vld [vmem:[%s10623_s29 + $0x88] sm:$0xff]  ;;  %825 = vst.msk [vmem:[#allocation2 + $0x30] sm:$0xff] %vm818_vm2, %v10703_v39  ;;  %p10427_p11 = scmp.ne.s32.totalorder %s12861_s20, %s10426_s28  ;;  %s10430_s17 = sshll.u32 %s10492_s15, 4  ;;  %s10431_s17 = int_to_ptr.vmem [resolvable:$false] %s10430_s17 }
  0x20   : > { %8971 = vmatmul.mubr.msk.f32.vlgmr.msra.gmra.mrb[0].mxu0 %vm453_vm1, %v414_v3  ;;  %v429_v7 = vld [vmem:[%s10623_s29 + $0x80] sm:$0xff]  ;;  %v431_v10 = vld [vmem:[%s10623_s29 + $0x90] sm:$0xff]  ;;  %v418_v11 = vld [vmem:[%s10623_s29 + $0x28] sm:$0xff]  ;;  %819 = vst.msk [vmem:[#allocation2] sm:$0xff] %vm818_vm2, %v10703_v39  ;;  %s10432_s19 = scalar_lea.vmem %s10431_s17, 16384  ;;  %p10433_p0 = scmp.lt.s32.totalorder %s12861_s20, %s10431_s17 }
  0x21   : > { %8973 = vmatprep.mubr.msk.f32.mxu0 %vm453_vm1, %v415_v4  ;;  %8994 = vmatprep.mubr.msk.f32.mxu1 %vm453_vm1, %v429_v7  ;;  %v419_v12 = vld [vmem:[%s10623_s29 + $0x30] sm:$0xff]  ;;  %v432_v13 = vld [vmem:[%s10623_s29 + $0x98] sm:$0xff]  ;;  %v433_v15 = vld [vmem:[%s10623_s29 + $0xa0] sm:$0xff]  ;;  %820 = vst.msk [vmem:[#allocation2 + $0x8] sm:$0xff] %vm818_vm2, %v10703_v39  ;;  %p10428_p12 = pnand %p10427_p11, %p10598_p5  ;;  %p10434_p1 = scmp.lt.s32.totalorder %s10432_s19, %s10426_s28 }
  0x22   : > { %8995 = vmatmul.mubr.msk.f32.vlgmr.msra.gmra.mrb[0].mxu1 %vm453_vm1, %v430_v8  ;;  %v420_v14 = vld [vmem:[%s10623_s29 + $0x38] sm:$0xff]  ;;  %v421_v17 = vld [vmem:[%s10623_s29 + $0x40] sm:$0xff]  ;;  %v434_v18 = vld [vmem:[%s10623_s29 + $0xa8] sm:$0xff]  ;;  %821 = vst.msk [vmem:[#allocation2 + $0x10] sm:$0xff] %vm818_vm2, %v10703_v39 }
  0x23   : > { %8997 = vmatprep.mubr.msk.f32.mxu1 %vm453_vm1, %v431_v10  ;;  %9019 = vmatpush3.bf16.msra.mxu1 %v10297_v1  ;;  %v435_v19 = vld [vmem:[%s10623_s29 + $0xb0] sm:$0xff]  ;;  %v422_v20 = vld [vmem:[%s10623_s29 + $0x48] sm:$0xff]  ;;  %v436_v22 = vld [vmem:[%s10623_s29 + $0xb8] sm:$0xff]  ;;  %822 = vst.msk [vmem:[#allocation2 + $0x18] sm:$0xff] %vm818_vm2, %v10703_v39  ;;  %p10429_p13 = pneg %p10428_p12  ;;  %p10435_p2 = por %p10434_p1, %p10433_p0 }
  0x24   : > { %8974 = vmatmul.mubr.msk.f32.gmra.mrb[2].mxu0 %vm453_vm1, %v416_v5  ;;  %9020 = vmatprep.subr.bf16.mxu1 %v10298_v9  ;;  %v423_v21 = vld [vmem:[%s10623_s29 + $0x50] sm:$0xff]  ;;  %v437_v23 = vld [vmem:[%s10623_s29 + $0xc0] sm:$0xff]  ;;  %v424_v24 = vld [vmem:[%s10623_s29 + $0x58] sm:$0xff]  ;;  %823 = vst.msk [vmem:[#allocation2 + $0x20] sm:$0xff] %vm818_vm2, %v10703_v39 }
  0x25   : > { %8976 = vmatprep.mubr.msk.f32.mxu0 %vm453_vm1, %v417_v6  ;;  %v425_v25 = vld [vmem:[%s10623_s29 + $0x60] sm:$0xff]  ;;  %v438_v26 = vld [vmem:[%s10623_s29 + $0xc8] sm:$0xff]  ;;  %v439_v27 = vld [vmem:[%s10623_s29 + $0xd0] sm:$0xff]  ;;  %824 = vst.msk [vmem:[#allocation2 + $0x28] sm:$0xff] %vm818_vm2, %v10703_v39  ;;  %p10436_p3 = pnand %p10435_p2, %p10429_p13 }
  0x26   : > { %8998 = vmatmul.mubr.msk.f32.gmra.mrb[2].mxu1 %vm453_vm1, %v432_v13  ;;  %v426_v28 = vld [vmem:[%s10623_s29 + $0x68] sm:$0xff]  ;;  %v427_v29 = vld [vmem:[%s10623_s29 + $0x70] sm:$0xff]  ;;  %v440_v30 = vld [vmem:[%s10623_s29 + $0xd8] sm:$0xff]  ;;  %826 = vst.msk [vmem:[#allocation2 + $0x38] sm:$0xff] %vm818_vm2, %v10703_v39 }
  0x27   : > { %9000 = vmatprep.mubr.msk.f32.mxu1 %vm453_vm1, %v433_v15  ;;  %9021 = vmatpush3.bf16.msra.mxu1 %v10298_v9  ;;  %v441_v31 = vld [vmem:[%s10623_s29 + $0xe0] sm:$0xff]  ;;  %v428_v32 = vld [vmem:[%s10623_s29 + $0x78] sm:$0xff]  ;;  %v442_v33 = vld [vmem:[%s10623_s29 + $0xe8] sm:$0xff]  ;;  %827 = vst.msk [vmem:[#allocation2 + $0x40] sm:$0xff] %vm818_vm2, %v10703_v39 }
  0x28   : > { %8977 = vmatmul.mubr.msk.f32.gmra.mrb[4].mxu0 %vm453_vm1, %v418_v11  ;;  %9022 = vmatprep.subr.bf16.mxu1 %v10299_v16  ;;  %828 = vst.msk [vmem:[#allocation2 + $0x48] sm:$0xff] %vm818_vm2, %v10703_v39  ;;  %829 = vst.msk [vmem:[#allocation2 + $0x50] sm:$0xff] %vm818_vm2, %v10703_v39  ;;  %v443_v40 = vld [vmem:[%s10623_s29 + $0xf0] sm:$0xff]  ;;  %v444_v42 = vld [vmem:[%s10623_s29 + $0xf8] sm:$0xff] }
  0x29   : > { %8979 = vmatprep.mubr.msk.f32.mxu0 %vm453_vm1, %v419_v12  ;;  %830 = vst.msk [vmem:[#allocation2 + $0x58] sm:$0xff] %vm818_vm2, %v10703_v39  ;;  %831 = vst.msk [vmem:[#allocation2 + $0x60] sm:$0xff] %vm818_vm2, %v10703_v39  ;;  %v980_v43 = vld [vmem:[#allocation2 + $0x8] sm:$0xff]  ;;  %v981_v44 = vld [vmem:[#allocation2 + $0x10] sm:$0xff] }
  0x2a   : > { %9001 = vmatmul.mubr.msk.f32.gmra.mrb[4].mxu1 %vm453_vm1, %v434_v18  ;;  %832 = vst.msk [vmem:[#allocation2 + $0x68] sm:$0xff] %vm818_vm2, %v10703_v39  ;;  %833 = vst.msk [vmem:[#allocation2 + $0x70] sm:$0xff] %vm818_vm2, %v10703_v39  ;;  %v1012_v45 = vpack.c.bf16 %v981_v44, %v980_v43 }
  0x2b   : > { %9003 = vmatprep.mubr.msk.f32.mxu1 %vm453_vm1, %v435_v19  ;;  %9023 = vmatpush3.bf16.msra.mxu1 %v10299_v16  ;;  %834 = vst.msk [vmem:[#allocation2 + $0x78] sm:$0xff] %vm818_vm2, %v10703_v39  ;;  %835 = vst.msk [vmem:[#allocation2 + $0x80] sm:$0xff] %vm818_vm2, %v10703_v39 }
  0x2c   : > { %8980 = vmatmul.mubr.msk.f32.gmra.mrb[6].mxu0 %vm453_vm1, %v420_v14  ;;  %836 = vst.msk [vmem:[#allocation2 + $0x88] sm:$0xff] %vm818_vm2, %v10703_v39  ;;  %837 = vst.msk [vmem:[#allocation2 + $0x90] sm:$0xff] %vm818_vm2, %v10703_v39  ;;  %9024 = vmatprep.subr.bf16.mxu1 %v10300_v41 }
  0x2d   : > { %8982 = vmatprep.mubr.msk.f32.mxu0 %vm453_vm1, %v421_v17  ;;  %838 = vst.msk [vmem:[#allocation2 + $0x98] sm:$0xff] %vm818_vm2, %v10703_v39  ;;  %839 = vst.msk [vmem:[#allocation2 + $0xa0] sm:$0xff] %vm818_vm2, %v10703_v39 }
  0x2e   : > { %9004 = vmatmul.mubr.msk.f32.gmra.mrb[6].mxu1 %vm453_vm1, %v436_v22  ;;  %840 = vst.msk [vmem:[#allocation2 + $0xa8] sm:$0xff] %vm818_vm2, %v10703_v39  ;;  %841 = vst.msk [vmem:[#allocation2 + $0xb0] sm:$0xff] %vm818_vm2, %v10703_v39  ;;  %v10302_v22 = vld [vmem:[%s12913_s4 + $0x8] sm:$0xff]  }
  0x2f   : > { %9006 = vmatprep.mubr.msk.f32.mxu1 %vm453_vm1, %v437_v23  ;;  %842 = vst.msk [vmem:[#allocation2 + $0xb8] sm:$0xff] %vm818_vm2, %v10703_v39  ;;  %843 = vst.msk [vmem:[#allocation2 + $0xc0] sm:$0xff] %vm818_vm2, %v10703_v39  ;;  %9025 = vmatpush3.bf16.msra.mxu1 %v10300_v41 }
  0x30   : > { %8983 = vmatmul.mubr.msk.f32.gmra.mrb[8].mxu0 %vm453_vm1, %v422_v20  ;;  %844 = vst.msk [vmem:[#allocation2 + $0xc8] sm:$0xff] %vm818_vm2, %v10703_v39  ;;  %845 = vst.msk [vmem:[#allocation2 + $0xd0] sm:$0xff] %vm818_vm2, %v10703_v39  ;;  %9058 = vmatprep.subr.bf16.mxu1 %v10860_v46 }
  0x31   : > { %8985 = vmatprep.mubr.msk.f32.mxu0 %vm453_vm1, %v423_v21  ;;  %846 = vst.msk [vmem:[#allocation2 + $0xd8] sm:$0xff] %vm818_vm2, %v10703_v39  ;;  %847 = vst.msk [vmem:[#allocation2 + $0xe0] sm:$0xff] %vm818_vm2, %v10703_v39 }
  0x32   : > { %9007 = vmatmul.mubr.msk.f32.gmra.mrb[8].mxu1 %vm453_vm1, %v438_v26  ;;  %848 = vst.msk [vmem:[#allocation2 + $0xe8] sm:$0xff] %vm818_vm2, %v10703_v39  ;;  %849 = vst.msk [vmem:[#allocation2 + $0xf0] sm:$0xff] %vm818_vm2, %v10703_v39 }
  0x33   : > { %9009 = vmatprep.mubr.msk.f32.mxu1 %vm453_vm1, %v439_v27  ;;  %850 = vst.msk [vmem:[#allocation2 + $0xf8] sm:$0xff] %vm818_vm2, %v10703_v39  ;;  %851 = vst.msk [vmem:[#allocation2 + $0x100] sm:$0xff] %vm818_vm2, %v10703_v39 }
  0x34   : > { %8986 = vmatmul.mubr.msk.f32.gmra.mrb[10].mxu0 %vm453_vm1, %v424_v24  ;;  %852 = vst.msk [vmem:[#allocation2 + $0x108] sm:$0xff] %vm818_vm2, %v10703_v39  ;;  %853 = vst.msk [vmem:[#allocation2 + $0x110] sm:$0xff] %vm818_vm2, %v10703_v39 }
  0x35   : > { %8988 = vmatprep.mubr.msk.f32.mxu0 %vm453_vm1, %v425_v25  ;;  %854 = vst.msk [vmem:[#allocation2 + $0x118] sm:$0xff] %vm818_vm2, %v10703_v39  ;;  %855 = vst.msk [vmem:[#allocation2 + $0x120] sm:$0xff] %vm818_vm2, %v10703_v39 }
  0x36   : > { %9010 = vmatmul.mubr.msk.f32.gmra.mrb[10].mxu1 %vm453_vm1, %v440_v30  ;;  %856 = vst.msk [vmem:[#allocation2 + $0x128] sm:$0xff] %vm818_vm2, %v10703_v39  ;;  %857 = vst.msk [vmem:[#allocation2 + $0x130] sm:$0xff] %vm818_vm2, %v10703_v39 }
  0x37   : > { %9012 = vmatprep.mubr.msk.f32.mxu1 %vm453_vm1, %v441_v31  ;;  %858 = vst.msk [vmem:[#allocation2 + $0x138] sm:$0xff] %vm818_vm2, %v10703_v39  ;;  %859 = vst.msk [vmem:[#allocation2 + $0x140] sm:$0xff] %vm818_vm2, %v10703_v39 }
  0x38   : > { %8989 = vmatmul.mubr.msk.f32.gmra.mrb[12].mxu0 %vm453_vm1, %v426_v28  ;;  %860 = vst.msk [vmem:[#allocation2 + $0x148] sm:$0xff] %vm818_vm2, %v10703_v39  ;;  %861 = vst.msk [vmem:[#allocation2 + $0x150] sm:$0xff] %vm818_vm2, %v10703_v39 }
  0x39   : > { %8991 = vmatprep.mubr.msk.f32.mxu0 %vm453_vm1, %v427_v29  ;;  %862 = vst.msk [vmem:[#allocation2 + $0x158] sm:$0xff] %vm818_vm2, %v10703_v39  ;;  %863 = vst.msk [vmem:[#allocation2 + $0x160] sm:$0xff] %vm818_vm2, %v10703_v39 }
  0x3a   : > { %9013 = vmatmul.mubr.msk.f32.gmra.mrb[12].mxu1 %vm453_vm1, %v442_v33  ;;  %864 = vst.msk [vmem:[#allocation2 + $0x168] sm:$0xff] %vm818_vm2, %v10703_v39  ;;  %865 = vst.msk [vmem:[#allocation2 + $0x170] sm:$0xff] %vm818_vm2, %v10703_v39 }
  0x3b   : > { %866 = vst.msk [vmem:[#allocation2 + $0x178] sm:$0xff] %vm818_vm2, %v10703_v39  ;;  %867 = vst.msk [vmem:[#allocation2 + $0x180] sm:$0xff] %vm818_vm2, %v10703_v39  ;;  %9015 = vmatprep.mubr.msk.f32.mxu1 %vm453_vm1, %v443_v40 }
  0x3c   : > { %8992 = vmatmul.mubr.msk.f32.gmra.mrb[14].mxu0 %vm453_vm1, %v428_v32  ;;  %868 = vst.msk [vmem:[#allocation2 + $0x188] sm:$0xff] %vm818_vm2, %v10703_v39  ;;  %869 = vst.msk [vmem:[#allocation2 + $0x190] sm:$0xff] %vm818_vm2, %v10703_v39 }
  0x3d   : > { %870 = vst.msk [vmem:[#allocation2 + $0x198] sm:$0xff] %vm818_vm2, %v10703_v39  ;;  %871 = vst.msk [vmem:[#allocation2 + $0x1a0] sm:$0xff] %vm818_vm2, %v10703_v39 }
  0x3e   : > { %872 = vst.msk [vmem:[#allocation2 + $0x1a8] sm:$0xff] %vm818_vm2, %v10703_v39  ;;  %873 = vst.msk [vmem:[#allocation2 + $0x1b0] sm:$0xff] %vm818_vm2, %v10703_v39  ;;  %9016 = vmatmul.mubr.msk.f32.gmra.mrb[14].mxu1 %vm453_vm1, %v444_v42  ;;  %v10303_v42 = vld [vmem:[%s12913_s4 + $0x10] sm:$0xff]  }
  0x3f   : > { %874 = vst.msk [vmem:[#allocation2 + $0x1b8] sm:$0xff] %vm818_vm2, %v10703_v39  ;;  %875 = vst.msk [vmem:[#allocation2 + $0x1c0] sm:$0xff] %vm818_vm2, %v10703_v39  ;;  %9026 = vmatprep.mubr.msk.bf16.mxu1 %vm818_vm2, %v1012_v45 }
  0x40   : > { %876 = vst.msk [vmem:[#allocation2 + $0x1c8] sm:$0xff] %vm818_vm2, %v10703_v39  ;;  %877 = vst.msk [vmem:[#allocation2 + $0x1d0] sm:$0xff] %vm818_vm2, %v10703_v39 }
  0x41   : > { %878 = vst.msk [vmem:[#allocation2 + $0x1d8] sm:$0xff] %vm818_vm2, %v10703_v39  ;;  %879 = vst.msk [vmem:[#allocation2 + $0x1e0] sm:$0xff] %vm818_vm2, %v10703_v39 }
  0x42   : > { %880 = vst.msk [vmem:[#allocation2 + $0x1e8] sm:$0xff] %vm818_vm2, %v10703_v39  ;;  %881 = vst.msk [vmem:[#allocation2 + $0x1f0] sm:$0xff] %vm818_vm2, %v10703_v39 }
  0x43   : > { %882 = vst.msk [vmem:[#allocation2 + $0x1f8] sm:$0xff] %vm818_vm2, %v10703_v39  ;;  %883 = vst.msk [vmem:[#allocation2 + $0x200] sm:$0xff] %vm818_vm2, %v10703_v39 }
  0x44   : > { %884 = vst.msk [vmem:[#allocation2 + $0x208] sm:$0xff] %vm818_vm2, %v10703_v39  ;;  %885 = vst.msk [vmem:[#allocation2 + $0x210] sm:$0xff] %vm818_vm2, %v10703_v39 }
  0x45   : > { %886 = vst.msk [vmem:[#allocation2 + $0x218] sm:$0xff] %vm818_vm2, %v10703_v39  ;;  %887 = vst.msk [vmem:[#allocation2 + $0x220] sm:$0xff] %vm818_vm2, %v10703_v39 }
  0x46   : > { %888 = vst.msk [vmem:[#allocation2 + $0x228] sm:$0xff] %vm818_vm2, %v10703_v39  ;;  %889 = vst.msk [vmem:[#allocation2 + $0x230] sm:$0xff] %vm818_vm2, %v10703_v39 }
  0x47   : > { %890 = vst.msk [vmem:[#allocation2 + $0x238] sm:$0xff] %vm818_vm2, %v10703_v39 }
  0xf3   : > { %v8972_v48 = vpop.f32.mrb[0].mxu0 }
  0xf4   : > { %v626_v49 = vadd.f32 %v8972_v48, %v10865_v47  ;;  %v620_v50 = vpop.f32.mrb[1].mxu0 }
  0xf5   : > { %v621_v51 = vadd.f32 %v620_v50, %v10865_v47  ;;  %v8996_v57 = vpop.f32.mrb[0].mxu1 }
  0xf6   : > { %v780_v52 = vmax.f32 %v626_v49, 0.0  ;;  %v706_v59 = vadd.f32 %v8996_v57, %v10865_v47  ;;  %v700_v60 = vpop.f32.mrb[1].mxu1 }
  0xf7   : > { %v779_v53 = vmax.f32 %v621_v51, 0.0  ;;  %v8975_v54 = vpop.f32.mrb[2].mxu0  ;;  %v701_v62 = vadd.f32 %v700_v60, %v10865_v47 }
  0xf8   : > { %893 = vst.msk [vmem:[#allocation2 + $0x30] sm:$0xff] %vm818_vm2, %v780_v52  ;;  %v636_v55 = vadd.f32 %v8975_v54, %v10865_v47  ;;  %v630_v56 = vpop.f32.mrb[3].mxu0  ;;  %v796_v1 = vmax.f32 %v706_v59, 0.0  ;;  %v10304_v59 = vld [vmem:[%s12913_s4 + $0x18] sm:$0xff]  }
  0xf9   : > { %892 = vst.msk [vmem:[#allocation2 + $0x28] sm:$0xff] %vm818_vm2, %v779_v53  ;;  %v631_v58 = vadd.f32 %v630_v56, %v10865_v47  ;;  %v795_v4 = vmax.f32 %v701_v62, 0.0  ;;  %v8999_v5 = vpop.f32.mrb[2].mxu1 }
  0xfa   : > { %v782_v61 = vmax.f32 %v636_v55, 0.0  ;;  %909 = vst.msk [vmem:[#allocation2 + $0x130] sm:$0xff] %vm818_vm2, %v796_v1  ;;  %v716_v7 = vadd.f32 %v8999_v5, %v10865_v47  ;;  %v710_v8 = vpop.f32.mrb[3].mxu1 }
  0xfb   : > { %v781_v63 = vmax.f32 %v631_v58, 0.0  ;;  %v8978_v0 = vpop.f32.mrb[4].mxu0  ;;  %908 = vst.msk [vmem:[#allocation2 + $0x128] sm:$0xff] %vm818_vm2, %v795_v4  ;;  %v711_v10 = vadd.f32 %v710_v8, %v10865_v47 }
  0xfc   : > { %895 = vst.msk [vmem:[#allocation2 + $0x50] sm:$0xff] %vm818_vm2, %v782_v61  ;;  %v646_v2 = vadd.f32 %v8978_v0, %v10865_v47  ;;  %v640_v3 = vpop.f32.mrb[5].mxu0  ;;  %v798_v14 = vmax.f32 %v716_v7, 0.0 }
  0xfd   : > { %894 = vst.msk [vmem:[#allocation2 + $0x48] sm:$0xff] %vm818_vm2, %v781_v63  ;;  %v641_v6 = vadd.f32 %v640_v3, %v10865_v47  ;;  %v797_v18 = vmax.f32 %v711_v10, 0.0  ;;  %v9002_v19 = vpop.f32.mrb[4].mxu1 }
  0xfe   : > { %v784_v9 = vmax.f32 %v646_v2, 0.0  ;;  %911 = vst.msk [vmem:[#allocation2 + $0x150] sm:$0xff] %vm818_vm2, %v798_v14  ;;  %v726_v23 = vadd.f32 %v9002_v19, %v10865_v47  ;;  %v720_v24 = vpop.f32.mrb[5].mxu1 }
  0xff   : > { %v783_v11 = vmax.f32 %v641_v6, 0.0  ;;  %v8981_v12 = vpop.f32.mrb[6].mxu0  ;;  %v983_v13 = vld [vmem:[#allocation2 + $0x30] sm:$0xff]  ;;  %910 = vst.msk [vmem:[#allocation2 + $0x148] sm:$0xff] %vm818_vm2, %v797_v18  ;;  %v721_v26 = vadd.f32 %v720_v24, %v10865_v47 }
 0x100   : > { %897 = vst.msk [vmem:[#allocation2 + $0x70] sm:$0xff] %vm818_vm2, %v784_v9  ;;  %v656_v15 = vadd.f32 %v8981_v12, %v10865_v47  ;;  %v650_v16 = vpop.f32.mrb[7].mxu0  ;;  %v982_v17 = vld [vmem:[#allocation2 + $0x28] sm:$0xff]  ;;  %v800_v30 = vmax.f32 %v726_v23, 0.0 }
 0x101   : > { %896 = vst.msk [vmem:[#allocation2 + $0x68] sm:$0xff] %vm818_vm2, %v783_v11  ;;  %v651_v20 = vadd.f32 %v650_v16, %v10865_v47  ;;  %v10887_v21 = vpack.c.bf16 %v983_v13, %v982_v17  ;;  %v799_v34 = vmax.f32 %v721_v26, 0.0  ;;  %v9005_v36 = vpop.f32.mrb[6].mxu1  ;;  %v10940_v11 = vld [vmem:[%s12913_s4 + $0x40] sm:$0xff]  }
 0x102   : > { %v786_v25 = vmax.f32 %v656_v15, 0.0  ;;  %913 = vst.msk [vmem:[#allocation2 + $0x170] sm:$0xff] %vm818_vm2, %v800_v30  ;;  %v736_v40 = vadd.f32 %v9005_v36, %v10865_v47  ;;  %v730_v41 = vpop.f32.mrb[7].mxu1 }
 0x103   : > { %v785_v27 = vmax.f32 %v651_v20, 0.0  ;;  %v8984_v28 = vpop.f32.mrb[8].mxu0  ;;  %9027 = vmatmul.mubr.msk.bf16.vlgmr.msra.gmra.mrb[16].mxu1 %vm818_vm2, %v10887_v21  ;;  %v985_v29 = vld [vmem:[#allocation2 + $0x50] sm:$0xff]  ;;  %912 = vst.msk [vmem:[#allocation2 + $0x168] sm:$0xff] %vm818_vm2, %v799_v34  ;;  %v731_v44 = vadd.f32 %v730_v41, %v10865_v47 }
 0x104   : > { %899 = vst.msk [vmem:[#allocation2 + $0x90] sm:$0xff] %vm818_vm2, %v786_v25  ;;  %v666_v31 = vadd.f32 %v8984_v28, %v10865_v47  ;;  %9059 = vmatpush3.bf16.msra.mxu1 %v10860_v46  ;;  %v660_v32 = vpop.f32.mrb[9].mxu0  ;;  %v984_v33 = vld [vmem:[#allocation2 + $0x48] sm:$0xff]  ;;  %v802_v49 = vmax.f32 %v736_v40, 0.0 }
 0x105   : > { %898 = vst.msk [vmem:[#allocation2 + $0x88] sm:$0xff] %vm818_vm2, %v785_v27  ;;  %v661_v38 = vadd.f32 %v660_v32, %v10865_v47  ;;  %v10903_v39 = vpack.c.bf16 %v985_v29, %v984_v33  ;;  %9060 = vmatprep.subr.bf16.mxu1 %v10302_v22  ;;  %v801_v53 = vmax.f32 %v731_v44, 0.0  ;;  %v9008_v54 = vpop.f32.mrb[8].mxu1  ;;  %v998_v44 = vld [vmem:[#allocation2 + $0x128] sm:$0xff] }
 0x106   : > { %v788_v43 = vmax.f32 %v666_v31, 0.0  ;;  %915 = vst.msk [vmem:[#allocation2 + $0x190] sm:$0xff] %vm818_vm2, %v802_v49  ;;  %v746_v57 = vadd.f32 %v9008_v54, %v10865_v47  ;;  %v740_v58 = vpop.f32.mrb[9].mxu1  ;;  %v1001_v49 = vld [vmem:[#allocation2 + $0x150] sm:$0xff] }
 0x107   : > { %v787_v45 = vmax.f32 %v661_v38, 0.0  ;;  %v8987_v46 = vpop.f32.mrb[10].mxu0  ;;  %9030 = vmatprep.mubr.msk.bf16.mxu1 %vm818_vm2, %v10903_v39  ;;  %v987_v48 = vld [vmem:[#allocation2 + $0x70] sm:$0xff]  ;;  %914 = vst.msk [vmem:[#allocation2 + $0x188] sm:$0xff] %vm818_vm2, %v801_v53  ;;  %v741_v61 = vadd.f32 %v740_v58, %v10865_v47 }
 0x108   : > { %901 = vst.msk [vmem:[#allocation2 + $0xb0] sm:$0xff] %vm818_vm2, %v788_v43  ;;  %v676_v50 = vadd.f32 %v8987_v46, %v10865_v47  ;;  %v670_v51 = vpop.f32.mrb[11].mxu0  ;;  %v986_v52 = vld [vmem:[#allocation2 + $0x68] sm:$0xff]  ;;  %9061 = vmatpush3.bf16.msra.mxu1 %v10302_v22  ;;  %v804_v1 = vmax.f32 %v746_v57, 0.0 }
 0x109   : > { %900 = vst.msk [vmem:[#allocation2 + $0xa8] sm:$0xff] %vm818_vm2, %v787_v45  ;;  %v671_v55 = vadd.f32 %v670_v51, %v10865_v47  ;;  %v10918_v56 = vpack.c.bf16 %v987_v48, %v986_v52  ;;  %9062 = vmatprep.subr.bf16.mxu1 %v10303_v42  ;;  %v803_v5 = vmax.f32 %v741_v61, 0.0  ;;  %v9011_v6 = vpop.f32.mrb[10].mxu1  ;;  %v999_v45 = vld [vmem:[#allocation2 + $0x130] sm:$0xff]  ;;  %v1000_v48 = vld [vmem:[#allocation2 + $0x148] sm:$0xff] }
 0x10a   : > { %v790_v60 = vmax.f32 %v676_v50, 0.0  ;;  %917 = vst.msk [vmem:[#allocation2 + $0x1b0] sm:$0xff] %vm818_vm2, %v804_v1  ;;  %v756_v9 = vadd.f32 %v9011_v6, %v10865_v47  ;;  %v750_v10 = vpop.f32.mrb[11].mxu1  ;;  %v10975_v50 = vpack.c.bf16 %v999_v45, %v998_v44  ;;  %v10977_v51 = vpack.c.bf16 %v1001_v49, %v1000_v48  ;;  %v1002_v52 = vld [vmem:[#allocation2 + $0x168] sm:$0xff]  ;;  %v1003_v53 = vld [vmem:[#allocation2 + $0x170] sm:$0xff] }
 0x10b   : > { %v789_v62 = vmax.f32 %v671_v55, 0.0  ;;  %v8990_v63 = vpop.f32.mrb[12].mxu0  ;;  %9031 = vmatmul.mubr.msk.bf16.gmra.mrb[20].mxu1 %vm818_vm2, %v10918_v56  ;;  %v989_v0 = vld [vmem:[#allocation2 + $0x90] sm:$0xff]  ;;  %916 = vst.msk [vmem:[#allocation2 + $0x1a8] sm:$0xff] %vm818_vm2, %v803_v5  ;;  %v751_v13 = vadd.f32 %v750_v10, %v10865_v47  ;;  %v10983_v57 = vpack.c.bf16 %v1003_v53, %v1002_v52  ;;  %v928_v10 = vld [vmem:[#allocation2 + $0x47] sm:$0xff] }
 0x10c   : > { %903 = vst.msk [vmem:[#allocation2 + $0xd0] sm:$0xff] %vm818_vm2, %v790_v60  ;;  %v686_v2 = vadd.f32 %v8990_v63, %v10865_v47  ;;  %v680_v3 = vpop.f32.mrb[13].mxu0  ;;  %v988_v4 = vld [vmem:[#allocation2 + $0x88] sm:$0xff]  ;;  %9063 = vmatpush3.bf16.msra.mxu1 %v10303_v42  ;;  %v806_v17 = vmax.f32 %v756_v9, 0.0 }
 0x10d   : > { %902 = vst.msk [vmem:[#allocation2 + $0xc8] sm:$0xff] %vm818_vm2, %v789_v62  ;;  %v681_v7 = vadd.f32 %v680_v3, %v10865_v47  ;;  %v10933_v8 = vpack.c.bf16 %v989_v0, %v988_v4  ;;  %9064 = vmatprep.subr.bf16.mxu1 %v10304_v59  ;;  %v805_v22 = vmax.f32 %v751_v13, 0.0  ;;  %v9014_v23 = vpop.f32.mrb[12].mxu1  ;;  %v1005_v55 = vld [vmem:[#allocation2 + $0x190] sm:$0xff]  ;;  %v924_v3 = vld [vmem:[#allocation2 + $0x7] sm:$0xff] }
 0x10e   : > { %v792_v12 = vmax.f32 %v686_v2, 0.0  ;;  %919 = vst.msk [vmem:[#allocation2 + $0x1d0] sm:$0xff] %vm818_vm2, %v806_v17  ;;  %v766_v26 = vadd.f32 %v9014_v23, %v10865_v47  ;;  %v760_v27 = vpop.f32.mrb[13].mxu1  ;;  %v1004_v54 = vld [vmem:[#allocation2 + $0x188] sm:$0xff] }
 0x10f   : > { %v791_v14 = vmax.f32 %v681_v7, 0.0  ;;  %9034 = vmatprep.mubr.msk.bf16.mxu1 %vm818_vm2, %v10933_v8  ;;  %v8993_v15 = vpop.f32.mrb[14].mxu0  ;;  %v991_v16 = vld [vmem:[#allocation2 + $0xb0] sm:$0xff]  ;;  %918 = vst.msk [vmem:[#allocation2 + $0x1c8] sm:$0xff] %vm818_vm2, %v805_v22  ;;  %v761_v29 = vadd.f32 %v760_v27, %v10865_v47  ;;  %v10985_v58 = vpack.c.bf16 %v1005_v55, %v1004_v54  ;;  %v926_v7 = vld [vmem:[#allocation2 + $0x27] sm:$0xff] }
 0x110   : > { %905 = vst.msk [vmem:[#allocation2 + $0xf0] sm:$0xff] %vm818_vm2, %v792_v12  ;;  %v696_v18 = vadd.f32 %v8993_v15, %v10865_v47  ;;  %v690_v19 = vpop.f32.mrb[15].mxu0  ;;  %v990_v20 = vld [vmem:[#allocation2 + $0xa8] sm:$0xff]  ;;  %9065 = vmatpush3.bf16.msra.mxu1 %v10304_v59  ;;  %v808_v32 = vmax.f32 %v766_v26, 0.0 }
 0x111   : > { %904 = vst.msk [vmem:[#allocation2 + $0xe8] sm:$0xff] %vm818_vm2, %v791_v14  ;;  %v691_v24 = vadd.f32 %v690_v19, %v10865_v47  ;;  %v10950_v25 = vpack.c.bf16 %v991_v16, %v990_v20  ;;  %9098 = vmatprep.subr.bf16.mxu1 %v10940_v11  ;;  %v807_v34 = vmax.f32 %v761_v29, 0.0  ;;  %v1007_v60 = vld [vmem:[#allocation2 + $0x1b0] sm:$0xff]  ;;  %v10306_v14 = vld [vmem:[%s12913_s4 + $0x48] sm:$0xff]  }
 0x112   : > { %v794_v28 = vmax.f32 %v696_v18, 0.0  ;;  %921 = vst.msk [vmem:[#allocation2 + $0x1f0] sm:$0xff] %vm818_vm2, %v808_v32  ;;  %v1006_v59 = vld [vmem:[#allocation2 + $0x1a8] sm:$0xff]  ;;  %v10307_v16 = vld [vmem:[%s12913_s4 + $0x50] sm:$0xff]  }
 0x113   : > { %v793_v30 = vmax.f32 %v691_v24, 0.0  ;;  %9035 = vmatmul.mubr.msk.bf16.gmra.mrb[24].mxu1 %vm818_vm2, %v10950_v25  ;;  %v993_v31 = vld [vmem:[#allocation2 + $0xd0] sm:$0xff]  ;;  %920 = vst.msk [vmem:[#allocation2 + $0x1e8] sm:$0xff] %vm818_vm2, %v807_v34  ;;  %v10991_v63 = vpack.c.bf16 %v1007_v60, %v1006_v59  ;;  %v930_v17 = vld [vmem:[#allocation2 + $0x67] sm:$0xff] }
 0x114   : > { %907 = vst.msk [vmem:[#allocation2 + $0x110] sm:$0xff] %vm818_vm2, %v794_v28  ;;  %v992_v33 = vld [vmem:[#allocation2 + $0xc8] sm:$0xff]  ;;  %v11033_v24 = vld [vmem:[%s12913_s4 + $0x60] sm:$0xff]  }
 0x115   : > { %906 = vst.msk [vmem:[#allocation2 + $0x108] sm:$0xff] %vm818_vm2, %v793_v30  ;;  %v10961_v36 = vpack.c.bf16 %v993_v31, %v992_v33  ;;  %v1009_v62 = vld [vmem:[#allocation2 + $0x1d0] sm:$0xff]  ;;  %v932_v19 = vld [vmem:[#allocation2 + $0x87] sm:$0xff]  ;;  %v9017_v31 = vpop.f32.mrb[14].mxu1 }
 0x116   : > { %v1008_v61 = vld [vmem:[#allocation2 + $0x1c8] sm:$0xff]  ;;  %v776_v33 = vadd.f32 %v9017_v31, %v10865_v47  ;;  %v770_v34 = vpop.f32.mrb[15].mxu1 }
 0x117   : > { %9038 = vmatprep.mubr.msk.bf16.mxu1 %vm818_vm2, %v10961_v36  ;;  %v995_v38 = vld [vmem:[#allocation2 + $0xf0] sm:$0xff]  ;;  %v10993_v0 = vpack.c.bf16 %v1009_v62, %v1008_v61  ;;  %v934_v26 = vld [vmem:[#allocation2 + $0xa7] sm:$0xff] }
 0x118   : > { %v994_v40 = vld [vmem:[#allocation2 + $0xe8] sm:$0xff] }
 0x119   : > { %v10967_v41 = vpack.c.bf16 %v995_v38, %v994_v40  ;;  %v1011_v2 = vld [vmem:[#allocation2 + $0x1f0] sm:$0xff]  ;;  %v936_v28 = vld [vmem:[#allocation2 + $0xc7] sm:$0xff]  ;;  %v771_v38 = vadd.f32 %v770_v34, %v10865_v47  ;;  %v810_v40 = vmax.f32 %v776_v33, 0.0 }
 0x11a   : > { %v1010_v1 = vld [vmem:[#allocation2 + $0x1e8] sm:$0xff] }
 0x11b   : > { %9039 = vmatmul.mubr.msk.bf16.gmra.mrb[28].mxu1 %vm818_vm2, %v10967_v41  ;;  %v997_v42 = vld [vmem:[#allocation2 + $0x110] sm:$0xff]  ;;  %v10999_v5 = vpack.c.bf16 %v1011_v2, %v1010_v1  ;;  %923 = vst.msk [vmem:[#allocation2 + $0x210] sm:$0xff] %vm818_vm2, %v810_v40  ;;  %v942_v47 = vld [vmem:[#allocation2 + $0x127] sm:$0xff] }
 0x11c   : > { %v996_v43 = vld [vmem:[#allocation2 + $0x108] sm:$0xff] }
 0x11d   : > { %v10971_v46 = vpack.c.bf16 %v997_v42, %v996_v43  ;;  %v925_v4 = vld [vmem:[#allocation2 + $0xf] sm:$0xff]  ;;  %v809_v42 = vmax.f32 %v771_v38, 0.0  ;;  %v938_v43 = vld [vmem:[#allocation2 + $0xe7] sm:$0xff] }
 0x11e   : > { %v956_v6 = vpack.c.bf16 %v925_v4, %v924_v3  ;;  %v927_v9 = vld [vmem:[#allocation2 + $0x2f] sm:$0xff]  ;;  %v940_v45 = vld [vmem:[#allocation2 + $0x107] sm:$0xff] }
 0x11f   : > { %9042 = vmatprep.mubr.msk.bf16.mxu1 %vm818_vm2, %v10971_v46  ;;  %v929_v12 = vld [vmem:[#allocation2 + $0x4f] sm:$0xff]  ;;  %v11004_v13 = vpack.c.bf16 %v927_v9, %v926_v7  ;;  %922 = vst.msk [vmem:[#allocation2 + $0x208] sm:$0xff] %vm818_vm2, %v809_v42  ;;  %v944_v54 = vld [vmem:[#allocation2 + $0x147] sm:$0xff] }
 0x120   : > { %v11009_v15 = vpack.c.bf16 %v929_v12, %v928_v10  ;;  %v931_v18 = vld [vmem:[#allocation2 + $0x6f] sm:$0xff]  ;;  %v946_v61 = vld [vmem:[#allocation2 + $0x167] sm:$0xff] }
 0x121   : > { %v933_v20 = vld [vmem:[#allocation2 + $0x8f] sm:$0xff]  ;;  %v11019_v22 = vpack.c.bf16 %v931_v18, %v930_v17  ;;  %v948_v1 = vld [vmem:[#allocation2 + $0x187] sm:$0xff] }
 0x122   : > { %v11024_v23 = vpack.c.bf16 %v933_v20, %v932_v19  ;;  %v935_v27 = vld [vmem:[#allocation2 + $0xaf] sm:$0xff]  ;;  %v952_v9 = vld [vmem:[#allocation2 + $0x1c7] sm:$0xff] }
 0x123   : > { %9043 = vmatmul.mubr.msk.bf16.gmra.mrb[32].mxu1 %vm818_vm2, %v10975_v50  ;;  %v937_v29 = vld [vmem:[#allocation2 + $0xcf] sm:$0xff]  ;;  %v11035_v30 = vpack.c.bf16 %v935_v27, %v934_v26  ;;  %v954_v18 = vld [vmem:[#allocation2 + $0x1e7] sm:$0xff] }
 0x124   : > { %9046 = vmatprep.mubr.msk.bf16.mxu1 %vm818_vm2, %v10977_v51  ;;  %v11038_v32 = vpack.c.bf16 %v937_v29, %v936_v28  ;;  %v939_v44 = vld [vmem:[#allocation2 + $0xef] sm:$0xff] }
 0x125   : > { %v941_v48 = vld [vmem:[#allocation2 + $0x10f] sm:$0xff]  ;;  %v11048_v49 = vpack.c.bf16 %v939_v44, %v938_v43 }
 0x126   : > { %v11050_v52 = vpack.c.bf16 %v941_v48, %v940_v45  ;;  %v943_v53 = vld [vmem:[#allocation2 + $0x12f] sm:$0xff] }
 0x127   : > { %v945_v55 = vld [vmem:[#allocation2 + $0x14f] sm:$0xff]  ;;  %v11056_v59 = vpack.c.bf16 %v943_v53, %v942_v47  ;;  %v10313_v47 = vld [vmem:[%s12913_s4 + $0x80] sm:$0xff]  }
 0x128   : > { %v11058_v60 = vpack.c.bf16 %v945_v55, %v944_v54  ;;  %v947_v62 = vld [vmem:[#allocation2 + $0x16f] sm:$0xff] }
 0x129   : > { %v949_v2 = vld [vmem:[#allocation2 + $0x18f] sm:$0xff]  ;;  %v11064_v3 = vpack.c.bf16 %v947_v62, %v946_v61 }
 0x12a   : > { %v11066_v4 = vpack.c.bf16 %v949_v2, %v948_v1  ;;  %v951_v7 = vld [vmem:[#allocation2 + $0x1af] sm:$0xff] }
 0x12b   : > { %9047 = vmatmul.mubr.msk.bf16.gmra.mrb[36].mxu1 %vm818_vm2, %v10983_v57  ;;  %v953_v10 = vld [vmem:[#allocation2 + $0x1cf] sm:$0xff] }
 0x12c   : > { %9050 = vmatprep.mubr.msk.bf16.mxu1 %vm818_vm2, %v10985_v58  ;;  %v1504_v17 = vld [vmem:[#allocation2 + $0x11] sm:$0xff]  ;;  %v1505_v26 = vld [vmem:[#allocation2 + $0x29] sm:$0xff] }
 0x12d   : > { %v955_v19 = vld [vmem:[#allocation2 + $0x1ef] sm:$0xff] }
 0x12e   : > { %v1506_v27 = vld [vmem:[#allocation2 + $0x31] sm:$0xff]  ;;  %v1507_v28 = vld [vmem:[#allocation2 + $0x49] sm:$0xff] }
 0x12f   : > { %v1508_v29 = vld [vmem:[#allocation2 + $0x51] sm:$0xff]  ;;  %v11085_v31 = vpack.c.bf16 %v1506_v27, %v1505_v26  ;;  %v10310_v33 = vld [vmem:[%s12913_s4 + $0x68] sm:$0xff]  }
 0x130   : > { %v11090_v34 = vpack.c.bf16 %v1508_v29, %v1507_v28  ;;  %v10311_v38 = vld [vmem:[%s12913_s4 + $0x70] sm:$0xff]  }
 0x131   : > { %v1509_v40 = vld [vmem:[#allocation2 + $0x69] sm:$0xff]  ;;  %v1510_v42 = vld [vmem:[#allocation2 + $0x71] sm:$0xff] }
 0x132   : > { %v1511_v43 = vld [vmem:[#allocation2 + $0x89] sm:$0xff]  ;;  %v1512_v44 = vld [vmem:[#allocation2 + $0x91] sm:$0xff]  ;;  %v11100_v45 = vpack.c.bf16 %v1510_v42, %v1509_v40 }
 0x133   : > { %9051 = vmatmul.mubr.msk.bf16.gmra.mrb[40].mxu1 %vm818_vm2, %v10991_v63  ;;  %v11105_v48 = vpack.c.bf16 %v1512_v44, %v1511_v43  ;;  %v1513_v53 = vld [vmem:[#allocation2 + $0xa9] sm:$0xff]  ;;  %v1514_v54 = vld [vmem:[#allocation2 + $0xb1] sm:$0xff] }
 0x134   : > { %9054 = vmatprep.mubr.msk.bf16.mxu1 %vm818_vm2, %v10993_v0  ;;  %v1515_v55 = vld [vmem:[#allocation2 + $0xc9] sm:$0xff]  ;;  %v1516_v61 = vld [vmem:[#allocation2 + $0xd1] sm:$0xff]  ;;  %v11114_v62 = vpack.c.bf16 %v1514_v54, %v1513_v53 }
 0x135   : > { %v11116_v1 = vpack.c.bf16 %v1516_v61, %v1515_v55  ;;  %v1517_v2 = vld [vmem:[#allocation2 + $0xe9] sm:$0xff]  ;;  %v1526_v29 = vld [vmem:[#allocation2 + $0x171] sm:$0xff] }
 0x136   : > { %v1525_v28 = vld [vmem:[#allocation2 + $0x169] sm:$0xff]  ;;  %v1530_v44 = vld [vmem:[#allocation2 + $0x1b1] sm:$0xff] }
 0x137   : > { %v11138_v40 = vpack.c.bf16 %v1526_v29, %v1525_v28  ;;  %v1529_v43 = vld [vmem:[#allocation2 + $0x1a9] sm:$0xff]  ;;  %v1532_v53 = vld [vmem:[#allocation2 + $0x1d1] sm:$0xff] }
 0x138   : > { %v11146_v54 = vpack.c.bf16 %v1530_v44, %v1529_v43  ;;  %v1533_v61 = vld [vmem:[#allocation2 + $0x1e9] sm:$0xff] }
 0x139   : > { %v10319_v28 = vld [vmem:[%s12913_s4 + $0xb0] sm:$0xff]   ;;  %v3122_v44 = vld [vmem:[#allocation2 + $0xc8] sm:$0xff] }
 0x13a   : > { %v3121_v43 = vld [vmem:[#allocation2 + $0xb0] sm:$0xff] }
 0x13b   : > { %9055 = vmatmul.mubr.msk.bf16.gmra.mrb[44].mxu1 %vm818_vm2, %v10999_v5 }
 0x13c   : > { %9066 = vmatprep.mubr.msk.bf16.mxu1 %vm818_vm2, %v956_v6  ;;  %v950_v6 = vld [vmem:[#allocation2 + $0x1a7] sm:$0xff] }
 0x13d   : > { %v11072_v12 = vpack.c.bf16 %v951_v7, %v950_v6  ;;  %v1518_v6 = vld [vmem:[#allocation2 + $0xf1] sm:$0xff]  ;;  %v1519_v7 = vld [vmem:[#allocation2 + $0x109] sm:$0xff] }
 0x143   : > { %9067 = vmatmul.mubr.msk.bf16.vlgmr.msra.gmra.mrb[16].mxu1 %vm818_vm2, %v11004_v13 }
 0x144   : > { %9099 = vmatpush3.bf16.msra.mxu1 %v10940_v11  ;;  %9070 = vmatprep.mubr.msk.bf16.mxu1 %vm818_vm2, %v11009_v15  ;;  %v10308_v11 = vld [vmem:[%s12913_s4 + $0x58] sm:$0xff]  }
 0x145   : > { %9100 = vmatprep.subr.bf16.mxu1 %v10306_v14 }
 0x148   : > { %9101 = vmatpush3.bf16.msra.mxu1 %v10306_v14  ;;  %v11074_v14 = vpack.c.bf16 %v953_v10, %v952_v9  ;;  %v1520_v9 = vld [vmem:[#allocation2 + $0x111] sm:$0xff]  ;;  %v11122_v10 = vpack.c.bf16 %v1518_v6, %v1517_v2 }
 0x149   : > { %9102 = vmatprep.subr.bf16.mxu1 %v10307_v16  ;;  %v1534_v2 = vld [vmem:[#allocation2 + $0x1f1] sm:$0xff] }
 0x14a   : > { %v11154_v6 = vpack.c.bf16 %v1534_v2, %v1533_v61  ;;  %v10332_v61 = vld [vmem:[%s12913_s4 + $0x118] sm:$0xff]  }
 0x14b   : > { %9071 = vmatmul.mubr.msk.bf16.gmra.mrb[20].mxu1 %vm818_vm2, %v11019_v22 }
 0x14c   : > { %9074 = vmatprep.mubr.msk.bf16.mxu1 %vm818_vm2, %v11024_v23  ;;  %9103 = vmatpush3.bf16.msra.mxu1 %v10307_v16  ;;  %v1503_v16 = vld [vmem:[#allocation2 + $0x9] sm:$0xff] }
 0x14d   : > { %9104 = vmatprep.subr.bf16.mxu1 %v10308_v11  ;;  %v1535_v20 = vpack.c.bf16 %v1504_v17, %v1503_v16  ;;  %v11124_v16 = vpack.c.bf16 %v1520_v9, %v1519_v7  ;;  %v1521_v17 = vld [vmem:[#allocation2 + $0x129] sm:$0xff] }
 0x14e   : > { %v10314_v7 = vld [vmem:[%s12913_s4 + $0x88] sm:$0xff]   ;;  %v10315_v9 = vld [vmem:[%s12913_s4 + $0x90] sm:$0xff]  }
 0x150   : > { %9105 = vmatpush3.bf16.msra.mxu1 %v10308_v11  ;;  %v11080_v11 = vpack.c.bf16 %v955_v19, %v954_v18  ;;  %v1522_v18 = vld [vmem:[#allocation2 + $0x131] sm:$0xff]  ;;  %v1523_v19 = vld [vmem:[#allocation2 + $0x149] sm:$0xff] }
 0x151   : > { %9138 = vmatprep.subr.bf16.mxu1 %v11033_v24  ;;  %v11130_v26 = vpack.c.bf16 %v1522_v18, %v1521_v17  ;;  %v1855_v17 = vld [vmem:[#allocation2 + $0x207] sm:$0xff]  ;;  %v1856_v18 = vld [vmem:[#allocation2 + $0x20f] sm:$0xff] }
 0x153   : > { %9075 = vmatmul.mubr.msk.bf16.gmra.mrb[24].mxu1 %vm818_vm2, %v11035_v30 }
 0x154   : > { %9078 = vmatprep.mubr.msk.bf16.mxu1 %vm818_vm2, %v11038_v32 }
 0x15b   : > { %9079 = vmatmul.mubr.msk.bf16.gmra.mrb[28].mxu1 %vm818_vm2, %v11048_v49 }
 0x15c   : > { %9082 = vmatprep.mubr.msk.bf16.mxu1 %vm818_vm2, %v11050_v52 }
 0x163   : > { %9083 = vmatmul.mubr.msk.bf16.gmra.mrb[32].mxu1 %vm818_vm2, %v11056_v59 }
 0x164   : > { %9086 = vmatprep.mubr.msk.bf16.mxu1 %vm818_vm2, %v11058_v60 }
 0x16b   : > { %9087 = vmatmul.mubr.msk.bf16.gmra.mrb[36].mxu1 %vm818_vm2, %v11064_v3 }
 0x16c   : > { %9090 = vmatprep.mubr.msk.bf16.mxu1 %vm818_vm2, %v11066_v4 }
 0x173   : > { %9091 = vmatmul.mubr.msk.bf16.gmra.mrb[40].mxu1 %vm818_vm2, %v11072_v12 }
 0x174   : > { %9094 = vmatprep.mubr.msk.bf16.mxu1 %vm818_vm2, %v11074_v14 }
 0x17b   : > { %9095 = vmatmul.mubr.msk.bf16.gmra.mrb[44].mxu1 %vm818_vm2, %v11080_v11 }
 0x17c   : > { %9106 = vmatprep.mubr.msk.bf16.mxu1 %vm818_vm2, %v1535_v20  ;;  %v1524_v20 = vld [vmem:[#allocation2 + $0x151] sm:$0xff] }
 0x17d   : > { %v11132_v27 = vpack.c.bf16 %v1524_v20, %v1523_v19  ;;  %v11200_v19 = vpack.c.bf16 %v1856_v18, %v1855_v17  ;;  %v10318_v20 = vld [vmem:[%s12913_s4 + $0xa8] sm:$0xff]  }
 0x183   : > { %9107 = vmatmul.mubr.msk.bf16.vlgmr.msra.gmra.mrb[16].mxu1 %vm818_vm2, %v11085_v31 }
 0x184   : > { %9139 = vmatpush3.bf16.msra.mxu1 %v11033_v24  ;;  %9110 = vmatprep.mubr.msk.bf16.mxu1 %vm818_vm2, %v11090_v34  ;;  %v10312_v24 = vld [vmem:[%s12913_s4 + $0x78] sm:$0xff]  }
 0x185   : > { %9140 = vmatprep.subr.bf16.mxu1 %v10310_v33 }
 0x188   : > { %9141 = vmatpush3.bf16.msra.mxu1 %v10310_v33  ;;  %v1527_v33 = vld [vmem:[#allocation2 + $0x189] sm:$0xff] }
 0x189   : > { %9142 = vmatprep.subr.bf16.mxu1 %v10311_v38 }
 0x18b   : > { %9111 = vmatmul.mubr.msk.bf16.gmra.mrb[20].mxu1 %vm818_vm2, %v11100_v45 }
 0x18c   : > { %9114 = vmatprep.mubr.msk.bf16.mxu1 %vm818_vm2, %v11105_v48  ;;  %9143 = vmatpush3.bf16.msra.mxu1 %v10311_v38  ;;  %v1528_v38 = vld [vmem:[#allocation2 + $0x191] sm:$0xff] }
 0x18d   : > { %9144 = vmatprep.subr.bf16.mxu1 %v10312_v24  ;;  %v11140_v42 = vpack.c.bf16 %v1528_v38, %v1527_v33  ;;  %v10331_v33 = vld [vmem:[%s12913_s4 + $0x110] sm:$0xff]   ;;  %v3120_v38 = vld [vmem:[#allocation2 + $0xa8] sm:$0xff] }
 0x190   : > { %9145 = vmatpush3.bf16.msra.mxu1 %v10312_v24  ;;  %v1531_v24 = vld [vmem:[#allocation2 + $0x1c9] sm:$0xff] }
 0x191   : > { %9178 = vmatprep.subr.bf16.mxu1 %v10313_v47  ;;  %v11148_v55 = vpack.c.bf16 %v1532_v53, %v1531_v24  ;;  %v3123_v24 = vld [vmem:[#allocation2 + $0xd0] sm:$0xff]  ;;  %v3149_v53 = vpack.c.bf16 %v3121_v43, %v3120_v38 }
 0x192   : > { %v3150_v2 = vpack.c.bf16 %v3123_v24, %v3122_v44 }
 0x193   : > { %9115 = vmatmul.mubr.msk.bf16.gmra.mrb[24].mxu1 %vm818_vm2, %v11114_v62 }
 0x194   : > { %9118 = vmatprep.mubr.msk.bf16.mxu1 %vm818_vm2, %v11116_v1 }
 0x19b   : > { %9119 = vmatmul.mubr.msk.bf16.gmra.mrb[28].mxu1 %vm818_vm2, %v11122_v10 }
 0x19c   : > { %9122 = vmatprep.mubr.msk.bf16.mxu1 %vm818_vm2, %v11124_v16 }
 0x1a3   : > { %9123 = vmatmul.mubr.msk.bf16.gmra.mrb[32].mxu1 %vm818_vm2, %v11130_v26 }
 0x1a4   : > { %9126 = vmatprep.mubr.msk.bf16.mxu1 %vm818_vm2, %v11132_v27 }
 0x1ab   : > { %9127 = vmatmul.mubr.msk.bf16.gmra.mrb[36].mxu1 %vm818_vm2, %v11138_v40 }
 0x1ac   : > { %9130 = vmatprep.mubr.msk.bf16.mxu1 %vm818_vm2, %v11140_v42 }
 0x1b3   : > { %9131 = vmatmul.mubr.msk.bf16.gmra.mrb[40].mxu1 %vm818_vm2, %v11146_v54 }
 0x1b4   : > { %9134 = vmatprep.mubr.msk.bf16.mxu1 %vm818_vm2, %v11148_v55 }
 0x1bb   : > { %9135 = vmatmul.mubr.msk.bf16.gmra.mrb[44].mxu1 %vm818_vm2, %v11154_v6 }
 0x1bc   : > { %9146 = vmatprep.mubr.msk.bf16.mxu1 %vm818_vm2, %v11004_v13  ;;  %v10316_v13 = vld [vmem:[%s12913_s4 + $0x98] sm:$0xff]  }
 0x1c3   : > { %9147 = vmatmul.mubr.msk.bf16.vlgmr.msra.gmra.mrb[16].mxu1 %vm818_vm2, %v11009_v15 }
 0x1c4   : > { %9179 = vmatpush3.bf16.msra.mxu1 %v10313_v47  ;;  %9150 = vmatprep.mubr.msk.bf16.mxu1 %vm818_vm2, %v11019_v22  ;;  %v10317_v47 = vld [vmem:[%s12913_s4 + $0xa0] sm:$0xff]  }
 0x1c5   : > { %9180 = vmatprep.subr.bf16.mxu1 %v10314_v7 }
 0x1c8   : > { %9181 = vmatpush3.bf16.msra.mxu1 %v10314_v7  ;;  %v3124_v7 = vld [vmem:[#allocation2 + $0xe8] sm:$0xff] }
 0x1c9   : > { %9182 = vmatprep.subr.bf16.mxu1 %v10315_v9 }
 0x1cb   : > { %9151 = vmatmul.mubr.msk.bf16.gmra.mrb[20].mxu1 %vm818_vm2, %v11024_v23 }
 0x1cc   : > { %9154 = vmatprep.mubr.msk.bf16.mxu1 %vm818_vm2, %v11035_v30  ;;  %9183 = vmatpush3.bf16.msra.mxu1 %v10315_v9  ;;  %v3125_v9 = vld [vmem:[#allocation2 + $0xf0] sm:$0xff] }
 0x1cd   : > { %9184 = vmatprep.subr.bf16.mxu1 %v10316_v13  ;;  %v3151_v17 = vpack.c.bf16 %v3125_v9, %v3124_v7 }
 0x1d0   : > { %9185 = vmatpush3.bf16.msra.mxu1 %v10316_v13  ;;  %v3126_v13 = vld [vmem:[#allocation2 + $0x108] sm:$0xff] }
 0x1d1   : > { %9218 = vmatprep.subr.bf16.mxu1 %v10317_v47 }
 0x1d3   : > { %9155 = vmatmul.mubr.msk.bf16.gmra.mrb[24].mxu1 %vm818_vm2, %v11038_v32 }
 0x1d4   : > { %9158 = vmatprep.mubr.msk.bf16.mxu1 %vm818_vm2, %v11048_v49 }
 0x1db   : > { %9159 = vmatmul.mubr.msk.bf16.gmra.mrb[28].mxu1 %vm818_vm2, %v11050_v52 }
 0x1dc   : > { %9162 = vmatprep.mubr.msk.bf16.mxu1 %vm818_vm2, %v11056_v59 }
 0x1e3   : > { %9163 = vmatmul.mubr.msk.bf16.gmra.mrb[32].mxu1 %vm818_vm2, %v11058_v60 }
 0x1e4   : > { %9166 = vmatprep.mubr.msk.bf16.mxu1 %vm818_vm2, %v11064_v3 }
 0x1eb   : > { %9167 = vmatmul.mubr.msk.bf16.gmra.mrb[36].mxu1 %vm818_vm2, %v11066_v4 }
 0x1ec   : > { %9170 = vmatprep.mubr.msk.bf16.mxu1 %vm818_vm2, %v11072_v12 }
 0x1f3   : > { %9171 = vmatmul.mubr.msk.bf16.gmra.mrb[40].mxu1 %vm818_vm2, %v11074_v14 }
 0x1f4   : > { %9174 = vmatprep.mubr.msk.bf16.mxu1 %vm818_vm2, %v11080_v11 }
 0x1fb   : > { %9175 = vmatmul.mubr.msk.bf16.gmra.mrb[44].mxu1 %vm818_vm2, %v11200_v19 }
 0x1fc   : > { %9186 = vmatprep.mubr.msk.bf16.mxu1 %vm818_vm2, %v10887_v21  ;;  %v10320_v21 = vld [vmem:[%s12913_s4 + $0xb8] sm:$0xff]  }
 0x203   : > { %9187 = vmatmul.mubr.msk.bf16.vlgmr.msra.gmra.mrb[16].mxu1 %vm818_vm2, %v10903_v39  ;;  %v10321_v39 = vld [vmem:[%s12913_s4 + $0xc0] sm:$0xff]  }
 0x204   : > { %9219 = vmatpush3.bf16.msra.mxu1 %v10317_v47  ;;  %9190 = vmatprep.mubr.msk.bf16.mxu1 %vm818_vm2, %v10918_v56  ;;  %v2177_v56 = vld [vmem:[#allocation2 + $0x208] sm:$0xff]  ;;  %v3127_v47 = vld [vmem:[#allocation2 + $0x110] sm:$0xff] }
 0x205   : > { %9220 = vmatprep.subr.bf16.mxu1 %v10318_v20  ;;  %v3152_v18 = vpack.c.bf16 %v3127_v47, %v3126_v13 }
 0x208   : > { %9221 = vmatpush3.bf16.msra.mxu1 %v10318_v20  ;;  %v3129_v20 = vld [vmem:[#allocation2 + $0x130] sm:$0xff] }
 0x209   : > { %9222 = vmatprep.subr.bf16.mxu1 %v10319_v28 }
 0x20b   : > { %9191 = vmatmul.mubr.msk.bf16.gmra.mrb[20].mxu1 %vm818_vm2, %v10933_v8  ;;  %v2178_v8 = vld [vmem:[#allocation2 + $0x210] sm:$0xff] }
 0x20c   : > { %9194 = vmatprep.mubr.msk.bf16.mxu1 %vm818_vm2, %v10950_v25  ;;  %9223 = vmatpush3.bf16.msra.mxu1 %v10319_v28  ;;  %v11246_v25 = vpack.c.bf16 %v2178_v8, %v2177_v56  ;;  %v3130_v28 = vld [vmem:[#allocation2 + $0x148] sm:$0xff] }
 0x20d   : > { %9224 = vmatprep.subr.bf16.mxu1 %v10320_v21  ;;  %v3132_v8 = vld [vmem:[#allocation2 + $0x168] sm:$0xff] }
 0x210   : > { %9225 = vmatpush3.bf16.msra.mxu1 %v10320_v21  ;;  %v3131_v21 = vld [vmem:[#allocation2 + $0x150] sm:$0xff] }
 0x211   : > { %9258 = vmatprep.subr.bf16.mxu1 %v10321_v39  ;;  %v3154_v56 = vpack.c.bf16 %v3131_v21, %v3130_v28  ;;  %v10338_v21 = vld [vmem:[%s12915_s6 + $0x8] sm:$0xff]  }
 0x213   : > { %9195 = vmatmul.mubr.msk.bf16.gmra.mrb[24].mxu1 %vm818_vm2, %v10961_v36  ;;  %v10322_v36 = vld [vmem:[%s12913_s4 + $0xc8] sm:$0xff]  }
 0x214   : > { %9198 = vmatprep.mubr.msk.bf16.mxu1 %vm818_vm2, %v10967_v41  ;;  %v10323_v41 = vld [vmem:[%s12913_s4 + $0xd0] sm:$0xff]  }
 0x21b   : > { %9199 = vmatmul.mubr.msk.bf16.gmra.mrb[28].mxu1 %vm818_vm2, %v10971_v46  ;;  %v10324_v46 = vld [vmem:[%s12913_s4 + $0xd8] sm:$0xff]  }
 0x21c   : > { %9202 = vmatprep.mubr.msk.bf16.mxu1 %vm818_vm2, %v10975_v50  ;;  %v10325_v50 = vld [vmem:[%s12913_s4 + $0xe0] sm:$0xff]  }
 0x223   : > { %9203 = vmatmul.mubr.msk.bf16.gmra.mrb[32].mxu1 %vm818_vm2, %v10977_v51  ;;  %v2499_v51 = vld [vmem:[#allocation2 + $0x209] sm:$0xff] }
 0x224   : > { %9206 = vmatprep.mubr.msk.bf16.mxu1 %vm818_vm2, %v10983_v57  ;;  %v2500_v57 = vld [vmem:[#allocation2 + $0x211] sm:$0xff] }
 0x22b   : > { %9207 = vmatmul.mubr.msk.bf16.gmra.mrb[36].mxu1 %vm818_vm2, %v10985_v58  ;;  %v11292_v58 = vpack.c.bf16 %v2500_v57, %v2499_v51  ;;  %v3136_v57 = vld [vmem:[#allocation2 + $0x1a8] sm:$0xff] }
 0x22c   : > { %9210 = vmatprep.mubr.msk.bf16.mxu1 %vm818_vm2, %v10991_v63  ;;  %v10326_v63 = vld [vmem:[%s12913_s4 + $0xe8] sm:$0xff]  }
 0x233   : > { %9211 = vmatmul.mubr.msk.bf16.gmra.mrb[40].mxu1 %vm818_vm2, %v10993_v0  ;;  %v10327_v0 = vld [vmem:[%s12913_s4 + $0xf0] sm:$0xff]  }
 0x234   : > { %9214 = vmatprep.mubr.msk.bf16.mxu1 %vm818_vm2, %v10999_v5  ;;  %v10328_v5 = vld [vmem:[%s12913_s4 + $0xf8] sm:$0xff]  }
 0x23b   : > { %9215 = vmatmul.mubr.msk.bf16.gmra.mrb[44].mxu1 %vm818_vm2, %v11246_v25 }
 0x23c   : > { %9226 = vmatprep.mubr.msk.bf16.mxu1 %vm818_vm2, %v11085_v31  ;;  %v10330_v31 = vld [vmem:[%s12913_s4 + $0x108] sm:$0xff]  }
 0x243   : > { %9227 = vmatmul.mubr.msk.bf16.vlgmr.msra.gmra.mrb[16].mxu1 %vm818_vm2, %v11090_v34 }
 0x244   : > { %9259 = vmatpush3.bf16.msra.mxu1 %v10321_v39  ;;  %9230 = vmatprep.mubr.msk.bf16.mxu1 %vm818_vm2, %v11100_v45 }
 0x245   : > { %9260 = vmatprep.subr.bf16.mxu1 %v10322_v36 }
 0x248   : > { %9261 = vmatpush3.bf16.msra.mxu1 %v10322_v36  ;;  %v3133_v36 = vld [vmem:[#allocation2 + $0x170] sm:$0xff] }
 0x249   : > { %9262 = vmatprep.subr.bf16.mxu1 %v10323_v41 }
 0x24b   : > { %9231 = vmatmul.mubr.msk.bf16.gmra.mrb[20].mxu1 %vm818_vm2, %v11105_v48 }
 0x24c   : > { %9234 = vmatprep.mubr.msk.bf16.mxu1 %vm818_vm2, %v11114_v62  ;;  %9263 = vmatpush3.bf16.msra.mxu1 %v10323_v41  ;;  %v3134_v41 = vld [vmem:[#allocation2 + $0x188] sm:$0xff] }
 0x24d   : > { %9264 = vmatprep.subr.bf16.mxu1 %v10324_v46 }
 0x250   : > { %9265 = vmatpush3.bf16.msra.mxu1 %v10324_v46  ;;  %v3135_v46 = vld [vmem:[#allocation2 + $0x190] sm:$0xff] }
 0x251   : > { %9298 = vmatprep.subr.bf16.mxu1 %v10325_v50  ;;  %v3156_v51 = vpack.c.bf16 %v3135_v46, %v3134_v41 }
 0x253   : > { %9235 = vmatmul.mubr.msk.bf16.gmra.mrb[24].mxu1 %vm818_vm2, %v11116_v1 }
 0x254   : > { %9238 = vmatprep.mubr.msk.bf16.mxu1 %vm818_vm2, %v11122_v10 }
 0x25b   : > { %9239 = vmatmul.mubr.msk.bf16.gmra.mrb[28].mxu1 %vm818_vm2, %v11124_v16 }
 0x25c   : > { %9242 = vmatprep.mubr.msk.bf16.mxu1 %vm818_vm2, %v11130_v26 }
 0x263   : > { %9243 = vmatmul.mubr.msk.bf16.gmra.mrb[32].mxu1 %vm818_vm2, %v11132_v27 }
 0x264   : > { %9246 = vmatprep.mubr.msk.bf16.mxu1 %vm818_vm2, %v11138_v40 }
 0x26b   : > { %9247 = vmatmul.mubr.msk.bf16.gmra.mrb[36].mxu1 %vm818_vm2, %v11140_v42 }
 0x26c   : > { %9250 = vmatprep.mubr.msk.bf16.mxu1 %vm818_vm2, %v11146_v54 }
 0x273   : > { %9251 = vmatmul.mubr.msk.bf16.gmra.mrb[40].mxu1 %vm818_vm2, %v11148_v55 }
 0x274   : > { %9254 = vmatprep.mubr.msk.bf16.mxu1 %vm818_vm2, %v11154_v6 }
 0x27b   : > { %9255 = vmatmul.mubr.msk.bf16.gmra.mrb[44].mxu1 %vm818_vm2, %v11292_v58 }
 0x27c   : > { %9266 = vmatprep.mubr.msk.bf16.mxu1 %vm818_vm2, %v11009_v15  ;;  %v10329_v15 = vld [vmem:[%s12913_s4 + $0x100] sm:$0xff]  }
 0x283   : > { %9267 = vmatmul.mubr.msk.bf16.vlgmr.msra.gmra.mrb[16].mxu1 %vm818_vm2, %v11019_v22  ;;  %v2822_v22 = vld [vmem:[#allocation2 + $0x227] sm:$0xff] }
 0x284   : > { %9299 = vmatpush3.bf16.msra.mxu1 %v10325_v50  ;;  %9270 = vmatprep.mubr.msk.bf16.mxu1 %vm818_vm2, %v11024_v23  ;;  %v2823_v23 = vld [vmem:[#allocation2 + $0x22f] sm:$0xff]  ;;  %v3155_v50 = vpack.c.bf16 %v3133_v36, %v3132_v8 }
 0x285   : > { %9300 = vmatprep.subr.bf16.mxu1 %v10326_v63 }
 0x288   : > { %9301 = vmatpush3.bf16.msra.mxu1 %v10326_v63  ;;  %v3137_v63 = vld [vmem:[#allocation2 + $0x1b0] sm:$0xff] }
 0x289   : > { %9302 = vmatprep.subr.bf16.mxu1 %v10327_v0 }
 0x28b   : > { %9271 = vmatmul.mubr.msk.bf16.gmra.mrb[20].mxu1 %vm818_vm2, %v11035_v30  ;;  %v2839_v30 = vpack.c.bf16 %v2823_v23, %v2822_v22  ;;  %v3140_v23 = vld [vmem:[#allocation2 + $0x1e8] sm:$0xff] }
 0x28c   : > { %9274 = vmatprep.mubr.msk.bf16.mxu1 %vm818_vm2, %v11038_v32  ;;  %9303 = vmatpush3.bf16.msra.mxu1 %v10327_v0  ;;  %v3114_v32 = vld [vmem:[#allocation2 + $0x48] sm:$0xff] }
 0x28d   : > { %9304 = vmatprep.subr.bf16.mxu1 %v10328_v5  ;;  %v3138_v0 = vld [vmem:[#allocation2 + $0x1c8] sm:$0xff] }
 0x290   : > { %9305 = vmatpush3.bf16.msra.mxu1 %v10328_v5  ;;  %v3139_v5 = vld [vmem:[#allocation2 + $0x1d0] sm:$0xff] }
 0x291   : > { %9338 = vmatprep.subr.bf16.mxu1 %v10329_v15  ;;  %v3158_v22 = vpack.c.bf16 %v3139_v5, %v3138_v0  ;;  %v10339_v0 = vld [vmem:[%s12915_s6 + $0x10] sm:$0xff]  }
 0x293   : > { %9275 = vmatmul.mubr.msk.bf16.gmra.mrb[24].mxu1 %vm818_vm2, %v11048_v49  ;;  %v3115_v49 = vld [vmem:[#allocation2 + $0x50] sm:$0xff] }
 0x294   : > { %9278 = vmatprep.mubr.msk.bf16.mxu1 %vm818_vm2, %v11050_v52  ;;  %v3146_v52 = vpack.c.bf16 %v3115_v49, %v3114_v32  ;;  %v3144_v49 = vld [vmem:[#allocation2 + $0x228] sm:$0xff] }
 0x29b   : > { %9279 = vmatmul.mubr.msk.bf16.gmra.mrb[28].mxu1 %vm818_vm2, %v11056_v59  ;;  %v10333_v59 = vld [vmem:[%s12915_s6 + $0x20] sm:$0xff]  }
 0x29c   : > { %9282 = vmatprep.mubr.msk.bf16.mxu1 %vm818_vm2, %v11058_v60  ;;  %v10334_v60 = vld [vmem:[%s12915_s6 + $0x28] sm:$0xff]   ;;  %9378 = vmatprep.subr.bf16.mxu0 %v10333_v59 }
 0x29d   : > { %9379 = vmatpush3.bf16.msra.mxu0 %v10333_v59 }
 0x29e   : > { %9380 = vmatprep.subr.bf16.mxu0 %v10334_v60 }
 0x2a1   : > { %9381 = vmatpush3.bf16.msra.mxu0 %v10334_v60 }
 0x2a3   : > { %9283 = vmatmul.mubr.msk.bf16.gmra.mrb[32].mxu1 %vm818_vm2, %v11064_v3  ;;  %v3116_v3 = vld [vmem:[#allocation2 + $0x68] sm:$0xff] }
 0x2a4   : > { %9286 = vmatprep.mubr.msk.bf16.mxu1 %vm818_vm2, %v11066_v4  ;;  %v3117_v4 = vld [vmem:[#allocation2 + $0x70] sm:$0xff] }
 0x2ab   : > { %9287 = vmatmul.mubr.msk.bf16.gmra.mrb[36].mxu1 %vm818_vm2, %v11072_v12  ;;  %v3118_v12 = vld [vmem:[#allocation2 + $0x88] sm:$0xff] }
 0x2ac   : > { %9290 = vmatprep.mubr.msk.bf16.mxu1 %vm818_vm2, %v11074_v14  ;;  %v3119_v14 = vld [vmem:[#allocation2 + $0x90] sm:$0xff] }
 0x2ad   : > { %v3148_v29 = vpack.c.bf16 %v3119_v14, %v3118_v12 }
 0x2b3   : > { %9291 = vmatmul.mubr.msk.bf16.gmra.mrb[40].mxu1 %vm818_vm2, %v11080_v11  ;;  %v3147_v11 = vpack.c.bf16 %v3117_v4, %v3116_v3 }
 0x2b4   : > { %9294 = vmatprep.mubr.msk.bf16.mxu1 %vm818_vm2, %v11200_v19  ;;  %v3128_v19 = vld [vmem:[#allocation2 + $0x128] sm:$0xff] }
 0x2b5   : > { %v3153_v39 = vpack.c.bf16 %v3129_v20, %v3128_v19 }
 0x2bb   : > { %9295 = vmatmul.mubr.msk.bf16.gmra.mrb[44].mxu1 %vm818_vm2, %v2839_v30  ;;  %v3141_v30 = vld [vmem:[#allocation2 + $0x1f0] sm:$0xff] }
 0x2bc   : > { %9306 = vmatprep.mubr.msk.bf16.mxu1 %vm818_vm2, %v3146_v52  ;;  %v3159_v32 = vpack.c.bf16 %v3141_v30, %v3140_v23  ;;  %v3145_v52 = vld [vmem:[#allocation2 + $0x230] sm:$0xff] }
 0x2bd   : > { %v3161_v59 = vpack.c.bf16 %v3145_v52, %v3144_v49 }
 0x2c3   : > { %9307 = vmatmul.mubr.msk.bf16.vlgmr.msra.gmra.mrb[16].mxu1 %vm818_vm2, %v3147_v11 }
 0x2c4   : > { %9339 = vmatpush3.bf16.msra.mxu1 %v10329_v15  ;;  %9310 = vmatprep.mubr.msk.bf16.mxu1 %vm818_vm2, %v3148_v29  ;;  %v3157_v15 = vpack.c.bf16 %v3137_v63, %v3136_v57 }
 0x2c5   : > { %9340 = vmatprep.subr.bf16.mxu1 %v10330_v31 }
 0x2c8   : > { %9341 = vmatpush3.bf16.msra.mxu1 %v10330_v31 }
 0x2c9   : > { %9342 = vmatprep.subr.bf16.mxu1 %v10331_v33 }
 0x2cb   : > { %9311 = vmatmul.mubr.msk.bf16.gmra.mrb[20].mxu1 %vm818_vm2, %v3149_v53 }
 0x2cc   : > { %9314 = vmatprep.mubr.msk.bf16.mxu1 %vm818_vm2, %v3150_v2  ;;  %9343 = vmatpush3.bf16.msra.mxu1 %v10331_v33 }
 0x2cd   : > { %9344 = vmatprep.subr.bf16.mxu1 %v10332_v61 }
 0x2d0   : > { %9345 = vmatpush3.bf16.msra.mxu1 %v10332_v61 }
 0x2d3   : > { %9315 = vmatmul.mubr.msk.bf16.gmra.mrb[24].mxu1 %vm818_vm2, %v3151_v17 }
 0x2d4   : > { %9318 = vmatprep.mubr.msk.bf16.mxu1 %vm818_vm2, %v3152_v18 }
 0x2db   : > { %9319 = vmatmul.mubr.msk.bf16.gmra.mrb[28].mxu1 %vm818_vm2, %v3153_v39 }
 0x2dc   : > { %9322 = vmatprep.mubr.msk.bf16.mxu1 %vm818_vm2, %v3154_v56 }
 0x2e3   : > { %9323 = vmatmul.mubr.msk.bf16.gmra.mrb[32].mxu1 %vm818_vm2, %v3155_v50 }
 0x2e4   : > { %9326 = vmatprep.mubr.msk.bf16.mxu1 %vm818_vm2, %v3156_v51 }
 0x2eb   : > { %9327 = vmatmul.mubr.msk.bf16.gmra.mrb[36].mxu1 %vm818_vm2, %v3157_v15 }
 0x2ec   : > { %9330 = vmatprep.mubr.msk.bf16.mxu1 %vm818_vm2, %v3158_v22 }
 0x2f3   : > { %9331 = vmatmul.mubr.msk.bf16.gmra.mrb[40].mxu1 %vm818_vm2, %v3159_v32 }
 0x2f4   : > { %9334 = vmatprep.mubr.msk.bf16.mxu1 %vm818_vm2, %v11246_v25 }
 0x2fb   : > { %9335 = vmatmul.mubr.msk.bf16.gmra.mrb[44].mxu1 %vm818_vm2, %v3161_v59  ;;  %v10340_v59 = vld [vmem:[%s12915_s6 + $0x18] sm:$0xff]  }
 0x2fc   : > { %9346 = vmatprep.mubr.msk.bf16.mxu1 %vm818_vm2, %v11090_v34  ;;  %v3466_v34 = vld [vmem:[#allocation2 + $0x229] sm:$0xff] }
 0x303   : > { %9347 = vmatmul.mubr.msk.bf16.vlgmr.msra.gmra.mrb[16].mxu1 %vm818_vm2, %v11100_v45  ;;  %v3467_v45 = vld [vmem:[#allocation2 + $0x231] sm:$0xff] }
 0x304   : > { %9350 = vmatprep.mubr.msk.bf16.mxu1 %vm818_vm2, %v11105_v48  ;;  %v3483_v48 = vpack.c.bf16 %v3467_v45, %v3466_v34 }
 0x30b   : > { %9351 = vmatmul.mubr.msk.bf16.gmra.mrb[20].mxu1 %vm818_vm2, %v11114_v62  ;;  %v10490_v62 = vmov 0.0  }
 0x30c   : > { %9354 = vmatprep.mubr.msk.bf16.mxu1 %vm818_vm2, %v11116_v1  ;;  %3838 = vst.msk [vmem:[#allocation3 + $0x48] sm:$0xff] %vm818_vm2, %v10490_v62  ;;  %3829 = vst.msk [vmem:[#allocation3] sm:$0xff] %vm818_vm2, %v10490_v62  ;;  %v10335_v1 = vld [vmem:[%s12915_s6 + $0x30] sm:$0xff]  }
 0x30d   : > { %3830 = vst.msk [vmem:[#allocation3 + $0x8] sm:$0xff] %vm818_vm2, %v10490_v62  ;;  %3831 = vst.msk [vmem:[#allocation3 + $0x10] sm:$0xff] %vm818_vm2, %v10490_v62  ;;  %9382 = vmatprep.subr.bf16.mxu0 %v10335_v1 }
 0x30e   : > { %3832 = vst.msk [vmem:[#allocation3 + $0x18] sm:$0xff] %vm818_vm2, %v10490_v62  ;;  %3833 = vst.msk [vmem:[#allocation3 + $0x20] sm:$0xff] %vm818_vm2, %v10490_v62  ;;  %9383 = vmatpush3.bf16.msra.mxu0 %v10335_v1 }
 0x30f   : > { %3834 = vst.msk [vmem:[#allocation3 + $0x28] sm:$0xff] %vm818_vm2, %v10490_v62  ;;  %3835 = vst.msk [vmem:[#allocation3 + $0x30] sm:$0xff] %vm818_vm2, %v10490_v62 }
 0x310   : > { %3836 = vst.msk [vmem:[#allocation3 + $0x38] sm:$0xff] %vm818_vm2, %v10490_v62  ;;  %3837 = vst.msk [vmem:[#allocation3 + $0x40] sm:$0xff] %vm818_vm2, %v10490_v62 }
 0x311   : > { %3839 = vst.msk [vmem:[#allocation3 + $0x50] sm:$0xff] %vm818_vm2, %v10490_v62  ;;  %3840 = vst.msk [vmem:[#allocation3 + $0x58] sm:$0xff] %vm818_vm2, %v10490_v62 }
 0x312   : > { %3841 = vst.msk [vmem:[#allocation3 + $0x60] sm:$0xff] %vm818_vm2, %v10490_v62  ;;  %3842 = vst.msk [vmem:[#allocation3 + $0x68] sm:$0xff] %vm818_vm2, %v10490_v62 }
 0x313   : > { %9355 = vmatmul.mubr.msk.bf16.gmra.mrb[24].mxu1 %vm818_vm2, %v11122_v10  ;;  %3843 = vst.msk [vmem:[#allocation3 + $0x70] sm:$0xff] %vm818_vm2, %v10490_v62  ;;  %3844 = vst.msk [vmem:[#allocation3 + $0x78] sm:$0xff] %vm818_vm2, %v10490_v62  ;;  %v10336_v10 = vld [vmem:[%s12915_s6 + $0x38] sm:$0xff]  }
 0x314   : > { %9358 = vmatprep.mubr.msk.bf16.mxu1 %vm818_vm2, %v11124_v16  ;;  %3845 = vst.msk [vmem:[#allocation3 + $0x80] sm:$0xff] %vm818_vm2, %v10490_v62  ;;  %3846 = vst.msk [vmem:[#allocation3 + $0x88] sm:$0xff] %vm818_vm2, %v10490_v62  ;;  %9384 = vmatprep.subr.bf16.mxu0 %v10336_v10  ;;  %v3990_v16 = vld [vmem:[#allocation3 + $0x8] sm:$0xff] }
 0x315   : > { %3847 = vst.msk [vmem:[#allocation3 + $0x90] sm:$0xff] %vm818_vm2, %v10490_v62  ;;  %3848 = vst.msk [vmem:[#allocation3 + $0x98] sm:$0xff] %vm818_vm2, %v10490_v62  ;;  %9385 = vmatpush3.bf16.msra.mxu0 %v10336_v10 }
 0x316   : > { %3849 = vst.msk [vmem:[#allocation3 + $0xa0] sm:$0xff] %vm818_vm2, %v10490_v62  ;;  %3850 = vst.msk [vmem:[#allocation3 + $0xa8] sm:$0xff] %vm818_vm2, %v10490_v62 }
 0x317   : > { %3851 = vst.msk [vmem:[#allocation3 + $0xb0] sm:$0xff] %vm818_vm2, %v10490_v62  ;;  %3852 = vst.msk [vmem:[#allocation3 + $0xb8] sm:$0xff] %vm818_vm2, %v10490_v62 }
 0x318   : > { %3853 = vst.msk [vmem:[#allocation3 + $0xc0] sm:$0xff] %vm818_vm2, %v10490_v62  ;;  %3854 = vst.msk [vmem:[#allocation3 + $0xc8] sm:$0xff] %vm818_vm2, %v10490_v62 }
 0x319   : > { %3855 = vst.msk [vmem:[#allocation3 + $0xd0] sm:$0xff] %vm818_vm2, %v10490_v62  ;;  %3856 = vst.msk [vmem:[#allocation3 + $0xd8] sm:$0xff] %vm818_vm2, %v10490_v62 }
 0x31a   : > { %3857 = vst.msk [vmem:[#allocation3 + $0xe0] sm:$0xff] %vm818_vm2, %v10490_v62  ;;  %3858 = vst.msk [vmem:[#allocation3 + $0xe8] sm:$0xff] %vm818_vm2, %v10490_v62 }
 0x31b   : > { %9359 = vmatmul.mubr.msk.bf16.gmra.mrb[28].mxu1 %vm818_vm2, %v11130_v26  ;;  %3859 = vst.msk [vmem:[#allocation3 + $0xf0] sm:$0xff] %vm818_vm2, %v10490_v62  ;;  %3860 = vst.msk [vmem:[#allocation3 + $0xf8] sm:$0xff] %vm818_vm2, %v10490_v62  ;;  %v3991_v26 = vld [vmem:[#allocation3 + $0x10] sm:$0xff] }
 0x31c   : > { %9362 = vmatprep.mubr.msk.bf16.mxu1 %vm818_vm2, %v11132_v27  ;;  %3861 = vst.msk [vmem:[#allocation3 + $0x100] sm:$0xff] %vm818_vm2, %v10490_v62  ;;  %3862 = vst.msk [vmem:[#allocation3 + $0x108] sm:$0xff] %vm818_vm2, %v10490_v62  ;;  %v10337_v27 = vld [vmem:[%s12915_s6] sm:$0xff]  }
 0x31d   : > { %3863 = vst.msk [vmem:[#allocation3 + $0x110] sm:$0xff] %vm818_vm2, %v10490_v62  ;;  %3864 = vst.msk [vmem:[#allocation3 + $0x118] sm:$0xff] %vm818_vm2, %v10490_v62  ;;  %9418 = vmatprep.subr.bf16.mxu0 %v10337_v27 }
 0x31e   : > { %3865 = vst.msk [vmem:[#allocation3 + $0x120] sm:$0xff] %vm818_vm2, %v10490_v62  ;;  %3866 = vst.msk [vmem:[#allocation3 + $0x128] sm:$0xff] %vm818_vm2, %v10490_v62 }
 0x31f   : > { %3867 = vst.msk [vmem:[#allocation3 + $0x130] sm:$0xff] %vm818_vm2, %v10490_v62  ;;  %3868 = vst.msk [vmem:[#allocation3 + $0x138] sm:$0xff] %vm818_vm2, %v10490_v62 }
 0x320   : > { %3869 = vst.msk [vmem:[#allocation3 + $0x140] sm:$0xff] %vm818_vm2, %v10490_v62  ;;  %3870 = vst.msk [vmem:[#allocation3 + $0x148] sm:$0xff] %vm818_vm2, %v10490_v62 }
 0x321   : > { %3871 = vst.msk [vmem:[#allocation3 + $0x150] sm:$0xff] %vm818_vm2, %v10490_v62  ;;  %3872 = vst.msk [vmem:[#allocation3 + $0x158] sm:$0xff] %vm818_vm2, %v10490_v62 }
 0x322   : > { %3873 = vst.msk [vmem:[#allocation3 + $0x160] sm:$0xff] %vm818_vm2, %v10490_v62  ;;  %3874 = vst.msk [vmem:[#allocation3 + $0x168] sm:$0xff] %vm818_vm2, %v10490_v62 }
 0x323   : > { %9363 = vmatmul.mubr.msk.bf16.gmra.mrb[32].mxu1 %vm818_vm2, %v11138_v40  ;;  %3875 = vst.msk [vmem:[#allocation3 + $0x170] sm:$0xff] %vm818_vm2, %v10490_v62  ;;  %3876 = vst.msk [vmem:[#allocation3 + $0x178] sm:$0xff] %vm818_vm2, %v10490_v62  ;;  %v4022_v40 = vpack.c.bf16 %v3991_v26, %v3990_v16 }
 0x324   : > { %9366 = vmatprep.mubr.msk.bf16.mxu1 %vm818_vm2, %v11140_v42  ;;  %3877 = vst.msk [vmem:[#allocation3 + $0x180] sm:$0xff] %vm818_vm2, %v10490_v62  ;;  %3878 = vst.msk [vmem:[#allocation3 + $0x188] sm:$0xff] %vm818_vm2, %v10490_v62  ;;  %v11559_v42 = vld [vmem:[%s12914_s5] ss:$0 sm:$0xff] }
 0x325   : > { %3879 = vst.msk [vmem:[#allocation3 + $0x190] sm:$0xff] %vm818_vm2, %v10490_v62  ;;  %3880 = vst.msk [vmem:[#allocation3 + $0x198] sm:$0xff] %vm818_vm2, %v10490_v62  ;;  %9386 = vmatprep.mubr.msk.bf16.mxu0 %vm818_vm2, %v4022_v40 }
 0x326   : > { %3881 = vst.msk [vmem:[#allocation3 + $0x1a0] sm:$0xff] %vm818_vm2, %v10490_v62  ;;  %3882 = vst.msk [vmem:[#allocation3 + $0x1a8] sm:$0xff] %vm818_vm2, %v10490_v62 }
 0x327   : > { %3883 = vst.msk [vmem:[#allocation3 + $0x1b0] sm:$0xff] %vm818_vm2, %v10490_v62  ;;  %3884 = vst.msk [vmem:[#allocation3 + $0x1b8] sm:$0xff] %vm818_vm2, %v10490_v62 }
 0x328   : > { %3885 = vst.msk [vmem:[#allocation3 + $0x1c0] sm:$0xff] %vm818_vm2, %v10490_v62  ;;  %3886 = vst.msk [vmem:[#allocation3 + $0x1c8] sm:$0xff] %vm818_vm2, %v10490_v62 }
 0x329   : > { %3887 = vst.msk [vmem:[#allocation3 + $0x1d0] sm:$0xff] %vm818_vm2, %v10490_v62  ;;  %3888 = vst.msk [vmem:[#allocation3 + $0x1d8] sm:$0xff] %vm818_vm2, %v10490_v62 }
 0x32a   : > { %3889 = vst.msk [vmem:[#allocation3 + $0x1e0] sm:$0xff] %vm818_vm2, %v10490_v62  ;;  %3890 = vst.msk [vmem:[#allocation3 + $0x1e8] sm:$0xff] %vm818_vm2, %v10490_v62 }
 0x32b   : > { %9367 = vmatmul.mubr.msk.bf16.gmra.mrb[36].mxu1 %vm818_vm2, %v11146_v54  ;;  %3891 = vst.msk [vmem:[#allocation3 + $0x1f0] sm:$0xff] %vm818_vm2, %v10490_v62  ;;  %3892 = vst.msk [vmem:[#allocation3 + $0x1f8] sm:$0xff] %vm818_vm2, %v10490_v62 }
 0x32c   : > { %9370 = vmatprep.mubr.msk.bf16.mxu1 %vm818_vm2, %v11148_v55  ;;  %3893 = vst.msk [vmem:[#allocation3 + $0x200] sm:$0xff] %vm818_vm2, %v10490_v62  ;;  %3894 = vst.msk [vmem:[#allocation3 + $0x208] sm:$0xff] %vm818_vm2, %v10490_v62 }
 0x32d   : > { %3895 = vst.msk [vmem:[#allocation3 + $0x210] sm:$0xff] %vm818_vm2, %v10490_v62  ;;  %3896 = vst.msk [vmem:[#allocation3 + $0x218] sm:$0xff] %vm818_vm2, %v10490_v62 }
 0x32e   : > { %3897 = vst.msk [vmem:[#allocation3 + $0x220] sm:$0xff] %vm818_vm2, %v10490_v62  ;;  %3898 = vst.msk [vmem:[#allocation3 + $0x228] sm:$0xff] %vm818_vm2, %v10490_v62 }
 0x32f   : > { %3899 = vst.msk [vmem:[#allocation3 + $0x230] sm:$0xff] %vm818_vm2, %v10490_v62  ;;  %3900 = vst.msk [vmem:[#allocation3 + $0x238] sm:$0xff] %vm818_vm2, %v10490_v62 }
 0x333   : > { %9371 = vmatmul.mubr.msk.bf16.gmra.mrb[40].mxu1 %vm818_vm2, %v11154_v6 }
 0x334   : > { %9374 = vmatprep.mubr.msk.bf16.mxu1 %vm818_vm2, %v11292_v58 }
 0x33b   : > { %9375 = vmatmul.mubr.msk.bf16.gmra.mrb[44].mxu1 %vm818_vm2, %v3483_v48 }
 0x3d6   : > { %v9348_v54 = vpop.f32.mrb[16].mxu1 }
 0x3d7   : > { %v3767_v55 = vadd.f32 %v9348_v54, %v11559_v42  ;;  %v3599_v6 = vpop.f32.mrb[17].mxu1 }
 0x3d8   : > { %v3765_v25 = vadd.f32 %v11559_v42, %v3599_v6  ;;  %v9349_v58 = vpop.f32.mrb[18].mxu1 }
 0x3d9   : > { %v3799_v60 = vmax.f32 %v3767_v55, 0.0  ;;  %v3768_v3 = vadd.f32 %v9349_v58, %v11559_v42  ;;  %v3602_v4 = vpop.f32.mrb[19].mxu1  ;;  %v11617_v55 = vld [vmem:[%s12915_s6 + $0x40] sm:$0xff]  }
 0x3da   : > { %v3797_v12 = vmax.f32 %v3765_v25, 0.0  ;;  %v3766_v14 = vadd.f32 %v11559_v42, %v3602_v4 }
 0x3db   : > { %3904 = vst.msk [vmem:[#allocation3 + $0x48] sm:$0xff] %vm818_vm2, %v3799_v60  ;;  %v3800_v11 = vmax.f32 %v3768_v3, 0.0 }
 0x3dc   : > { %3902 = vst.msk [vmem:[#allocation3 + $0x28] sm:$0xff] %vm818_vm2, %v3797_v12  ;;  %v3798_v31 = vmax.f32 %v3766_v14, 0.0 }
 0x3dd   : > { %3905 = vst.msk [vmem:[#allocation3 + $0x50] sm:$0xff] %vm818_vm2, %v3800_v11 }
 0x3de   : > { %3903 = vst.msk [vmem:[#allocation3 + $0x30] sm:$0xff] %vm818_vm2, %v3798_v31  ;;  %v9352_v29 = vpop.f32.mrb[20].mxu1 }
 0x3df   : > { %v3771_v33 = vadd.f32 %v9352_v29, %v11559_v42  ;;  %v3615_v38 = vpop.f32.mrb[21].mxu1 }
 0x3e0   : > { %v3769_v43 = vadd.f32 %v11559_v42, %v3615_v38  ;;  %v9353_v44 = vpop.f32.mrb[22].mxu1 }
 0x3e1   : > { %v3803_v24 = vmax.f32 %v3771_v33, 0.0  ;;  %v3772_v53 = vadd.f32 %v9353_v44, %v11559_v42  ;;  %v3618_v61 = vpop.f32.mrb[23].mxu1 }
 0x3e2   : > { %v3801_v2 = vmax.f32 %v3769_v43, 0.0  ;;  %v3770_v7 = vadd.f32 %v11559_v42, %v3618_v61  ;;  %v3994_v28 = vld [vmem:[#allocation3 + $0x48] sm:$0xff] }
 0x3e3   : > { %3908 = vst.msk [vmem:[#allocation3 + $0x88] sm:$0xff] %vm818_vm2, %v3803_v24  ;;  %v3804_v9 = vmax.f32 %v3772_v53, 0.0  ;;  %v3992_v17 = vld [vmem:[#allocation3 + $0x28] sm:$0xff] }
 0x3e4   : > { %3906 = vst.msk [vmem:[#allocation3 + $0x68] sm:$0xff] %vm818_vm2, %v3801_v2  ;;  %v3802_v13 = vmax.f32 %v3770_v7, 0.0  ;;  %v3995_v47 = vld [vmem:[#allocation3 + $0x50] sm:$0xff] }
 0x3e5   : > { %3909 = vst.msk [vmem:[#allocation3 + $0x90] sm:$0xff] %vm818_vm2, %v3804_v9  ;;  %v3993_v18 = vld [vmem:[#allocation3 + $0x30] sm:$0xff]  ;;  %v11583_v8 = vpack.c.bf16 %v3995_v47, %v3994_v28 }
 0x3e6   : > { %3907 = vst.msk [vmem:[#allocation3 + $0x70] sm:$0xff] %vm818_vm2, %v3802_v13  ;;  %v9356_v19 = vpop.f32.mrb[24].mxu1  ;;  %v11577_v20 = vpack.c.bf16 %v3993_v18, %v3992_v17 }
 0x3e7   : > { %v3775_v39 = vadd.f32 %v9356_v19, %v11559_v42  ;;  %v3631_v56 = vpop.f32.mrb[25].mxu1 }
 0x3e8   : > { %v3773_v36 = vadd.f32 %v11559_v42, %v3631_v56  ;;  %v9357_v41 = vpop.f32.mrb[26].mxu1  ;;  %9387 = vmatmul.mubr.msk.bf16.vlgmr.msra.gmra.mrb[16].mxu0 %vm818_vm2, %v11577_v20 }
 0x3e9   : > { %v3807_v46 = vmax.f32 %v3775_v39, 0.0  ;;  %v3776_v50 = vadd.f32 %v9357_v41, %v11559_v42  ;;  %9419 = vmatpush3.bf16.msra.mxu0 %v10337_v27  ;;  %v3634_v51 = vpop.f32.mrb[27].mxu1  ;;  %9390 = vmatprep.mubr.msk.bf16.mxu0 %vm818_vm2, %v11583_v8 }
 0x3ea   : > { %v3805_v57 = vmax.f32 %v3773_v36, 0.0  ;;  %v3774_v63 = vadd.f32 %v11559_v42, %v3634_v51  ;;  %9420 = vmatprep.subr.bf16.mxu0 %v10338_v21  ;;  %v3998_v52 = vld [vmem:[#allocation3 + $0x88] sm:$0xff] }
 0x3eb   : > { %3912 = vst.msk [vmem:[#allocation3 + $0xc8] sm:$0xff] %vm818_vm2, %v3807_v46  ;;  %v3808_v5 = vmax.f32 %v3776_v50, 0.0  ;;  %v3996_v23 = vld [vmem:[#allocation3 + $0x68] sm:$0xff] }
 0x3ec   : > { %3910 = vst.msk [vmem:[#allocation3 + $0xa8] sm:$0xff] %vm818_vm2, %v3805_v57  ;;  %v3806_v15 = vmax.f32 %v3774_v63, 0.0  ;;  %v3999_v22 = vld [vmem:[#allocation3 + $0x90] sm:$0xff] }
 0x3ed   : > { %3913 = vst.msk [vmem:[#allocation3 + $0xd0] sm:$0xff] %vm818_vm2, %v3808_v5  ;;  %v3997_v30 = vld [vmem:[#allocation3 + $0x70] sm:$0xff]  ;;  %9421 = vmatpush3.bf16.msra.mxu0 %v10338_v21  ;;  %v11605_v48 = vpack.c.bf16 %v3999_v22, %v3998_v52 }
 0x3ee   : > { %3911 = vst.msk [vmem:[#allocation3 + $0xb0] sm:$0xff] %vm818_vm2, %v3806_v15  ;;  %v9360_v32 = vpop.f32.mrb[28].mxu1  ;;  %v11599_v49 = vpack.c.bf16 %v3997_v30, %v3996_v23  ;;  %9422 = vmatprep.subr.bf16.mxu0 %v10339_v0 }
 0x3ef   : > { %v3779_v34 = vadd.f32 %v9360_v32, %v11559_v42  ;;  %v3647_v45 = vpop.f32.mrb[29].mxu1 }
 0x3f0   : > { %v3777_v1 = vadd.f32 %v11559_v42, %v3647_v45  ;;  %v9361_v10 = vpop.f32.mrb[30].mxu1  ;;  %9391 = vmatmul.mubr.msk.bf16.gmra.mrb[20].mxu0 %vm818_vm2, %v11599_v49 }
 0x3f1   : > { %v3811_v16 = vmax.f32 %v3779_v34, 0.0  ;;  %v3780_v26 = vadd.f32 %v9361_v10, %v11559_v42  ;;  %v3650_v27 = vpop.f32.mrb[31].mxu1  ;;  %9394 = vmatprep.mubr.msk.bf16.mxu0 %vm818_vm2, %v11605_v48  ;;  %9423 = vmatpush3.bf16.msra.mxu0 %v10339_v0 }
 0x3f2   : > { %v3809_v40 = vmax.f32 %v3777_v1, 0.0  ;;  %v3778_v54 = vadd.f32 %v11559_v42, %v3650_v27  ;;  %9424 = vmatprep.subr.bf16.mxu0 %v10340_v59  ;;  %v4002_v14 = vld [vmem:[#allocation3 + $0xc8] sm:$0xff] }
 0x3f3   : > { %3916 = vst.msk [vmem:[#allocation3 + $0x108] sm:$0xff] %vm818_vm2, %v3811_v16  ;;  %v3812_v6 = vmax.f32 %v3780_v26, 0.0  ;;  %v4000_v60 = vld [vmem:[#allocation3 + $0xa8] sm:$0xff] }
 0x3f4   : > { %3914 = vst.msk [vmem:[#allocation3 + $0xe8] sm:$0xff] %vm818_vm2, %v3809_v40  ;;  %v3810_v25 = vmax.f32 %v3778_v54, 0.0  ;;  %v4003_v58 = vld [vmem:[#allocation3 + $0xd0] sm:$0xff] }
 0x3f5   : > { %3917 = vst.msk [vmem:[#allocation3 + $0x110] sm:$0xff] %vm818_vm2, %v3812_v6  ;;  %v4001_v3 = vld [vmem:[#allocation3 + $0xb0] sm:$0xff]  ;;  %9425 = vmatpush3.bf16.msra.mxu0 %v10340_v59  ;;  %v11627_v29 = vpack.c.bf16 %v4003_v58, %v4002_v14 }
 0x3f6   : > { %3915 = vst.msk [vmem:[#allocation3 + $0xf0] sm:$0xff] %vm818_vm2, %v3810_v25  ;;  %v9364_v4 = vpop.f32.mrb[32].mxu1  ;;  %v11623_v12 = vpack.c.bf16 %v4001_v3, %v4000_v60  ;;  %9458 = vmatprep.subr.bf16.mxu0 %v11617_v55 }
 0x3f7   : > { %v3783_v11 = vadd.f32 %v9364_v4, %v11559_v42  ;;  %v3663_v31 = vpop.f32.mrb[33].mxu1 }
 0x3f8   : > { %v3781_v33 = vadd.f32 %v11559_v42, %v3663_v31  ;;  %v9365_v38 = vpop.f32.mrb[34].mxu1  ;;  %9395 = vmatmul.mubr.msk.bf16.gmra.mrb[24].mxu0 %vm818_vm2, %v11623_v12 }
 0x3f9   : > { %v3815_v43 = vmax.f32 %v3783_v11, 0.0  ;;  %v3784_v44 = vadd.f32 %v9365_v38, %v11559_v42  ;;  %v3666_v24 = vpop.f32.mrb[35].mxu1  ;;  %9398 = vmatprep.mubr.msk.bf16.mxu0 %vm818_vm2, %v11627_v29 }
 0x3fa   : > { %v3813_v53 = vmax.f32 %v3781_v33, 0.0  ;;  %v3782_v61 = vadd.f32 %v11559_v42, %v3666_v24  ;;  %v4006_v19 = vld [vmem:[#allocation3 + $0x108] sm:$0xff] }
 0x3fb   : > { %3920 = vst.msk [vmem:[#allocation3 + $0x148] sm:$0xff] %vm818_vm2, %v3815_v43  ;;  %v3816_v2 = vmax.f32 %v3784_v44, 0.0  ;;  %v4004_v13 = vld [vmem:[#allocation3 + $0xe8] sm:$0xff] }
 0x3fc   : > { %3918 = vst.msk [vmem:[#allocation3 + $0x128] sm:$0xff] %vm818_vm2, %v3813_v53  ;;  %v3814_v7 = vmax.f32 %v3782_v61, 0.0  ;;  %v4007_v9 = vld [vmem:[#allocation3 + $0x110] sm:$0xff] }
 0x3fd   : > { %3921 = vst.msk [vmem:[#allocation3 + $0x150] sm:$0xff] %vm818_vm2, %v3816_v2  ;;  %v4005_v47 = vld [vmem:[#allocation3 + $0xf0] sm:$0xff]  ;;  %v11643_v39 = vpack.c.bf16 %v4007_v9, %v4006_v19 }
 0x3fe   : > { %3919 = vst.msk [vmem:[#allocation3 + $0x130] sm:$0xff] %vm818_vm2, %v3814_v7  ;;  %v9368_v17 = vpop.f32.mrb[36].mxu1  ;;  %v11640_v18 = vpack.c.bf16 %v4005_v47, %v4004_v13 }
 0x3ff   : > { %v3787_v28 = vadd.f32 %v9368_v17, %v11559_v42  ;;  %v3679_v21 = vpop.f32.mrb[37].mxu1 }
 0x400   : > { %v3785_v56 = vadd.f32 %v11559_v42, %v3679_v21  ;;  %v9369_v36 = vpop.f32.mrb[38].mxu1  ;;  %9399 = vmatmul.mubr.msk.bf16.gmra.mrb[28].mxu0 %vm818_vm2, %v11640_v18 }
 0x401   : > { %v3819_v41 = vmax.f32 %v3787_v28, 0.0  ;;  %v3788_v46 = vadd.f32 %v9369_v36, %v11559_v42  ;;  %v3682_v50 = vpop.f32.mrb[39].mxu1  ;;  %9402 = vmatprep.mubr.msk.bf16.mxu0 %vm818_vm2, %v11643_v39 }
 0x402   : > { %v3817_v51 = vmax.f32 %v3785_v56, 0.0  ;;  %v3786_v57 = vadd.f32 %v11559_v42, %v3682_v50  ;;  %v4010_v32 = vld [vmem:[#allocation3 + $0x148] sm:$0xff] }
 0x403   : > { %3924 = vst.msk [vmem:[#allocation3 + $0x188] sm:$0xff] %vm818_vm2, %v3819_v41  ;;  %v3820_v63 = vmax.f32 %v3788_v46, 0.0  ;;  %v4008_v15 = vld [vmem:[#allocation3 + $0x128] sm:$0xff] }
 0x404   : > { %3922 = vst.msk [vmem:[#allocation3 + $0x168] sm:$0xff] %vm818_vm2, %v3817_v51  ;;  %v3818_v0 = vmax.f32 %v3786_v57, 0.0  ;;  %v4011_v5 = vld [vmem:[#allocation3 + $0x150] sm:$0xff] }
 0x405   : > { %3925 = vst.msk [vmem:[#allocation3 + $0x190] sm:$0xff] %vm818_vm2, %v3820_v63  ;;  %v4009_v22 = vld [vmem:[#allocation3 + $0x130] sm:$0xff]  ;;  %v11659_v34 = vpack.c.bf16 %v4011_v5, %v4010_v32  ;;  %v3936_v63 = vld [vmem:[#allocation3 + $0x27] sm:$0xff] }
 0x406   : > { %3923 = vst.msk [vmem:[#allocation3 + $0x170] sm:$0xff] %vm818_vm2, %v3818_v0  ;;  %v9372_v23 = vpop.f32.mrb[40].mxu1  ;;  %v11656_v30 = vpack.c.bf16 %v4009_v22, %v4008_v15  ;;  %v3935_v56 = vld [vmem:[#allocation3 + $0xf] sm:$0xff]  ;;  %v3938_v5 = vld [vmem:[#allocation3 + $0x47] sm:$0xff] }
 0x407   : > { %v3791_v52 = vadd.f32 %v9372_v23, %v11559_v42  ;;  %v3695_v59 = vpop.f32.mrb[41].mxu1  ;;  %v3937_v51 = vld [vmem:[#allocation3 + $0x2f] sm:$0xff] }
 0x408   : > { %v3789_v45 = vadd.f32 %v11559_v42, %v3695_v59  ;;  %v9373_v1 = vpop.f32.mrb[42].mxu1  ;;  %9403 = vmatmul.mubr.msk.bf16.gmra.mrb[32].mxu0 %vm818_vm2, %v11656_v30  ;;  %v3939_v57 = vld [vmem:[#allocation3 + $0x4f] sm:$0xff]  ;;  %v11701_v0 = vpack.c.bf16 %v3937_v51, %v3936_v63  ;;  %v3940_v59 = vld [vmem:[#allocation3 + $0x67] sm:$0xff] }
 0x409   : > { %v3823_v10 = vmax.f32 %v3791_v52, 0.0  ;;  %v3792_v16 = vadd.f32 %v9373_v1, %v11559_v42  ;;  %v3698_v26 = vpop.f32.mrb[43].mxu1  ;;  %9406 = vmatprep.mubr.msk.bf16.mxu0 %vm818_vm2, %v11659_v34  ;;  %v10342_v15 = vld [vmem:[%s12915_s6 + $0x48] sm:$0xff]   ;;  %v11706_v22 = vpack.c.bf16 %v3939_v57, %v3938_v5  ;;  %v10343_v23 = vld [vmem:[%s12915_s6 + $0x50] sm:$0xff]  }
 0x40a   : > { %v3821_v27 = vmax.f32 %v3789_v45, 0.0  ;;  %v3790_v40 = vadd.f32 %v11559_v42, %v3698_v26  ;;  %v4014_v14 = vld [vmem:[#allocation3 + $0x188] sm:$0xff]  ;;  %v4514_v57 = vld [vmem:[#allocation3 + $0x11] sm:$0xff] }
 0x40b   : > { %3928 = vst.msk [vmem:[#allocation3 + $0x1c8] sm:$0xff] %vm818_vm2, %v3823_v10  ;;  %v3824_v54 = vmax.f32 %v3792_v16, 0.0  ;;  %v4012_v58 = vld [vmem:[#allocation3 + $0x168] sm:$0xff]  ;;  %v10345_v16 = vld [vmem:[%s12915_s6 + $0x60] sm:$0xff]  }
 0x40c   : > { %3926 = vst.msk [vmem:[#allocation3 + $0x1a8] sm:$0xff] %vm818_vm2, %v3821_v27  ;;  %v3822_v6 = vmax.f32 %v3790_v40, 0.0  ;;  %v4015_v25 = vld [vmem:[#allocation3 + $0x190] sm:$0xff]  ;;  %v3942_v1 = vld [vmem:[#allocation3 + $0x87] sm:$0xff] }
 0x40d   : > { %3929 = vst.msk [vmem:[#allocation3 + $0x1d0] sm:$0xff] %vm818_vm2, %v3824_v54  ;;  %v4013_v60 = vld [vmem:[#allocation3 + $0x170] sm:$0xff]  ;;  %v11675_v33 = vpack.c.bf16 %v4015_v25, %v4014_v14  ;;  %v3944_v40 = vld [vmem:[#allocation3 + $0xa7] sm:$0xff] }
 0x40e   : > { %3927 = vst.msk [vmem:[#allocation3 + $0x1b0] sm:$0xff] %vm818_vm2, %v3822_v6  ;;  %v9376_v3 = vpop.f32.mrb[44].mxu1  ;;  %v11672_v4 = vpack.c.bf16 %v4013_v60, %v4012_v58  ;;  %v3941_v32 = vld [vmem:[#allocation3 + $0x6f] sm:$0xff]  ;;  %v3946_v6 = vld [vmem:[#allocation3 + $0xc7] sm:$0xff] }
 0x40f   : > { %v3795_v11 = vadd.f32 %v9376_v3, %v11559_v42  ;;  %v3711_v31 = vpop.f32.mrb[45].mxu1  ;;  %v3943_v52 = vld [vmem:[#allocation3 + $0x8f] sm:$0xff]  ;;  %v11716_v45 = vpack.c.bf16 %v3941_v32, %v3940_v59  ;;  %v3948_v3 = vld [vmem:[#allocation3 + $0xe7] sm:$0xff] }
 0x410   : > { %v3793_v38 = vadd.f32 %v11559_v42, %v3711_v31  ;;  %v9377_v43 = vpop.f32.mrb[46].mxu1  ;;  %9407 = vmatmul.mubr.msk.bf16.gmra.mrb[36].mxu0 %vm818_vm2, %v11672_v4  ;;  %v11721_v10 = vpack.c.bf16 %v3943_v52, %v3942_v1  ;;  %v3945_v26 = vld [vmem:[#allocation3 + $0xaf] sm:$0xff] }
 0x411   : > { %v3827_v44 = vmax.f32 %v3795_v11, 0.0  ;;  %v3796_v24 = vadd.f32 %v9377_v43, %v11559_v42  ;;  %v3714_v53 = vpop.f32.mrb[47].mxu1  ;;  %9410 = vmatprep.mubr.msk.bf16.mxu0 %vm818_vm2, %v11675_v33  ;;  %v3947_v27 = vld [vmem:[#allocation3 + $0xcf] sm:$0xff]  ;;  %v11730_v54 = vpack.c.bf16 %v3945_v26, %v3944_v40  ;;  %v3950_v11 = vld [vmem:[#allocation3 + $0x107] sm:$0xff] }
 0x412   : > { %v3825_v61 = vmax.f32 %v3793_v38, 0.0  ;;  %v3794_v2 = vadd.f32 %v11559_v42, %v3714_v53  ;;  %v4018_v28 = vld [vmem:[#allocation3 + $0x1c8] sm:$0xff]  ;;  %v11732_v25 = vpack.c.bf16 %v3947_v27, %v3946_v6  ;;  %v4516_v52 = vld [vmem:[#allocation3 + $0x31] sm:$0xff] }
 0x413   : > { %3932 = vst.msk [vmem:[#allocation3 + $0x208] sm:$0xff] %vm818_vm2, %v3827_v44  ;;  %v3828_v7 = vmax.f32 %v3796_v24, 0.0  ;;  %v4016_v47 = vld [vmem:[#allocation3 + $0x1a8] sm:$0xff]  ;;  %v4518_v1 = vld [vmem:[#allocation3 + $0x51] sm:$0xff] }
 0x414   : > { %3930 = vst.msk [vmem:[#allocation3 + $0x1e8] sm:$0xff] %vm818_vm2, %v3825_v61  ;;  %v3826_v9 = vmax.f32 %v3794_v2, 0.0  ;;  %v4019_v13 = vld [vmem:[#allocation3 + $0x1d0] sm:$0xff]  ;;  %v3934_v42 = vld [vmem:[#allocation3 + $0x7] sm:$0xff] }
 0x415   : > { %3933 = vst.msk [vmem:[#allocation3 + $0x210] sm:$0xff] %vm818_vm2, %v3828_v7  ;;  %v4017_v17 = vld [vmem:[#allocation3 + $0x1b0] sm:$0xff]  ;;  %v11690_v21 = vpack.c.bf16 %v4019_v13, %v4018_v28  ;;  %v3966_v46 = vpack.c.bf16 %v3935_v56, %v3934_v42  ;;  %v3952_v44 = vld [vmem:[#allocation3 + $0x127] sm:$0xff] }
 0x416   : > { %3931 = vst.msk [vmem:[#allocation3 + $0x1f0] sm:$0xff] %vm818_vm2, %v3826_v9  ;;  %v11688_v19 = vpack.c.bf16 %v4017_v17, %v4016_v47  ;;  %v3949_v58 = vld [vmem:[#allocation3 + $0xef] sm:$0xff]  ;;  %v3954_v53 = vld [vmem:[#allocation3 + $0x147] sm:$0xff] }
 0x417   : > { %v3951_v60 = vld [vmem:[#allocation3 + $0x10f] sm:$0xff]  ;;  %v11738_v14 = vpack.c.bf16 %v3949_v58, %v3948_v3  ;;  %v3956_v9 = vld [vmem:[#allocation3 + $0x167] sm:$0xff] }
 0x418   : > { %9411 = vmatmul.mubr.msk.bf16.gmra.mrb[40].mxu0 %vm818_vm2, %v11688_v19  ;;  %v11740_v31 = vpack.c.bf16 %v3951_v60, %v3950_v11  ;;  %v3953_v38 = vld [vmem:[#allocation3 + $0x12f] sm:$0xff]  ;;  %v3958_v47 = vld [vmem:[#allocation3 + $0x187] sm:$0xff] }
 0x419   : > { %9414 = vmatprep.mubr.msk.bf16.mxu0 %vm818_vm2, %v11690_v21  ;;  %v3955_v43 = vld [vmem:[#allocation3 + $0x14f] sm:$0xff]  ;;  %v11746_v24 = vpack.c.bf16 %v3953_v38, %v3952_v44  ;;  %v3960_v56 = vld [vmem:[#allocation3 + $0x1a7] sm:$0xff] }
 0x41a   : > { %v11748_v61 = vpack.c.bf16 %v3955_v43, %v3954_v53  ;;  %v3957_v2 = vld [vmem:[#allocation3 + $0x16f] sm:$0xff]  ;;  %v10349_v43 = vld [vmem:[%s12915_s6 + $0x80] sm:$0xff]  }
 0x41b   : > { %v4020_v36 = vld [vmem:[#allocation3 + $0x1e8] sm:$0xff]  ;;  %v11754_v13 = vpack.c.bf16 %v3957_v2, %v3956_v9  ;;  %v10347_v40 = vld [vmem:[%s12915_s6 + $0x70] sm:$0xff]  }
 0x41c   : > { %v3959_v7 = vld [vmem:[#allocation3 + $0x18f] sm:$0xff]  ;;  %v3964_v5 = vld [vmem:[#allocation3 + $0x1e7] sm:$0xff] }
 0x41d   : > { %v4021_v41 = vld [vmem:[#allocation3 + $0x1f0] sm:$0xff]  ;;  %v11756_v17 = vpack.c.bf16 %v3959_v7, %v3958_v47  ;;  %v10346_v26 = vld [vmem:[%s12915_s6 + $0x68] sm:$0xff]  }
 0x41e   : > { %v11696_v50 = vpack.c.bf16 %v4021_v41, %v4020_v36  ;;  %v3961_v28 = vld [vmem:[#allocation3 + $0x1af] sm:$0xff]  ;;  %v3962_v41 = vld [vmem:[#allocation3 + $0x1c7] sm:$0xff] }
 0x41f   : > { %v3963_v42 = vld [vmem:[#allocation3 + $0x1cf] sm:$0xff]  ;;  %v11762_v36 = vpack.c.bf16 %v3961_v28, %v3960_v56 }
 0x420   : > { %9415 = vmatmul.mubr.msk.bf16.gmra.mrb[44].mxu0 %vm818_vm2, %v11696_v50  ;;  %v4513_v51 = vld [vmem:[#allocation3 + $0x9] sm:$0xff]  ;;  %v4520_v58 = vld [vmem:[#allocation3 + $0x71] sm:$0xff] }
 0x421   : > { %9426 = vmatprep.mubr.msk.bf16.mxu0 %vm818_vm2, %v3966_v46  ;;  %v11764_v46 = vpack.c.bf16 %v3963_v42, %v3962_v41  ;;  %v3965_v63 = vld [vmem:[#allocation3 + $0x1ef] sm:$0xff] }
 0x422   : > { %v4515_v32 = vld [vmem:[#allocation3 + $0x29] sm:$0xff]  ;;  %v4522_v3 = vld [vmem:[#allocation3 + $0x91] sm:$0xff] }
 0x423   : > { %v4517_v59 = vld [vmem:[#allocation3 + $0x49] sm:$0xff]  ;;  %v4524_v53 = vld [vmem:[#allocation3 + $0xb1] sm:$0xff] }
 0x424   : > { %v11780_v27 = vpack.c.bf16 %v4518_v1, %v4517_v59  ;;  %v4519_v6 = vld [vmem:[#allocation3 + $0x69] sm:$0xff]  ;;  %v4526_v7 = vld [vmem:[#allocation3 + $0xd1] sm:$0xff] }
 0x425   : > { %v4521_v60 = vld [vmem:[#allocation3 + $0x89] sm:$0xff]  ;;  %v11789_v11 = vpack.c.bf16 %v4520_v58, %v4519_v6  ;;  %v4528_v42 = vld [vmem:[#allocation3 + $0xf1] sm:$0xff] }
 0x426   : > { %v11794_v38 = vpack.c.bf16 %v4522_v3, %v4521_v60  ;;  %v4523_v44 = vld [vmem:[#allocation3 + $0xa9] sm:$0xff]  ;;  %v4530_v41 = vld [vmem:[#allocation3 + $0x111] sm:$0xff] }
 0x427   : > { %v4525_v2 = vld [vmem:[#allocation3 + $0xc9] sm:$0xff]  ;;  %v11803_v9 = vpack.c.bf16 %v4524_v53, %v4523_v44  ;;  %v4538_v6 = vld [vmem:[#allocation3 + $0x191] sm:$0xff] }
 0x428   : > { %9427 = vmatmul.mubr.msk.bf16.vlgmr.msra.gmra.mrb[16].mxu0 %vm818_vm2, %v11701_v0  ;;  %v11805_v47 = vpack.c.bf16 %v4526_v7, %v4525_v2  ;;  %v4527_v28 = vld [vmem:[#allocation3 + $0xe9] sm:$0xff]  ;;  %v4542_v53 = vld [vmem:[#allocation3 + $0x1d1] sm:$0xff] }
 0x429   : > { %9459 = vmatpush3.bf16.msra.mxu0 %v11617_v55  ;;  %9430 = vmatprep.mubr.msk.bf16.mxu0 %vm818_vm2, %v11706_v22  ;;  %v10344_v55 = vld [vmem:[%s12915_s6 + $0x58] sm:$0xff]   ;;  %v4529_v56 = vld [vmem:[#allocation3 + $0x109] sm:$0xff] }
 0x42a   : > { %9460 = vmatprep.subr.bf16.mxu0 %v10342_v15  ;;  %v4535_v1 = vld [vmem:[#allocation3 + $0x169] sm:$0xff] }
 0x42b   : > { %v4539_v3 = vld [vmem:[#allocation3 + $0x1a9] sm:$0xff] }
 0x42c   : > { %v4541_v44 = vld [vmem:[#allocation3 + $0x1c9] sm:$0xff] }
 0x42d   : > { %9461 = vmatpush3.bf16.msra.mxu0 %v10342_v15  ;;  %v4545_v15 = vpack.c.bf16 %v4514_v57, %v4513_v51  ;;  %v11811_v51 = vpack.c.bf16 %v4528_v42, %v4527_v28  ;;  %v11813_v57 = vpack.c.bf16 %v4530_v41, %v4529_v56  ;;  %v11837_v7 = vpack.c.bf16 %v4542_v53, %v4541_v44  ;;  %v4543_v28 = vld [vmem:[#allocation3 + $0x1e9] sm:$0xff]  ;;  %v4544_v42 = vld [vmem:[#allocation3 + $0x1f1] sm:$0xff] }
 0x42e   : > { %9462 = vmatprep.subr.bf16.mxu0 %v10343_v23  ;;  %v11843_v56 = vpack.c.bf16 %v4544_v42, %v4543_v28  ;;  %v10350_v41 = vld [vmem:[%s12915_s6 + $0x88] sm:$0xff]   ;;  %v6821_v44 = vld [vmem:[%s12910_s1 + $0x70] sm:$0xff] }
 0x42f   : > { %v6124_v53 = vld [vmem:[#allocation3 + $0x48] sm:$0xff] }
 0x430   : > { %9431 = vmatmul.mubr.msk.bf16.gmra.mrb[20].mxu0 %vm818_vm2, %v11716_v45  ;;  %v6820_v42 = vld [vmem:[%s12910_s1 + $0x68] sm:$0xff] }
 0x431   : > { %9434 = vmatprep.mubr.msk.bf16.mxu0 %vm818_vm2, %v11721_v10  ;;  %9463 = vmatpush3.bf16.msra.mxu0 %v10343_v23  ;;  %v11770_v23 = vpack.c.bf16 %v3965_v63, %v3964_v5  ;;  %v4531_v63 = vld [vmem:[#allocation3 + $0x129] sm:$0xff]  ;;  %v4532_v5 = vld [vmem:[#allocation3 + $0x131] sm:$0xff] }
 0x432   : > { %9464 = vmatprep.subr.bf16.mxu0 %v10344_v55 }
 0x435   : > { %9465 = vmatpush3.bf16.msra.mxu0 %v10344_v55  ;;  %v11775_v55 = vpack.c.bf16 %v4516_v52, %v4515_v32  ;;  %v4534_v32 = vld [vmem:[#allocation3 + $0x151] sm:$0xff]  ;;  %v11819_v52 = vpack.c.bf16 %v4532_v5, %v4531_v63 }
 0x436   : > { %9498 = vmatprep.subr.bf16.mxu0 %v10345_v16  ;;  %v10351_v63 = vld [vmem:[%s12915_s6 + $0x90] sm:$0xff]  }
 0x437   : > { %v4866_v5 = vld [vmem:[#allocation3 + $0x20f] sm:$0xff] }
 0x438   : > { %9435 = vmatmul.mubr.msk.bf16.gmra.mrb[24].mxu0 %vm818_vm2, %v11730_v54 }
 0x439   : > { %9438 = vmatprep.mubr.msk.bf16.mxu0 %vm818_vm2, %v11732_v25 }
 0x440   : > { %9439 = vmatmul.mubr.msk.bf16.gmra.mrb[28].mxu0 %vm818_vm2, %v11738_v14 }
 0x441   : > { %9442 = vmatprep.mubr.msk.bf16.mxu0 %vm818_vm2, %v11740_v31 }
 0x448   : > { %9443 = vmatmul.mubr.msk.bf16.gmra.mrb[32].mxu0 %vm818_vm2, %v11746_v24 }
 0x449   : > { %9446 = vmatprep.mubr.msk.bf16.mxu0 %vm818_vm2, %v11748_v61 }
 0x450   : > { %9447 = vmatmul.mubr.msk.bf16.gmra.mrb[36].mxu0 %vm818_vm2, %v11754_v13 }
 0x451   : > { %9450 = vmatprep.mubr.msk.bf16.mxu0 %vm818_vm2, %v11756_v17 }
 0x458   : > { %9451 = vmatmul.mubr.msk.bf16.gmra.mrb[40].mxu0 %vm818_vm2, %v11762_v36 }
 0x459   : > { %9454 = vmatprep.mubr.msk.bf16.mxu0 %vm818_vm2, %v11764_v46 }
 0x460   : > { %9455 = vmatmul.mubr.msk.bf16.gmra.mrb[44].mxu0 %vm818_vm2, %v11770_v23 }
 0x461   : > { %9466 = vmatprep.mubr.msk.bf16.mxu0 %vm818_vm2, %v4545_v15  ;;  %v4533_v15 = vld [vmem:[#allocation3 + $0x149] sm:$0xff] }
 0x462   : > { %v11821_v59 = vpack.c.bf16 %v4534_v32, %v4533_v15  ;;  %v4865_v15 = vld [vmem:[#allocation3 + $0x207] sm:$0xff] }
 0x463   : > { %v11889_v32 = vpack.c.bf16 %v4866_v5, %v4865_v15  ;;  %v6825_v5 = vld [vmem:[%s12910_s1 + $0x90] sm:$0xff]  ;;  %v6126_v15 = vld [vmem:[#allocation3 + $0x68] sm:$0xff] }
 0x468   : > { %9467 = vmatmul.mubr.msk.bf16.vlgmr.msra.gmra.mrb[16].mxu0 %vm818_vm2, %v11775_v55 }
 0x469   : > { %9499 = vmatpush3.bf16.msra.mxu0 %v10345_v16  ;;  %9470 = vmatprep.mubr.msk.bf16.mxu0 %vm818_vm2, %v11780_v27  ;;  %v10348_v16 = vld [vmem:[%s12915_s6 + $0x78] sm:$0xff]  }
 0x46a   : > { %9500 = vmatprep.subr.bf16.mxu0 %v10346_v26 }
 0x46d   : > { %9501 = vmatpush3.bf16.msra.mxu0 %v10346_v26  ;;  %v4536_v26 = vld [vmem:[#allocation3 + $0x171] sm:$0xff] }
 0x46e   : > { %9502 = vmatprep.subr.bf16.mxu0 %v10347_v40  ;;  %v11827_v58 = vpack.c.bf16 %v4536_v26, %v4535_v1  ;;  %v10354_v1 = vld [vmem:[%s12915_s6 + $0xa8] sm:$0xff]   ;;  %v10355_v26 = vld [vmem:[%s12915_s6 + $0xb0] sm:$0xff]  }
 0x470   : > { %9471 = vmatmul.mubr.msk.bf16.gmra.mrb[20].mxu0 %vm818_vm2, %v11789_v11 }
 0x471   : > { %9474 = vmatprep.mubr.msk.bf16.mxu0 %vm818_vm2, %v11794_v38  ;;  %9503 = vmatpush3.bf16.msra.mxu0 %v10347_v40  ;;  %v4537_v40 = vld [vmem:[#allocation3 + $0x189] sm:$0xff] }
 0x472   : > { %9504 = vmatprep.subr.bf16.mxu0 %v10348_v16  ;;  %v11829_v60 = vpack.c.bf16 %v4538_v6, %v4537_v40  ;;  %v6816_v40 = vld [vmem:[%s12910_s1 + $0x48] sm:$0xff]  ;;  %v6819_v6 = vld [vmem:[%s12910_s1 + $0x60] sm:$0xff] }
 0x475   : > { %9505 = vmatpush3.bf16.msra.mxu0 %v10348_v16  ;;  %v4540_v16 = vld [vmem:[#allocation3 + $0x1b1] sm:$0xff] }
 0x476   : > { %9538 = vmatprep.subr.bf16.mxu0 %v10349_v43  ;;  %v11835_v2 = vpack.c.bf16 %v4540_v16, %v4539_v3  ;;  %v6818_v3 = vld [vmem:[%s12910_s1 + $0x58] sm:$0xff]  ;;  %v6125_v16 = vld [vmem:[#allocation3 + $0x50] sm:$0xff] }
 0x477   : > { %v6156_v28 = vpack.c.bf16 %v6125_v16, %v6124_v53  ;;  %v6134_v16 = vld [vmem:[#allocation3 + $0xe8] sm:$0xff] }
 0x478   : > { %9475 = vmatmul.mubr.msk.bf16.gmra.mrb[24].mxu0 %vm818_vm2, %v11803_v9  ;;  %v6136_v53 = vld [vmem:[#allocation3 + $0x108] sm:$0xff] }
 0x479   : > { %9478 = vmatprep.mubr.msk.bf16.mxu0 %vm818_vm2, %v11805_v47 }
 0x480   : > { %9479 = vmatmul.mubr.msk.bf16.gmra.mrb[28].mxu0 %vm818_vm2, %v11811_v51 }
 0x481   : > { %9482 = vmatprep.mubr.msk.bf16.mxu0 %vm818_vm2, %v11813_v57 }
 0x488   : > { %9483 = vmatmul.mubr.msk.bf16.gmra.mrb[32].mxu0 %vm818_vm2, %v11819_v52 }
 0x489   : > { %9486 = vmatprep.mubr.msk.bf16.mxu0 %vm818_vm2, %v11821_v59 }
 0x490   : > { %9487 = vmatmul.mubr.msk.bf16.gmra.mrb[36].mxu0 %vm818_vm2, %v11827_v58 }
 0x491   : > { %9490 = vmatprep.mubr.msk.bf16.mxu0 %vm818_vm2, %v11829_v60 }
 0x498   : > { %9491 = vmatmul.mubr.msk.bf16.gmra.mrb[40].mxu0 %vm818_vm2, %v11835_v2 }
 0x499   : > { %9494 = vmatprep.mubr.msk.bf16.mxu0 %vm818_vm2, %v11837_v7 }
 0x4a0   : > { %9495 = vmatmul.mubr.msk.bf16.gmra.mrb[44].mxu0 %vm818_vm2, %v11843_v56 }
 0x4a1   : > { %9506 = vmatprep.mubr.msk.bf16.mxu0 %vm818_vm2, %v11701_v0  ;;  %v10352_v0 = vld [vmem:[%s12915_s6 + $0x98] sm:$0xff]  }
 0x4a8   : > { %9507 = vmatmul.mubr.msk.bf16.vlgmr.msra.gmra.mrb[16].mxu0 %vm818_vm2, %v11706_v22 }
 0x4a9   : > { %9539 = vmatpush3.bf16.msra.mxu0 %v10349_v43  ;;  %9510 = vmatprep.mubr.msk.bf16.mxu0 %vm818_vm2, %v11716_v45  ;;  %v10353_v43 = vld [vmem:[%s12915_s6 + $0xa0] sm:$0xff]  }
 0x4aa   : > { %9540 = vmatprep.subr.bf16.mxu0 %v10350_v41 }
 0x4ad   : > { %9541 = vmatpush3.bf16.msra.mxu0 %v10350_v41  ;;  %v6823_v41 = vld [vmem:[%s12910_s1 + $0x80] sm:$0xff] }
 0x4ae   : > { %9542 = vmatprep.subr.bf16.mxu0 %v10351_v63 }
 0x4b0   : > { %9511 = vmatmul.mubr.msk.bf16.gmra.mrb[20].mxu0 %vm818_vm2, %v11721_v10 }
 0x4b1   : > { %9514 = vmatprep.mubr.msk.bf16.mxu0 %vm818_vm2, %v11730_v54  ;;  %9543 = vmatpush3.bf16.msra.mxu0 %v10351_v63  ;;  %v6127_v63 = vld [vmem:[#allocation3 + $0x70] sm:$0xff] }
 0x4b2   : > { %9544 = vmatprep.subr.bf16.mxu0 %v10352_v0 }
 0x4b5   : > { %9545 = vmatpush3.bf16.msra.mxu0 %v10352_v0  ;;  %v6822_v0 = vld [vmem:[%s12910_s1 + $0x78] sm:$0xff] }
 0x4b6   : > { %9578 = vmatprep.subr.bf16.mxu0 %v10353_v43 }
 0x4b8   : > { %9515 = vmatmul.mubr.msk.bf16.gmra.mrb[24].mxu0 %vm818_vm2, %v11732_v25 }
 0x4b9   : > { %9518 = vmatprep.mubr.msk.bf16.mxu0 %vm818_vm2, %v11738_v14 }
 0x4c0   : > { %9519 = vmatmul.mubr.msk.bf16.gmra.mrb[28].mxu0 %vm818_vm2, %v11740_v31 }
 0x4c1   : > { %9522 = vmatprep.mubr.msk.bf16.mxu0 %vm818_vm2, %v11746_v24 }
 0x4c8   : > { %9523 = vmatmul.mubr.msk.bf16.gmra.mrb[32].mxu0 %vm818_vm2, %v11748_v61 }
 0x4c9   : > { %9526 = vmatprep.mubr.msk.bf16.mxu0 %vm818_vm2, %v11754_v13 }
 0x4d0   : > { %9527 = vmatmul.mubr.msk.bf16.gmra.mrb[36].mxu0 %vm818_vm2, %v11756_v17 }
 0x4d1   : > { %9530 = vmatprep.mubr.msk.bf16.mxu0 %vm818_vm2, %v11762_v36 }
 0x4d8   : > { %9531 = vmatmul.mubr.msk.bf16.gmra.mrb[40].mxu0 %vm818_vm2, %v11764_v46 }
 0x4d9   : > { %9534 = vmatprep.mubr.msk.bf16.mxu0 %vm818_vm2, %v11770_v23 }
 0x4e0   : > { %9535 = vmatmul.mubr.msk.bf16.gmra.mrb[44].mxu0 %vm818_vm2, %v11889_v32 }
 0x4e1   : > { %9546 = vmatprep.mubr.msk.bf16.mxu0 %vm818_vm2, %v11577_v20  ;;  %v10356_v20 = vld [vmem:[%s12915_s6 + $0xb8] sm:$0xff]  }
 0x4e8   : > { %9547 = vmatmul.mubr.msk.bf16.vlgmr.msra.gmra.mrb[16].mxu0 %vm818_vm2, %v11583_v8  ;;  %v10357_v8 = vld [vmem:[%s12915_s6 + $0xc0] sm:$0xff]  }
 0x4e9   : > { %9579 = vmatpush3.bf16.msra.mxu0 %v10353_v43  ;;  %9550 = vmatprep.mubr.msk.bf16.mxu0 %vm818_vm2, %v11599_v49  ;;  %v5188_v49 = vld [vmem:[#allocation3 + $0x210] sm:$0xff] }
 0x4ea   : > { %9580 = vmatprep.subr.bf16.mxu0 %v10354_v1  ;;  %v6129_v43 = vld [vmem:[#allocation3 + $0x90] sm:$0xff] }
 0x4ed   : > { %9581 = vmatpush3.bf16.msra.mxu0 %v10354_v1  ;;  %v6128_v1 = vld [vmem:[#allocation3 + $0x88] sm:$0xff] }
 0x4ee   : > { %9582 = vmatprep.subr.bf16.mxu0 %v10355_v26 }
 0x4f0   : > { %9551 = vmatmul.mubr.msk.bf16.gmra.mrb[20].mxu0 %vm818_vm2, %v11605_v48  ;;  %v5187_v48 = vld [vmem:[#allocation3 + $0x208] sm:$0xff] }
 0x4f1   : > { %9554 = vmatprep.mubr.msk.bf16.mxu0 %vm818_vm2, %v11623_v12  ;;  %9583 = vmatpush3.bf16.msra.mxu0 %v10355_v26  ;;  %v11935_v12 = vpack.c.bf16 %v5188_v49, %v5187_v48  ;;  %v10366_v26 = vld [vmem:[%s12915_s6 + $0x108] sm:$0xff]  }
 0x4f2   : > { %9584 = vmatprep.subr.bf16.mxu0 %v10356_v20  ;;  %v6824_v49 = vld [vmem:[%s12910_s1 + $0x88] sm:$0xff] }
 0x4f3   : > { %v10369_v48 = vld [vmem:[%s12917_s8] ss:$8 sps:$4 sm:$0xff]  }
 0x4f5   : > { %9585 = vmatpush3.bf16.msra.mxu0 %v10356_v20  ;;  %v10371_v20 = vld [vmem:[%s12917_s8 + $0x4] ss:$8 sps:$4 sm:$0xff]  }
 0x4f6   : > { %9618 = vmatprep.subr.bf16.mxu0 %v10357_v8  ;;  %7187 = vmatprep.subr.bf16.mxu1 %v10371_v20  ;;  %v6138_v20 = vld [vmem:[#allocation3 + $0x128] sm:$0xff] }
 0x4f7   : > { %7188 = vmatpush1.bf16.msra.mxu1 %v10369_v48 }
 0x4f8   : > { %9555 = vmatmul.mubr.msk.bf16.gmra.mrb[24].mxu0 %vm818_vm2, %v11627_v29  ;;  %v10358_v29 = vld [vmem:[%s12915_s6 + $0xc8] sm:$0xff]  }
 0x4f9   : > { %9558 = vmatprep.mubr.msk.bf16.mxu0 %vm818_vm2, %v11640_v18  ;;  %v10359_v18 = vld [vmem:[%s12915_s6 + $0xd0] sm:$0xff]  }
 0x500   : > { %9559 = vmatmul.mubr.msk.bf16.gmra.mrb[28].mxu0 %vm818_vm2, %v11643_v39  ;;  %v10360_v39 = vld [vmem:[%s12915_s6 + $0xd8] sm:$0xff]  }
 0x501   : > { %9562 = vmatprep.mubr.msk.bf16.mxu0 %vm818_vm2, %v11656_v30  ;;  %v10361_v30 = vld [vmem:[%s12915_s6 + $0xe0] sm:$0xff]  }
 0x508   : > { %9563 = vmatmul.mubr.msk.bf16.gmra.mrb[32].mxu0 %vm818_vm2, %v11659_v34  ;;  %v5509_v34 = vld [vmem:[#allocation3 + $0x209] sm:$0xff] }
 0x509   : > { %9566 = vmatprep.mubr.msk.bf16.mxu0 %vm818_vm2, %v11672_v4  ;;  %v5510_v4 = vld [vmem:[#allocation3 + $0x211] sm:$0xff] }
 0x510   : > { %9567 = vmatmul.mubr.msk.bf16.gmra.mrb[36].mxu0 %vm818_vm2, %v11675_v33  ;;  %v11981_v33 = vpack.c.bf16 %v5510_v4, %v5509_v34  ;;  %v6826_v34 = vld [vmem:[%s12910_s1 + $0x98] sm:$0xff] }
 0x511   : > { %9570 = vmatprep.mubr.msk.bf16.mxu0 %vm818_vm2, %v11688_v19  ;;  %v10362_v19 = vld [vmem:[%s12915_s6 + $0xe8] sm:$0xff]   ;;  %v10373_v4 = vld [vmem:[%s12917_s8 + $0x10] ss:$8 sps:$4 sm:$0xff]  }
 0x518   : > { %9571 = vmatmul.mubr.msk.bf16.gmra.mrb[40].mxu0 %vm818_vm2, %v11690_v21  ;;  %v10363_v21 = vld [vmem:[%s12915_s6 + $0xf0] sm:$0xff]  }
 0x519   : > { %9574 = vmatprep.mubr.msk.bf16.mxu0 %vm818_vm2, %v11696_v50  ;;  %v10364_v50 = vld [vmem:[%s12915_s6 + $0xf8] sm:$0xff]  }
 0x520   : > { %9575 = vmatmul.mubr.msk.bf16.gmra.mrb[44].mxu0 %vm818_vm2, %v11935_v12 }
 0x521   : > { %9586 = vmatprep.mubr.msk.bf16.mxu0 %vm818_vm2, %v11775_v55  ;;  %v5833_v55 = vld [vmem:[#allocation3 + $0x22f] sm:$0xff] }
 0x528   : > { %9587 = vmatmul.mubr.msk.bf16.vlgmr.msra.gmra.mrb[16].mxu0 %vm818_vm2, %v11780_v27 }
 0x529   : > { %9619 = vmatpush3.bf16.msra.mxu0 %v10357_v8  ;;  %9590 = vmatprep.mubr.msk.bf16.mxu0 %vm818_vm2, %v11789_v11  ;;  %v6158_v8 = vpack.c.bf16 %v6129_v43, %v6128_v1  ;;  %v6139_v43 = vld [vmem:[#allocation3 + $0x130] sm:$0xff] }
 0x52a   : > { %9620 = vmatprep.subr.bf16.mxu0 %v10358_v29  ;;  %v6837_v1 = vld [vmem:[%s12910_s1 + $0xf0] sm:$0xff] }
 0x52d   : > { %9621 = vmatpush3.bf16.msra.mxu0 %v10358_v29  ;;  %v6827_v29 = vld [vmem:[%s12910_s1 + $0xa0] sm:$0xff] }
 0x52e   : > { %9622 = vmatprep.subr.bf16.mxu0 %v10359_v18 }
 0x530   : > { %9591 = vmatmul.mubr.msk.bf16.gmra.mrb[20].mxu0 %vm818_vm2, %v11794_v38 }
 0x531   : > { %9594 = vmatprep.mubr.msk.bf16.mxu0 %vm818_vm2, %v11803_v9  ;;  %9623 = vmatpush3.bf16.msra.mxu0 %v10359_v18  ;;  %v10375_v18 = vld [vmem:[%s12917_s8 + $0x14] ss:$8 sps:$4 sm:$0xff]  }
 0x532   : > { %9624 = vmatprep.subr.bf16.mxu0 %v10360_v39  ;;  %7189 = vmatprep.subr.bf16.mxu1 %v10375_v18  ;;  %v10388_v18 = vld [vmem:[%s12917_s8 + $0x60] ss:$8 sps:$4 sm:$0xff]  }
 0x533   : > { %7190 = vmatpush1.bf16.msra.mxu1 %v10373_v4  ;;  %v6142_v4 = vld [vmem:[#allocation3 + $0x168] sm:$0xff] }
 0x535   : > { %9625 = vmatpush3.bf16.msra.mxu0 %v10360_v39  ;;  %v10367_v39 = vld [vmem:[%s12915_s6 + $0x110] sm:$0xff]  }
 0x536   : > { %9658 = vmatprep.subr.bf16.mxu0 %v10361_v30 }
 0x538   : > { %9595 = vmatmul.mubr.msk.bf16.gmra.mrb[24].mxu0 %vm818_vm2, %v11805_v47 }
 0x539   : > { %9598 = vmatprep.mubr.msk.bf16.mxu0 %vm818_vm2, %v11811_v51 }
 0x540   : > { %9599 = vmatmul.mubr.msk.bf16.gmra.mrb[28].mxu0 %vm818_vm2, %v11813_v57 }
 0x541   : > { %9602 = vmatprep.mubr.msk.bf16.mxu0 %vm818_vm2, %v11819_v52 }
 0x548   : > { %9603 = vmatmul.mubr.msk.bf16.gmra.mrb[32].mxu0 %vm818_vm2, %v11821_v59 }
 0x549   : > { %9606 = vmatprep.mubr.msk.bf16.mxu0 %vm818_vm2, %v11827_v58 }
 0x550   : > { %9607 = vmatmul.mubr.msk.bf16.gmra.mrb[36].mxu0 %vm818_vm2, %v11829_v60 }
 0x551   : > { %9610 = vmatprep.mubr.msk.bf16.mxu0 %vm818_vm2, %v11835_v2 }
 0x558   : > { %9611 = vmatmul.mubr.msk.bf16.gmra.mrb[40].mxu0 %vm818_vm2, %v11837_v7 }
 0x559   : > { %9614 = vmatprep.mubr.msk.bf16.mxu0 %vm818_vm2, %v11843_v56 }
 0x560   : > { %9615 = vmatmul.mubr.msk.bf16.gmra.mrb[44].mxu0 %vm818_vm2, %v11981_v33 }
 0x561   : > { %9626 = vmatprep.mubr.msk.bf16.mxu0 %vm818_vm2, %v11706_v22  ;;  %v12007_v22 = vld [vmem:[%s12915_s6 + $0x100] sm:$0xff]  }
 0x568   : > { %9627 = vmatmul.mubr.msk.bf16.vlgmr.msra.gmra.mrb[16].mxu0 %vm818_vm2, %v11716_v45  ;;  %v6807_v45 = vld [vmem:[%s12910_s1] sm:$0xff] }
 0x569   : > { %9659 = vmatpush3.bf16.msra.mxu0 %v10361_v30  ;;  %9630 = vmatprep.mubr.msk.bf16.mxu0 %vm818_vm2, %v11721_v10  ;;  %v10491_v10 = vmov 0   ;;  %v6131_v30 = vld [vmem:[#allocation3 + $0xb0] sm:$0xff] }
 0x56a   : > { %9660 = vmatprep.subr.bf16.mxu0 %v10362_v19  ;;  %10295 = vset.pattern.permute.xlu0 %v10491_v10 }
 0x56b   : > { %10296 = vset.pattern.permute.xlu1 %v10491_v10  ;;  %6873 = vperm.xlu0 %10295, %v6807_v45  }
 0x56c   : > { %7219 = vmatprep.mubr.bf16.mxu1 %v10491_v10 }
 0x56d   : > { %9661 = vmatpush3.bf16.msra.mxu0 %v10362_v19  ;;  %v6133_v19 = vld [vmem:[#allocation3 + $0xd0] sm:$0xff] }
 0x56e   : > { %9662 = vmatprep.subr.bf16.mxu0 %v10363_v21 }
 0x570   : > { %9631 = vmatmul.mubr.msk.bf16.gmra.mrb[20].mxu0 %vm818_vm2, %v11730_v54  ;;  %v6808_v54 = vld [vmem:[%s12910_s1 + $0x8] sm:$0xff] }
 0x571   : > { %9634 = vmatprep.mubr.msk.bf16.mxu0 %vm818_vm2, %v11732_v25  ;;  %9663 = vmatpush3.bf16.msra.mxu0 %v10363_v21  ;;  %v6809_v25 = vld [vmem:[%s12910_s1 + $0x10] sm:$0xff] }
 0x572   : > { %9664 = vmatprep.subr.bf16.mxu0 %v10364_v50  ;;  %6878 = vperm.xlu0 %10295, %v6808_v54   ;;  %v6829_v21 = vld [vmem:[%s12910_s1 + $0xb0] sm:$0xff]  ;;  %v6132_v54 = vld [vmem:[#allocation3 + $0xc8] sm:$0xff] }
 0x573   : > { %6883 = vperm.xlu1 %10296, %v6809_v25   ;;  %v10368_v25 = vld [vmem:[%s12915_s6 + $0x118] sm:$0xff]  }
 0x575   : > { %9665 = vmatpush3.bf16.msra.mxu0 %v10364_v50  ;;  %v10378_v50 = vld [vmem:[%s12917_s8 + $0x24] ss:$8 sps:$4 sm:$0xff]  }
 0x576   : > { %9698 = vmatprep.subr.bf16.mxu0 %v12007_v22  ;;  %7191 = vmatprep.subr.bf16.mxu1 %v10378_v50 }
 0x578   : > { %9635 = vmatmul.mubr.msk.bf16.gmra.mrb[24].mxu0 %vm818_vm2, %v11738_v14  ;;  %v6811_v14 = vld [vmem:[%s12910_s1 + $0x20] sm:$0xff] }
 0x579   : > { %9638 = vmatprep.mubr.msk.bf16.mxu0 %vm818_vm2, %v11740_v31  ;;  %6893 = vperm.xlu0 %10295, %v6811_v14   ;;  %v6810_v31 = vld [vmem:[%s12910_s1 + $0x18] sm:$0xff]  ;;  %v6160_v14 = vpack.c.bf16 %v6133_v19, %v6132_v54  ;;  %v6146_v54 = vld [vmem:[#allocation3 + $0x1a8] sm:$0xff] }
 0x57a   : > { %6888 = vperm.xlu1 %10296, %v6810_v31   ;;  %v6828_v31 = vld [vmem:[%s12910_s1 + $0xa8] sm:$0xff] }
 0x580   : > { %9639 = vmatmul.mubr.msk.bf16.gmra.mrb[28].mxu0 %vm818_vm2, %v11746_v24  ;;  %v6813_v24 = vld [vmem:[%s12910_s1 + $0x30] sm:$0xff] }
 0x581   : > { %9642 = vmatprep.mubr.msk.bf16.mxu0 %vm818_vm2, %v11748_v61  ;;  %6903 = vperm.xlu0 %10295, %v6813_v24   ;;  %v6812_v61 = vld [vmem:[%s12910_s1 + $0x28] sm:$0xff]  ;;  %v12134_v24 = vld [vmem:[%s12919_s10] sm:$0xff] }
 0x582   : > { %6898 = vperm.xlu1 %10296, %v6812_v61   ;;  %v10376_v61 = vld [vmem:[%s12917_s8 + $0x20] ss:$8 sps:$4 sm:$0xff]  }
 0x583   : > { %7192 = vmatpush1.bf16.msra.mxu1 %v10376_v61  ;;  %v6151_v61 = vld [vmem:[#allocation3 + $0x1f0] sm:$0xff] }
 0x588   : > { %9643 = vmatmul.mubr.msk.bf16.gmra.mrb[32].mxu0 %vm818_vm2, %v11754_v13  ;;  %v6815_v13 = vld [vmem:[%s12910_s1 + $0x40] sm:$0xff] }
 0x589   : > { %9646 = vmatprep.mubr.msk.bf16.mxu0 %vm818_vm2, %v11756_v17  ;;  %6913 = vperm.xlu0 %10295, %v6815_v13   ;;  %v6814_v17 = vld [vmem:[%s12910_s1 + $0x38] sm:$0xff]  ;;  %v6831_v13 = vld [vmem:[%s12910_s1 + $0xc0] sm:$0xff] }
 0x58a   : > { %6908 = vperm.xlu1 %10296, %v6814_v17   ;;  %v10381_v17 = vld [vmem:[%s12917_s8 + $0x34] ss:$8 sps:$4 sm:$0xff]  }
 0x58b   : > { %7193 = vmatprep.subr.bf16.mxu1 %v10381_v17 }
 0x58e   : > { %6918 = vperm.xlu1 %10296, %v6816_v40   ;;  %v10379_v40 = vld [vmem:[%s12917_s8 + $0x30] ss:$8 sps:$4 sm:$0xff]  }
 0x58f   : > { %7194 = vmatpush1.bf16.msra.mxu1 %v10379_v40  ;;  %v10406_v40 = vld [vmem:[%s10623_s29 + $0x60] sm:$0xff] }
 0x590   : > { %9647 = vmatmul.mubr.msk.bf16.gmra.mrb[36].mxu0 %vm818_vm2, %v11762_v36  ;;  %v6817_v36 = vld [vmem:[%s12910_s1 + $0x50] sm:$0xff] }
 0x591   : > { %9650 = vmatprep.mubr.msk.bf16.mxu0 %vm818_vm2, %v11764_v46  ;;  %6923 = vperm.xlu0 %10295, %v6817_v36   ;;  %v5832_v46 = vld [vmem:[#allocation3 + $0x227] sm:$0xff]  ;;  %v7458_v36 = vcombine.high %v12134_v24, %v12134_v24 }
 0x592   : > { %6928 = vperm.xlu1 %10296, %v6818_v3   ;;  %v6833_v3 = vld [vmem:[%s12910_s1 + $0xd0] sm:$0xff] }
 0x595   : > { %6933 = vperm.xlu0 %10295, %v6819_v6   ;;  %v6137_v6 = vld [vmem:[#allocation3 + $0x110] sm:$0xff] }
 0x596   : > { %6938 = vperm.xlu1 %10296, %v6820_v42   ;;  %v6832_v42 = vld [vmem:[%s12910_s1 + $0xc8] sm:$0xff] }
 0x598   : > { %9651 = vmatmul.mubr.msk.bf16.gmra.mrb[40].mxu0 %vm818_vm2, %v11770_v23  ;;  %v5849_v23 = vpack.c.bf16 %v5833_v55, %v5832_v46  ;;  %v6135_v46 = vld [vmem:[#allocation3 + $0xf0] sm:$0xff]  ;;  %v6830_v55 = vld [vmem:[%s12910_s1 + $0xb8] sm:$0xff] }
 0x599   : > { %9654 = vmatprep.mubr.msk.bf16.mxu0 %vm818_vm2, %v11889_v32  ;;  %6943 = vperm.xlu0 %10295, %v6821_v44   ;;  %v6157_v32 = vpack.c.bf16 %v6127_v63, %v6126_v15  ;;  %v6161_v44 = vpack.c.bf16 %v6135_v46, %v6134_v16  ;;  %v6835_v63 = vld [vmem:[%s12910_s1 + $0xe0] sm:$0xff]  ;;  %v10385_v15 = vld [vmem:[%s12917_s8 + $0x50] ss:$8 sps:$4 sm:$0xff]  }
 0x59a   : > { %6948 = vperm.xlu1 %10296, %v6822_v0   ;;  %v10387_v0 = vld [vmem:[%s12917_s8 + $0x54] ss:$8 sps:$4 sm:$0xff]   ;;  %v10410_v16 = vld [vmem:[%s10623_s29 + $0x80] sm:$0xff] }
 0x59b   : > { %v6155_v46 = vld [vmem:[#allocation3 + $0x230] sm:$0xff] }
 0x59d   : > { %6953 = vperm.xlu0 %10295, %v6823_v41   ;;  %v10382_v41 = vld [vmem:[%s12917_s8 + $0x40] ss:$8 sps:$4 sm:$0xff]  }
 0x59e   : > { %6958 = vperm.xlu1 %10296, %v6824_v49   ;;  %v6140_v49 = vld [vmem:[#allocation3 + $0x148] sm:$0xff] }
 0x5a0   : > { %9655 = vmatmul.mubr.msk.bf16.gmra.mrb[44].mxu0 %vm818_vm2, %v5849_v23  ;;  %v10384_v23 = vld [vmem:[%s12917_s8 + $0x44] ss:$8 sps:$4 sm:$0xff]  }
 0x5a1   : > { %9666 = vmatprep.mubr.msk.bf16.mxu0 %vm818_vm2, %v6156_v28  ;;  %6963 = vperm.xlu0 %10295, %v6825_v5   ;;  %v6162_v28 = vpack.c.bf16 %v6137_v6, %v6136_v53  ;;  %v6834_v5 = vld [vmem:[%s12910_s1 + $0xd8] sm:$0xff]  ;;  %v10407_v6 = vld [vmem:[%s10623_s29 + $0x68] sm:$0xff]  ;;  %v10412_v53 = vld [vmem:[%s10623_s29 + $0x90] sm:$0xff] }
 0x5a2   : > { %6968 = vperm.xlu1 %10296, %v6826_v34   ;;  %7195 = vmatprep.subr.bf16.mxu1 %v10384_v23  ;;  %v6145_v34 = vld [vmem:[#allocation3 + $0x190] sm:$0xff]  ;;  %v10409_v23 = vld [vmem:[%s10623_s29 + $0x78] sm:$0xff] }
 0x5a3   : > { %7196 = vmatpush1.bf16.msra.mxu1 %v10382_v41  ;;  %v10415_v41 = vld [vmem:[%s10623_s29 + $0xa8] sm:$0xff] }
 0x5a4   : > { %7197 = vmatprep.subr.bf16.mxu1 %v10387_v0  ;;  %v10417_v0 = vld [vmem:[%s10623_s29 + $0xb8] sm:$0xff] }
 0x5a5   : > { %6973 = vperm.xlu0 %10295, %v6827_v29   ;;  %v6836_v29 = vld [vmem:[%s12910_s1 + $0xe8] sm:$0xff] }
 0x5a6   : > { %6978 = vperm.xlu1 %10296, %v6828_v31  }
 0x5a7   : > { %7198 = vmatpush1.bf16.msra.mxu1 %v10385_v15  ;;  %v10420_v15 = vld [vmem:[%s10623_s29 + $0xd0] sm:$0xff] }
 0x5a8   : > { %9667 = vmatmul.mubr.msk.bf16.vlgmr.msra.gmra.mrb[16].mxu0 %vm818_vm2, %v6157_v32  ;;  %v6141_v32 = vld [vmem:[#allocation3 + $0x150] sm:$0xff] }
 0x5a9   : > { %9699 = vmatpush3.bf16.msra.mxu0 %v12007_v22  ;;  %9670 = vmatprep.mubr.msk.bf16.mxu0 %vm818_vm2, %v6158_v8  ;;  %v6130_v22 = vld [vmem:[#allocation3 + $0xa8] sm:$0xff]  ;;  %v6163_v8 = vpack.c.bf16 %v6139_v43, %v6138_v20  ;;  %v6164_v48 = vpack.c.bf16 %v6141_v32, %v6140_v49  ;;  %v10418_v43 = vld [vmem:[%s10623_s29 + $0xc0] sm:$0xff]  ;;  %v10421_v32 = vld [vmem:[%s10623_s29 + $0xd8] sm:$0xff] }
 0x5aa   : > { %9700 = vmatprep.subr.bf16.mxu0 %v10366_v26  ;;  %v6159_v45 = vpack.c.bf16 %v6131_v30, %v6130_v22  ;;  %6983 = vperm.xlu0 %10295, %v6829_v21   ;;  %v6838_v30 = vld [vmem:[%s12910_s1 + $0xf8] sm:$0xff]  ;;  %v6144_v21 = vld [vmem:[#allocation3 + $0x188] sm:$0xff]  ;;  %v6147_v22 = vld [vmem:[#allocation3 + $0x1b0] sm:$0xff] }
 0x5ab   : > { %6988 = vperm.xlu1 %10296, %v6830_v55   ;;  %v6166_v50 = vpack.c.bf16 %v6145_v34, %v6144_v21  ;;  %v10424_v49 = vld [vmem:[%s10623_s29 + $0xf0] sm:$0xff] }
 0x5ad   : > { %9701 = vmatpush3.bf16.msra.mxu0 %v10366_v26  ;;  %v10390_v26 = vld [vmem:[%s12917_s8 + $0x64] ss:$8 sps:$4 sm:$0xff]  }
 0x5ae   : > { %9702 = vmatprep.subr.bf16.mxu0 %v10367_v39  ;;  %6993 = vperm.xlu0 %10295, %v6831_v13   ;;  %v6150_v13 = vld [vmem:[#allocation3 + $0x1e8] sm:$0xff] }
 0x5af   : > { %6998 = vperm.xlu1 %10296, %v6832_v42   ;;  %7199 = vmatprep.subr.bf16.mxu1 %v10390_v26  ;;  %v6169_v17 = vpack.c.bf16 %v6151_v61, %v6150_v13  ;;  %v10414_v42 = vld [vmem:[%s10623_s29 + $0xa0] sm:$0xff]  ;;  %v10423_v26 = vld [vmem:[%s10623_s29 + $0xe8] sm:$0xff] }
 0x5b0   : > { %9671 = vmatmul.mubr.msk.bf16.gmra.mrb[20].mxu0 %vm818_vm2, %v6159_v45  ;;  %7200 = vmatpush1.bf16.msra.mxu1 %v10388_v18  ;;  %v6149_v45 = vld [vmem:[#allocation3 + $0x1d0] sm:$0xff] }
 0x5b1   : > { %9674 = vmatprep.mubr.msk.bf16.mxu0 %vm818_vm2, %v6160_v14  ;;  %9703 = vmatpush3.bf16.msra.mxu0 %v10367_v39  ;;  %v6143_v39 = vld [vmem:[#allocation3 + $0x170] sm:$0xff]  ;;  %v6148_v14 = vld [vmem:[#allocation3 + $0x1c8] sm:$0xff] }
 0x5b2   : > { %9704 = vmatprep.subr.bf16.mxu0 %v10368_v25  ;;  %7003 = vperm.xlu0 %10295, %v6833_v3   ;;  %v6165_v19 = vpack.c.bf16 %v6143_v39, %v6142_v4  ;;  %v6168_v31 = vpack.c.bf16 %v6149_v45, %v6148_v14  ;;  %v10408_v3 = vld [vmem:[%s10623_s29 + $0x70] sm:$0xff] }
 0x5b3   : > { %7008 = vperm.xlu1 %10296, %v6834_v5   ;;  %v10419_v5 = vld [vmem:[%s10623_s29 + $0xc8] sm:$0xff] }
 0x5b5   : > { %9705 = vmatpush3.bf16.msra.mxu0 %v10368_v25  ;;  %v6167_v25 = vpack.c.bf16 %v6147_v22, %v6146_v54 }
 0x5b6   : > { %8534 = vmatprep.subr.msk.mxu0 %vm550_vm0, %v7458_v36  ;;  %7013 = vperm.xlu0 %10295, %v6835_v63   ;;  %v6154_v36 = vld [vmem:[#allocation3 + $0x228] sm:$0xff]  ;;  %v10416_v63 = vld [vmem:[%s10623_s29 + $0xb0] sm:$0xff] }
 0x5b7   : > { %7018 = vperm.xlu1 %10296, %v6836_v29   ;;  %v6171_v55 = vpack.c.bf16 %v6155_v46, %v6154_v36  ;;  %v10425_v29 = vld [vmem:[%s10623_s29 + $0xf8] sm:$0xff] }
 0x5b8   : > { %9675 = vmatmul.mubr.msk.bf16.gmra.mrb[24].mxu0 %vm818_vm2, %v6161_v44  ;;  %v10411_v44 = vld [vmem:[%s10623_s29 + $0x88] sm:$0xff] }
 0x5b9   : > { %9678 = vmatprep.mubr.msk.bf16.mxu0 %vm818_vm2, %v6162_v28  ;;  %v10413_v28 = vld [vmem:[%s10623_s29 + $0x98] sm:$0xff] }
 0x5ba   : > { %7023 = vperm.xlu0 %10295, %v6837_v1   ;;  %v10422_v1 = vld [vmem:[%s10623_s29 + $0xe0] sm:$0xff] }
 0x5bb   : > { %7028 = vperm.xlu1 %10296, %v6838_v30  }
 0x5c0   : > { %9679 = vmatmul.mubr.msk.bf16.gmra.mrb[28].mxu0 %vm818_vm2, %v6163_v8 }
 0x5c1   : > { %9682 = vmatprep.mubr.msk.bf16.mxu0 %vm818_vm2, %v6164_v48 }
 0x5c8   : > { %9683 = vmatmul.mubr.msk.bf16.gmra.mrb[32].mxu0 %vm818_vm2, %v6165_v19 }
 0x5c9   : > { %9686 = vmatprep.mubr.msk.bf16.mxu0 %vm818_vm2, %v6166_v50  ;;  %v12349_v50 = vld [vmem:[%s12916_s7] ss:$0 sm:$0xff] }
 0x5d0   : > { %9687 = vmatmul.mubr.msk.bf16.gmra.mrb[36].mxu0 %vm818_vm2, %v6167_v25 }
 0x5d1   : > { %9690 = vmatprep.mubr.msk.bf16.mxu0 %vm818_vm2, %v6168_v31 }
 0x5d8   : > { %9691 = vmatmul.mubr.msk.bf16.gmra.mrb[40].mxu0 %vm818_vm2, %v6169_v17 }
 0x5d9   : > { %9694 = vmatprep.mubr.msk.bf16.mxu0 %vm818_vm2, %v11935_v12  ;;  %v10403_v12 = vld [vmem:[%s10623_s29 + $0x48] sm:$0xff] }
 0x5e0   : > { %9695 = vmatmul.mubr.msk.bf16.gmra.mrb[44].mxu0 %vm818_vm2, %v6171_v55 }
 0x5e1   : > { %9706 = vmatprep.mubr.msk.bf16.mxu0 %vm818_vm2, %v11780_v27  ;;  %v6476_v27 = vld [vmem:[#allocation3 + $0x229] sm:$0xff] }
 0x5e8   : > { %9707 = vmatmul.mubr.msk.bf16.vlgmr.msra.gmra.mrb[16].mxu0 %vm818_vm2, %v11789_v11  ;;  %v6477_v11 = vld [vmem:[#allocation3 + $0x231] sm:$0xff] }
 0x5e9   : > { %9710 = vmatprep.mubr.msk.bf16.mxu0 %vm818_vm2, %v11794_v38  ;;  %8535 = vmatpush1.msk.msra.mxu0 %vm550_vm0, %v12134_v24  ;;  %v6493_v38 = vpack.c.bf16 %v6477_v11, %v6476_v27  ;;  %v10405_v24 = vld [vmem:[%s10623_s29 + $0x58] sm:$0xff] }
 0x5ea   : > { %v6874_v20 = vpop.permute.xlu0 %6873 }
 0x5f0   : > { %9711 = vmatmul.mubr.msk.bf16.gmra.mrb[20].mxu0 %vm818_vm2, %v11803_v9  ;;  %v10394_v9 = vld [vmem:[%s10623_s29] sm:$0xff] }
 0x5f1   : > { %9714 = vmatprep.mubr.msk.bf16.mxu0 %vm818_vm2, %v11805_v47  ;;  %v10395_v47 = vld [vmem:[%s10623_s29 + $0x8] sm:$0xff]  ;;  %v6879_v48 = vpop.permute.xlu0 %6878 }
 0x5f2   : > { %v6884_v8 = vpop.permute.xlu1 %6883 }
 0x5f8   : > { %9715 = vmatmul.mubr.msk.bf16.gmra.mrb[24].mxu0 %vm818_vm2, %v11811_v51  ;;  %v10396_v51 = vld [vmem:[%s10623_s29 + $0x10] sm:$0xff]  ;;  %v6894_v39 = vpop.permute.xlu0 %6893 }
 0x5f9   : > { %9718 = vmatprep.mubr.msk.bf16.mxu0 %vm818_vm2, %v11813_v57  ;;  %v10397_v57 = vld [vmem:[%s10623_s29 + $0x18] sm:$0xff]  ;;  %v6889_v18 = vpop.permute.xlu1 %6888 }
 0x600   : > { %9719 = vmatmul.mubr.msk.bf16.gmra.mrb[28].mxu0 %vm818_vm2, %v11819_v52  ;;  %v10398_v52 = vld [vmem:[%s10623_s29 + $0x20] sm:$0xff]  ;;  %v6904_v34 = vpop.permute.xlu0 %6903 }
 0x601   : > { %9722 = vmatprep.mubr.msk.bf16.mxu0 %vm818_vm2, %v11821_v59  ;;  %v10399_v59 = vld [vmem:[%s10623_s29 + $0x28] sm:$0xff]  ;;  %v6899_v30 = vpop.permute.xlu1 %6898 }
 0x608   : > { %9723 = vmatmul.mubr.msk.bf16.gmra.mrb[32].mxu0 %vm818_vm2, %v11827_v58  ;;  %v10400_v58 = vld [vmem:[%s10623_s29 + $0x30] sm:$0xff]  ;;  %v12342_v19 = vpop.permute.xlu0 %6913 }
 0x609   : > { %9726 = vmatprep.mubr.msk.bf16.mxu0 %vm818_vm2, %v11829_v60  ;;  %v10401_v60 = vld [vmem:[%s10623_s29 + $0x38] sm:$0xff]  ;;  %v6909_v4 = vpop.permute.xlu1 %6908 }
 0x60d   : > { %v12344_v21 = vpop.permute.xlu1 %6918 }
 0x610   : > { %9727 = vmatmul.mubr.msk.bf16.gmra.mrb[36].mxu0 %vm818_vm2, %v11835_v2  ;;  %v10391_v2 = vld [vmem:[%s12917_s8 + $0x70] ss:$8 sps:$4 sm:$0xff]  }
 0x611   : > { %9730 = vmatprep.mubr.msk.bf16.mxu0 %vm818_vm2, %v11837_v7  ;;  %v10393_v7 = vld [vmem:[%s12917_s8 + $0x74] ss:$8 sps:$4 sm:$0xff]   ;;  %v6929_v25 = vpop.permute.xlu1 %6928 }
 0x612   : > { %7201 = vmatprep.subr.bf16.mxu1 %v10393_v7 }
 0x613   : > { %7202 = vmatpush1.bf16.msra.mxu1 %v10391_v2 }
 0x618   : > { %9731 = vmatmul.mubr.msk.bf16.gmra.mrb[40].mxu0 %vm818_vm2, %v11843_v56  ;;  %v10402_v56 = vld [vmem:[%s10623_s29 + $0x40] sm:$0xff] }
 0x619   : > { %9734 = vmatprep.mubr.msk.bf16.mxu0 %vm818_vm2, %v11981_v33  ;;  %v10404_v33 = vld [vmem:[%s10623_s29 + $0x50] sm:$0xff] }
 0x620   : > { %9735 = vmatmul.mubr.msk.bf16.gmra.mrb[44].mxu0 %vm818_vm2, %v6493_v38 }
 0x621   : > { %7527 = vmatprep.mubr.f32.mxu0 %v10490_v62 }
 0x628   : > { %8536 = vmatmul.mubr.msk.f32.vlgmr.msra.gmra.mrb[48].mxu0 %vm453_vm1, %v10394_v9 }
 0x629   : > { %7533 = vmatprep.mubr.f32.mxu0 %v10490_v62 }
 0x62c   : > { %8537 = vmatmul.mubr.msk.f32.gmra.mrb[50].mxu0 %vm453_vm1, %v10395_v47  ;;  %v12357_v47 = vpop.permute.xlu1 %6938 }
 0x62d   : > { %7539 = vmatprep.mubr.f32.mxu0 %v10490_v62 }
 0x630   : > { %8538 = vmatmul.mubr.msk.f32.gmra.mrb[52].mxu0 %vm453_vm1, %v10396_v51 }
 0x631   : > { %7545 = vmatprep.mubr.f32.mxu0 %v10490_v62 }
 0x634   : > { %8539 = vmatmul.mubr.msk.f32.gmra.mrb[54].mxu0 %vm453_vm1, %v10397_v57 }
 0x635   : > { %7551 = vmatprep.mubr.f32.mxu0 %v10490_v62 }
 0x638   : > { %8540 = vmatmul.mubr.msk.f32.gmra.mrb[56].mxu0 %vm453_vm1, %v10398_v52 }
 0x639   : > { %7557 = vmatprep.mubr.f32.mxu0 %v10490_v62 }
 0x63c   : > { %8541 = vmatmul.mubr.msk.f32.gmra.mrb[58].mxu0 %vm453_vm1, %v10399_v59 }
 0x63d   : > { %7563 = vmatprep.mubr.f32.mxu0 %v10490_v62 }
 0x640   : > { %8542 = vmatmul.mubr.msk.f32.gmra.mrb[60].mxu0 %vm453_vm1, %v10400_v58 }
 0x641   : > { %7569 = vmatprep.mubr.f32.mxu0 %v10490_v62 }
 0x644   : > { %8543 = vmatmul.mubr.msk.f32.gmra.mrb[62].mxu0 %vm453_vm1, %v10401_v60 }
 0x645   : > { %7575 = vmatprep.mubr.f32.mxu0 %v10490_v62 }
 0x648   : > { %8544 = vmatmul.mubr.msk.f32.gmra.mrb[64].mxu0 %vm453_vm1, %v10402_v56 }
 0x649   : > { %7581 = vmatprep.mubr.f32.mxu0 %v10490_v62 }
 0x64c   : > { %8545 = vmatmul.mubr.msk.f32.gmra.mrb[66].mxu0 %vm453_vm1, %v10403_v12 }
 0x64d   : > { %7587 = vmatprep.mubr.f32.mxu0 %v10490_v62 }
 0x650   : > { %8546 = vmatmul.mubr.msk.f32.gmra.mrb[68].mxu0 %vm453_vm1, %v10404_v33 }
 0x651   : > { %7593 = vmatprep.mubr.f32.mxu0 %v10490_v62 }
 0x654   : > { %8547 = vmatmul.mubr.msk.f32.gmra.mrb[70].mxu0 %vm453_vm1, %v10405_v24 }
 0x655   : > { %7599 = vmatprep.mubr.f32.mxu0 %v10490_v62 }
 0x658   : > { %8548 = vmatmul.mubr.msk.f32.gmra.mrb[72].mxu0 %vm453_vm1, %v10406_v40 }
 0x659   : > { %7605 = vmatprep.mubr.f32.mxu0 %v10490_v62 }
 0x65c   : > { %8549 = vmatmul.mubr.msk.f32.gmra.mrb[74].mxu0 %vm453_vm1, %v10407_v6 }
 0x65d   : > { %7611 = vmatprep.mubr.f32.mxu0 %v10490_v62 }
 0x660   : > { %8550 = vmatmul.mubr.msk.f32.gmra.mrb[76].mxu0 %vm453_vm1, %v10408_v3 }
 0x661   : > { %7617 = vmatprep.mubr.f32.mxu0 %v10490_v62 }
 0x664   : > { %8551 = vmatmul.mubr.msk.f32.gmra.mrb[78].mxu0 %vm453_vm1, %v10409_v23 }
 0x665   : > { %7623 = vmatprep.mubr.f32.mxu0 %v10490_v62 }
 0x668   : > { %8552 = vmatmul.mubr.msk.f32.gmra.mrb[80].mxu0 %vm453_vm1, %v10410_v16  ;;  %v6949_v16 = vpop.permute.xlu1 %6948 }
 0x669   : > { %7629 = vmatprep.mubr.f32.mxu0 %v10490_v62 }
 0x66c   : > { %8553 = vmatmul.mubr.msk.f32.gmra.mrb[82].mxu0 %vm453_vm1, %v10411_v44 }
 0x66d   : > { %7635 = vmatprep.mubr.f32.mxu0 %v10490_v62 }
 0x670   : > { %8554 = vmatmul.mubr.msk.f32.gmra.mrb[84].mxu0 %vm453_vm1, %v10412_v53 }
 0x671   : > { %7641 = vmatprep.mubr.f32.mxu0 %v10490_v62 }
 0x674   : > { %8555 = vmatmul.mubr.msk.f32.gmra.mrb[86].mxu0 %vm453_vm1, %v10413_v28 }
 0x675   : > { %7647 = vmatprep.mubr.f32.mxu0 %v10490_v62 }
 0x678   : > { %8556 = vmatmul.mubr.msk.f32.gmra.mrb[88].mxu0 %vm453_vm1, %v10414_v42 }
 0x679   : > { %7653 = vmatprep.mubr.f32.mxu0 %v10490_v62 }
 0x67c   : > { %8557 = vmatmul.mubr.msk.f32.gmra.mrb[90].mxu0 %vm453_vm1, %v10415_v41 }
 0x67d   : > { %7659 = vmatprep.mubr.f32.mxu0 %v10490_v62 }
 0x680   : > { %8558 = vmatmul.mubr.msk.f32.gmra.mrb[92].mxu0 %vm453_vm1, %v10416_v63 }
 0x681   : > { %7665 = vmatprep.mubr.f32.mxu0 %v10490_v62 }
 0x684   : > { %8559 = vmatmul.mubr.msk.f32.gmra.mrb[94].mxu0 %vm453_vm1, %v10417_v0 }
 0x685   : > { %7671 = vmatprep.mubr.f32.mxu0 %v10490_v62 }
 0x688   : > { %8560 = vmatmul.mubr.msk.f32.gmra.mrb[96].mxu0 %vm453_vm1, %v10418_v43 }
 0x689   : > { %7677 = vmatprep.mubr.f32.mxu0 %v10490_v62 }
 0x68c   : > { %8561 = vmatmul.mubr.msk.f32.gmra.mrb[98].mxu0 %vm453_vm1, %v10419_v5 }
 0x68d   : > { %7683 = vmatprep.mubr.f32.mxu0 %v10490_v62 }
 0x690   : > { %8562 = vmatmul.mubr.msk.f32.gmra.mrb[100].mxu0 %vm453_vm1, %v10420_v15 }
 0x691   : > { %7689 = vmatprep.mubr.f32.mxu0 %v10490_v62 }
 0x694   : > { %8563 = vmatmul.mubr.msk.f32.gmra.mrb[102].mxu0 %vm453_vm1, %v10421_v32 }
 0x695   : > { %7695 = vmatprep.mubr.f32.mxu0 %v10490_v62 }
 0x698   : > { %8564 = vmatmul.mubr.msk.f32.gmra.mrb[104].mxu0 %vm453_vm1, %v10422_v1 }
 0x699   : > { %7701 = vmatprep.mubr.f32.mxu0 %v10490_v62 }
 0x69c   : > { %8565 = vmatmul.mubr.msk.f32.gmra.mrb[106].mxu0 %vm453_vm1, %v10423_v26 }
 0x69d   : > { %7707 = vmatprep.mubr.f32.mxu0 %v10490_v62 }
 0x6a0   : > { %8566 = vmatmul.mubr.msk.f32.gmra.mrb[108].mxu0 %vm453_vm1, %v10424_v49 }
 0x6a1   : > { %7713 = vmatprep.mubr.f32.mxu0 %v10490_v62  ;;  %v6924_v62 = vpop.permute.xlu0 %6923 }
 0x6a4   : > { %8567 = vmatmul.mubr.msk.f32.gmra.mrb[110].mxu0 %vm453_vm1, %v10425_v29 }
 0x6a5   : > { %v12355_v11 = vpop.permute.xlu0 %6933 }
 0x6a9   : > { %v6944_v3 = vpop.permute.xlu0 %6943 }
 0x6ad   : > { %v6954_v26 = vpop.permute.xlu0 %6953 }
 0x6bb   : > { %v9708_v22 = vpop.f32.mrb[16].mxu0 }
 0x6bc   : > { %v6777_v45 = vadd.f32 %v9708_v22, %v12349_v50  ;;  %v6609_v54 = vpop.f32.mrb[17].mxu0 }
 0x6bd   : > { %v6775_v14 = vadd.f32 %v12349_v50, %v6609_v54  ;;  %v9709_v31 = vpop.f32.mrb[18].mxu0 }
 0x6be   : > { %v6841_v61 = vmax.f32 %v6777_v45, 0.0  ;;  %v6778_v13 = vadd.f32 %v9709_v31, %v12349_v50  ;;  %v6612_v17 = vpop.f32.mrb[19].mxu0 }
 0x6bf   : > { %v6839_v36 = vmax.f32 %v6775_v14, 0.0  ;;  %v6776_v46 = vadd.f32 %v12349_v50, %v6612_v17  ;;  %v6964_v14 = vpop.permute.xlu0 %6963 }
 0x6c0   : > { %v6842_v55 = vmax.f32 %v6778_v13, 0.0  ;;  %v7033_v38 = vmul.f32 %v6884_v8, %v6841_v61 }
 0x6c1   : > { %v6840_v27 = vmax.f32 %v6776_v46, 0.0  ;;  %v7031_v51 = vmul.f32 %v6874_v20, %v6839_v36 }
 0x6c2   : > { %v7034_v9 = vmul.f32 %v6889_v18, %v6842_v55 }
 0x6c3   : > { %v7032_v57 = vmul.f32 %v6879_v48, %v6840_v27  ;;  %v9712_v52 = vpop.f32.mrb[20].mxu0  ;;  %v6959_v48 = vpop.permute.xlu1 %6958 }
 0x6c4   : > { %v6781_v59 = vadd.f32 %v9712_v52, %v12349_v50  ;;  %v6625_v58 = vpop.f32.mrb[21].mxu0  ;;  %v7064_v60 = vpack.c.bf16 %v7034_v9, %v7033_v38 }
 0x6c5   : > { %v7063_v2 = vpack.c.bf16 %v7032_v57, %v7031_v51  ;;  %v6779_v7 = vadd.f32 %v12349_v50, %v6625_v58  ;;  %v9713_v56 = vpop.f32.mrb[22].mxu0  ;;  %v6974_v51 = vpop.permute.xlu0 %6973 }
 0x6c6   : > { %v6845_v12 = vmax.f32 %v6781_v59, 0.0  ;;  %v6782_v33 = vadd.f32 %v9713_v56, %v12349_v50  ;;  %v6628_v24 = vpop.f32.mrb[23].mxu0 }
 0x6c7   : > { %v6843_v40 = vmax.f32 %v6779_v7, 0.0  ;;  %v6780_v6 = vadd.f32 %v12349_v50, %v6628_v24  ;;  %7220 = vmatmul.mubr.bf16.vlgmr.msra.gmra.mrb[48].mxu1 %v7063_v2  ;;  %v6969_v17 = vpop.permute.xlu1 %6968 }
 0x6c8   : > { %v6846_v23 = vmax.f32 %v6782_v33, 0.0  ;;  %7229 = vmatprep.mubr.bf16.mxu1 %v10491_v10  ;;  %v7037_v53 = vmul.f32 %v6904_v34, %v6845_v12 }
 0x6c9   : > { %v6844_v44 = vmax.f32 %v6780_v6, 0.0  ;;  %v7035_v42 = vmul.f32 %v6894_v39, %v6843_v40 }
 0x6ca   : > { %v7038_v28 = vmul.f32 %v6909_v4, %v6846_v23 }
 0x6cb   : > { %v7036_v41 = vmul.f32 %v6899_v30, %v6844_v44  ;;  %v9716_v63 = vpop.f32.mrb[24].mxu0  ;;  %v6979_v59 = vpop.permute.xlu1 %6978 }
 0x6cc   : > { %v6785_v0 = vadd.f32 %v9716_v63, %v12349_v50  ;;  %v6641_v43 = vpop.f32.mrb[25].mxu0  ;;  %v7066_v5 = vpack.c.bf16 %v7038_v28, %v7037_v53 }
 0x6cd   : > { %v6783_v15 = vadd.f32 %v12349_v50, %v6641_v43  ;;  %v9717_v32 = vpop.f32.mrb[26].mxu0  ;;  %v7065_v1 = vpack.c.bf16 %v7036_v41, %v7035_v42 }
 0x6ce   : > { %v6849_v20 = vmax.f32 %v6785_v0, 0.0  ;;  %v6786_v8 = vadd.f32 %v9717_v32, %v12349_v50  ;;  %v6644_v49 = vpop.f32.mrb[27].mxu0 }
 0x6cf   : > { %v6847_v29 = vmax.f32 %v6783_v15, 0.0  ;;  %v6784_v18 = vadd.f32 %v12349_v50, %v6644_v49  ;;  %7230 = vmatmul.mubr.bf16.gmra.mrb[52].mxu1 %v7064_v60  ;;  %v6989_v53 = vpop.permute.xlu1 %6988 }
 0x6d0   : > { %v6850_v39 = vmax.f32 %v6786_v8, 0.0  ;;  %7239 = vmatprep.mubr.bf16.mxu1 %v10491_v10  ;;  %v12369_v34 = vmul.f32 %v6924_v62, %v6849_v20 }
 0x6d1   : > { %v6848_v30 = vmax.f32 %v6784_v18, 0.0  ;;  %v7039_v22 = vmul.f32 %v12342_v19, %v6847_v29 }
 0x6d2   : > { %v12371_v4 = vmul.f32 %v6929_v25, %v6850_v39 }
 0x6d3   : > { %v7040_v45 = vmul.f32 %v12344_v21, %v6848_v30  ;;  %v9720_v54 = vpop.f32.mrb[28].mxu0 }
 0x6d4   : > { %v6789_v31 = vadd.f32 %v9720_v54, %v12349_v50  ;;  %v6657_v61 = vpop.f32.mrb[29].mxu0  ;;  %v7068_v13 = vpack.c.bf16 %v12371_v4, %v12369_v34 }
 0x6d5   : > { %v6787_v36 = vadd.f32 %v12349_v50, %v6657_v61  ;;  %v9721_v46 = vpop.f32.mrb[30].mxu0  ;;  %v7067_v62 = vpack.c.bf16 %v7040_v45, %v7039_v22 }
 0x6d6   : > { %v6853_v55 = vmax.f32 %v6789_v31, 0.0  ;;  %v6790_v25 = vadd.f32 %v9721_v46, %v12349_v50  ;;  %v6660_v27 = vpop.f32.mrb[31].mxu0 }
 0x6d7   : > { %v6851_v19 = vmax.f32 %v6787_v36, 0.0  ;;  %v6788_v21 = vadd.f32 %v12349_v50, %v6660_v27  ;;  %7240 = vmatmul.mubr.bf16.gmra.mrb[56].mxu1 %v7065_v1 }
 0x6d8   : > { %v6854_v38 = vmax.f32 %v6790_v25, 0.0  ;;  %7249 = vmatprep.mubr.bf16.mxu1 %v10491_v10  ;;  %v12382_v57 = vmul.f32 %v6944_v3, %v6853_v55 }
 0x6d9   : > { %v6852_v9 = vmax.f32 %v6788_v21, 0.0  ;;  %v12387_v58 = vmul.f32 %v12355_v11, %v6851_v19 }
 0x6da   : > { %v12384_v52 = vmul.f32 %v6949_v16, %v6854_v38  ;;  %v6984_v16 = vpop.permute.xlu0 %6983 }
 0x6db   : > { %v12390_v60 = vmul.f32 %v12357_v47, %v6852_v9  ;;  %v9724_v2 = vpop.f32.mrb[32].mxu0 }
 0x6dc   : > { %v6793_v7 = vadd.f32 %v9724_v2, %v12349_v50  ;;  %v6673_v56 = vpop.f32.mrb[33].mxu0  ;;  %v7070_v12 = vpack.c.bf16 %v12384_v52, %v12382_v57 }
 0x6dd   : > { %v6791_v33 = vadd.f32 %v12349_v50, %v6673_v56  ;;  %v9725_v24 = vpop.f32.mrb[34].mxu0  ;;  %v7069_v40 = vpack.c.bf16 %v12390_v60, %v12387_v58 }
 0x6de   : > { %v6857_v6 = vmax.f32 %v6793_v7, 0.0  ;;  %v6794_v11 = vadd.f32 %v9725_v24, %v12349_v50  ;;  %v6676_v3 = vpop.f32.mrb[35].mxu0  ;;  %v6994_v49 = vpop.permute.xlu0 %6993 }
 0x6df   : > { %v6855_v23 = vmax.f32 %v6791_v33, 0.0  ;;  %v6792_v47 = vadd.f32 %v12349_v50, %v6676_v3  ;;  %7250 = vmatmul.mubr.bf16.gmra.mrb[60].mxu1 %v7066_v5 }
 0x6e0   : > { %v6858_v44 = vmax.f32 %v6794_v11, 0.0  ;;  %7259 = vmatprep.mubr.bf16.mxu1 %v10491_v10  ;;  %v12401_v42 = vmul.f32 %v6964_v14, %v6857_v6 }
 0x6e1   : > { %v6856_v28 = vmax.f32 %v6792_v47, 0.0  ;;  %v12405_v63 = vmul.f32 %v6954_v26, %v6855_v23 }
 0x6e2   : > { %v12403_v41 = vmul.f32 %v6969_v17, %v6858_v44  ;;  %v7004_v36 = vpop.permute.xlu0 %7003 }
 0x6e3   : > { %v12407_v0 = vmul.f32 %v6959_v48, %v6856_v28  ;;  %v9728_v43 = vpop.f32.mrb[36].mxu0  ;;  %v6999_v48 = vpop.permute.xlu1 %6998 }
 0x6e4   : > { %v6797_v15 = vadd.f32 %v9728_v43, %v12349_v50  ;;  %v6689_v32 = vpop.f32.mrb[37].mxu0  ;;  %v7072_v5 = vpack.c.bf16 %v12403_v41, %v12401_v42 }
 0x6e5   : > { %v6795_v1 = vadd.f32 %v12349_v50, %v6689_v32  ;;  %v9729_v20 = vpop.f32.mrb[38].mxu0  ;;  %v7071_v8 = vpack.c.bf16 %v12407_v0, %v12405_v63 }
 0x6e6   : > { %v6861_v29 = vmax.f32 %v6797_v15, 0.0  ;;  %v6798_v26 = vadd.f32 %v9729_v20, %v12349_v50  ;;  %v6692_v18 = vpop.f32.mrb[39].mxu0  ;;  %v7014_v33 = vpop.permute.xlu0 %7013 }
 0x6e7   : > { %v6859_v39 = vmax.f32 %v6795_v1, 0.0  ;;  %v6796_v30 = vadd.f32 %v12349_v50, %v6692_v18  ;;  %7260 = vmatmul.mubr.bf16.gmra.mrb[64].mxu1 %v7067_v62  ;;  %v7009_v27 = vpop.permute.xlu1 %7008 }
 0x6e8   : > { %v6862_v22 = vmax.f32 %v6798_v26, 0.0  ;;  %7269 = vmatprep.mubr.bf16.mxu1 %v10491_v10  ;;  %v7053_v54 = vmul.f32 %v6984_v16, %v6861_v29 }
 0x6e9   : > { %v6860_v45 = vmax.f32 %v6796_v30, 0.0  ;;  %v7051_v31 = vmul.f32 %v6974_v51, %v6859_v39 }
 0x6ea   : > { %v7054_v14 = vmul.f32 %v6989_v53, %v6862_v22 }
 0x6eb   : > { %v7052_v61 = vmul.f32 %v6979_v59, %v6860_v45  ;;  %v9732_v17 = vpop.f32.mrb[40].mxu0  ;;  %v7019_v11 = vpop.permute.xlu1 %7018 }
 0x6ec   : > { %v6801_v46 = vadd.f32 %v9732_v17, %v12349_v50  ;;  %v6705_v55 = vpop.f32.mrb[41].mxu0  ;;  %v7074_v25 = vpack.c.bf16 %v7054_v14, %v7053_v54 }
 0x6ed   : > { %v6799_v19 = vadd.f32 %v12349_v50, %v6705_v55  ;;  %v9733_v21 = vpop.f32.mrb[42].mxu0  ;;  %v7073_v38 = vpack.c.bf16 %v7052_v61, %v7051_v31 }
 0x6ee   : > { %v6865_v62 = vmax.f32 %v6801_v46, 0.0  ;;  %v6802_v9 = vadd.f32 %v9733_v21, %v12349_v50  ;;  %v6708_v2 = vpop.f32.mrb[43].mxu0 }
 0x6ef   : > { %v6863_v7 = vmax.f32 %v6799_v19, 0.0  ;;  %v6800_v56 = vadd.f32 %v12349_v50, %v6708_v2  ;;  %7270 = vmatmul.mubr.bf16.gmra.mrb[68].mxu1 %v7068_v13  ;;  %v7029_v29 = vpop.permute.xlu1 %7028 }
 0x6f0   : > { %v6866_v51 = vmax.f32 %v6802_v9, 0.0  ;;  %7279 = vmatprep.mubr.bf16.mxu1 %v10491_v10  ;;  %v7057_v24 = vmul.f32 %v7004_v36, %v6865_v62 }
 0x6f1   : > { %v6864_v59 = vmax.f32 %v6800_v56, 0.0  ;;  %v7055_v3 = vmul.f32 %v6994_v49, %v6863_v7  ;;  %v7024_v49 = vpop.permute.xlu0 %7023 }
 0x6f2   : > { %v7058_v6 = vmul.f32 %v7009_v27, %v6866_v51 }
 0x6f3   : > { %v7056_v23 = vmul.f32 %v6999_v48, %v6864_v59  ;;  %v9736_v47 = vpop.f32.mrb[44].mxu0 }
 0x6f4   : > { %v6805_v16 = vadd.f32 %v9736_v47, %v12349_v50  ;;  %v6721_v44 = vpop.f32.mrb[45].mxu0  ;;  %v7076_v53 = vpack.c.bf16 %v7058_v6, %v7057_v24 }
 0x6f5   : > { %v6803_v28 = vadd.f32 %v12349_v50, %v6721_v44  ;;  %v9737_v43 = vpop.f32.mrb[46].mxu0  ;;  %v7075_v34 = vpack.c.bf16 %v7056_v23, %v7055_v3 }
 0x6f6   : > { %v6869_v4 = vmax.f32 %v6805_v16, 0.0  ;;  %v6806_v13 = vadd.f32 %v9737_v43, %v12349_v50  ;;  %v6724_v15 = vpop.f32.mrb[47].mxu0 }
 0x6f7   : > { %v6867_v32 = vmax.f32 %v6803_v28, 0.0  ;;  %v6804_v1 = vadd.f32 %v12349_v50, %v6724_v15  ;;  %7280 = vmatmul.mubr.bf16.gmra.mrb[72].mxu1 %v7069_v40 }
 0x6f8   : > { %v6870_v20 = vmax.f32 %v6806_v13, 0.0  ;;  %7289 = vmatprep.mubr.bf16.mxu1 %v10491_v10  ;;  %v7061_v18 = vmul.f32 %v7024_v49, %v6869_v4 }
 0x6f9   : > { %v6868_v26 = vmax.f32 %v6804_v1, 0.0  ;;  %v7059_v39 = vmul.f32 %v7014_v33, %v6867_v32 }
 0x6fa   : > { %v7062_v48 = vmul.f32 %v7029_v29, %v6870_v20 }
 0x6fb   : > { %v7060_v30 = vmul.f32 %v7019_v11, %v6868_v26  ;;  %v12434_v22 = vpop.f32.mrb[48].mxu0 }
 0x6fc   : > { %v7078_v45 = vpack.c.bf16 %v7062_v48, %v7061_v18  ;;  %v12450_v50 = vpop.f32.mrb[49].mxu0 }
 0x6fd   : > { %v7077_v54 = vpack.c.bf16 %v7060_v30, %v7059_v39  ;;  %v7095_v39 = vld [vmem:[%s12918_s9] sm:$0x3]  ;;  %v7103_v30 = vsub.s32 1, %v10691_v35 }
 0x6ff   : > { %7290 = vmatmul.mubr.bf16.gmra.mrb[76].mxu1 %v7070_v12  ;;  %v12452_v57 = vpop.f32.mrb[50].mxu0 }
 0x700   : > { %7299 = vmatprep.mubr.bf16.mxu1 %v10491_v10  ;;  %v12454_v52 = vpop.f32.mrb[51].mxu0 }
 0x703   : > { %v12456_v58 = vpop.f32.mrb[52].mxu0 }
 0x704   : > { %v12459_v60 = vpop.f32.mrb[53].mxu0 }
 0x707   : > { %7300 = vmatmul.mubr.bf16.gmra.mrb[80].mxu1 %v7071_v8  ;;  %v12461_v12 = vpop.f32.mrb[54].mxu0 }
 0x708   : > { %7309 = vmatprep.mubr.bf16.mxu1 %v10491_v10  ;;  %v12463_v40 = vpop.f32.mrb[55].mxu0 }
 0x70b   : > { %v12465_v42 = vpop.f32.mrb[56].mxu0 }
 0x70c   : > { %v12468_v41 = vpop.f32.mrb[57].mxu0 }
 0x70f   : > { %7310 = vmatmul.mubr.bf16.gmra.mrb[84].mxu1 %v7072_v5  ;;  %v12470_v63 = vpop.f32.mrb[58].mxu0 }
 0x710   : > { %7319 = vmatprep.mubr.bf16.mxu1 %v10491_v10  ;;  %v12472_v0 = vpop.f32.mrb[59].mxu0 }
 0x713   : > { %v12474_v5 = vpop.f32.mrb[60].mxu0 }
 0x714   : > { %v12477_v8 = vpop.f32.mrb[61].mxu0 }
 0x717   : > { %7320 = vmatmul.mubr.bf16.gmra.mrb[88].mxu1 %v7073_v38  ;;  %v12479_v14 = vpop.f32.mrb[62].mxu0 }
 0x718   : > { %7329 = vmatprep.mubr.bf16.mxu1 %v10491_v10  ;;  %v12481_v31 = vpop.f32.mrb[63].mxu0 }
 0x71b   : > { %v12483_v61 = vpop.f32.mrb[64].mxu0 }
 0x71c   : > { %v12485_v17 = vpop.f32.mrb[65].mxu0 }
 0x71f   : > { %7330 = vmatmul.mubr.bf16.gmra.mrb[92].mxu1 %v7074_v25  ;;  %v12487_v36 = vpop.f32.mrb[66].mxu0 }
 0x720   : > { %7339 = vmatprep.mubr.bf16.mxu1 %v10491_v10  ;;  %v12489_v46 = vpop.f32.mrb[67].mxu0 }
 0x723   : > { %v12491_v55 = vpop.f32.mrb[68].mxu0 }
 0x724   : > { %v12493_v25 = vpop.f32.mrb[69].mxu0 }
 0x727   : > { %7340 = vmatmul.mubr.bf16.gmra.mrb[96].mxu1 %v7075_v34 }
 0x728   : > { %7349 = vmatprep.mubr.bf16.mxu1 %v10491_v10 }
 0x72f   : > { %7350 = vmatmul.mubr.bf16.gmra.mrb[100].mxu1 %v7076_v53 }
 0x730   : > { %7359 = vmatprep.mubr.bf16.mxu1 %v10491_v10 }
 0x737   : > { %7360 = vmatmul.mubr.bf16.gmra.mrb[104].mxu1 %v7077_v54 }
 0x738   : > { %7369 = vmatprep.mubr.bf16.mxu1 %v10491_v10  ;;  %v12495_v10 = vpop.f32.mrb[70].mxu0 }
 0x739   : > { %v12497_v27 = vpop.f32.mrb[71].mxu0 }
 0x73a   : > { %v12499_v19 = vpop.f32.mrb[72].mxu0 }
 0x73b   : > { %v12501_v21 = vpop.f32.mrb[73].mxu0 }
 0x73c   : > { %v12503_v38 = vpop.f32.mrb[74].mxu0 }
 0x73d   : > { %v12505_v62 = vpop.f32.mrb[75].mxu0 }
 0x73e   : > { %v12507_v9 = vpop.f32.mrb[76].mxu0 }
 0x73f   : > { %7370 = vmatmul.mubr.bf16.gmra.mrb[108].mxu1 %v7078_v45  ;;  %v12509_v2 = vpop.f32.mrb[77].mxu0 }
 0x740   : > { %v12511_v7 = vpop.f32.mrb[78].mxu0 }
 0x741   : > { %v12513_v56 = vpop.f32.mrb[79].mxu0 }
 0x742   : > { %v12515_v51 = vpop.f32.mrb[80].mxu0 }
 0x743   : > { %v12517_v59 = vpop.f32.mrb[81].mxu0 }
 0x744   : > { %v12519_v33 = vpop.f32.mrb[82].mxu0 }
 0x745   : > { %v12521_v24 = vpop.f32.mrb[83].mxu0 }
 0x746   : > { %v12523_v6 = vpop.f32.mrb[84].mxu0 }
 0x747   : > { %v12525_v11 = vpop.f32.mrb[85].mxu0 }
 0x748   : > { %v12527_v3 = vpop.f32.mrb[86].mxu0 }
 0x749   : > { %v12529_v23 = vpop.f32.mrb[87].mxu0 }
 0x74b   : > { %v12531_v47 = vpop.f32.mrb[88].mxu0 }
 0x74c   : > { %v12533_v16 = vpop.f32.mrb[89].mxu0 }
 0x74d   : > { %12926 = vst [vmem:[#allocation7_spill] sm:$0xff] %v12533_v16 }
 0x74f   : > { %v12535_v44 = vpop.f32.mrb[90].mxu0 }
 0x750   : > { %v12537_v53 = vpop.f32.mrb[91].mxu0 }
 0x751   : > { %12927 = vst [vmem:[#allocation8_spill] sm:$0xff] %v12537_v53 }
 0x753   : > { %v12539_v28 = vpop.f32.mrb[92].mxu0 }
 0x754   : > { %12928 = vst [vmem:[#allocation9_spill] sm:$0xff] %v12539_v28  ;;  %v12541_v43 = vpop.f32.mrb[93].mxu0 }
 0x755   : > { %12929 = vst [vmem:[#allocation10_spill] sm:$0xff] %v12541_v43 }
 0x757   : > { %v12543_v34 = vpop.f32.mrb[94].mxu0 }
 0x758   : > { %12930 = vst [vmem:[#allocation11_spill] sm:$0xff] %v12543_v34  ;;  %v12545_v4 = vpop.f32.mrb[95].mxu0 }
 0x759   : > { %12931 = vst [vmem:[#allocation12_spill] sm:$0xff] %v12545_v4 }
 0x75b   : > { %v12547_v13 = vpop.f32.mrb[96].mxu0 }
 0x75c   : > { %12932 = vst [vmem:[#allocation13_spill] sm:$0xff] %v12547_v13  ;;  %v12549_v15 = vpop.f32.mrb[97].mxu0 }
 0x75d   : > { %12933 = vst [vmem:[#allocation14_spill] sm:$0xff] %v12549_v15 }
 0x75f   : > { %v12551_v32 = vpop.f32.mrb[98].mxu0 }
 0x760   : > { %12934 = vst [vmem:[#allocation15_spill] sm:$0xff] %v12551_v32  ;;  %v12553_v1 = vpop.f32.mrb[99].mxu0 }
 0x761   : > { %12935 = vst [vmem:[#allocation16_spill] sm:$0xff] %v12553_v1 }
 0x763   : > { %v12555_v20 = vpop.f32.mrb[100].mxu0 }
 0x764   : > { %12936 = vst [vmem:[#allocation17_spill] sm:$0xff] %v12555_v20  ;;  %v12557_v49 = vpop.f32.mrb[101].mxu0 }
 0x765   : > { %12937 = vst [vmem:[#allocation18_spill] sm:$0xff] %v12557_v49  ;;  %v7445_v49 = vld [vmem:[%s12920_s11] sm:$0x3] }
 0x767   : > { %v12559_v29 = vpop.f32.mrb[102].mxu0 }
 0x768   : > { %12938 = vst [vmem:[#allocation19_spill] sm:$0xff] %v12559_v29  ;;  %v12561_v26 = vpop.f32.mrb[103].mxu0  ;;  %v12586_v29 = vrot.slane %v7445_v49, %v10699_v37 }
 0x769   : > { %12939 = vst [vmem:[#allocation20_spill] sm:$0xff] %v12561_v26 }
 0x76b   : > { %v12563_v18 = vpop.f32.mrb[104].mxu0 }
 0x76c   : > { %12940 = vst [vmem:[#allocation21_spill] sm:$0xff] %v12563_v18  ;;  %v12565_v48 = vpop.f32.mrb[105].mxu0  ;;  %v12581_v18 = vrot.slane %v7095_v39, %v10699_v37 }
 0x76d   : > { %12941 = vst [vmem:[#allocation22_spill] sm:$0xff] %v12565_v48  ;;  %v12583_v48 = vrot.slane %v7095_v39, %v7103_v30  ;;  %v7530_v39 = vadd.f32 %v12434_v22, %v12586_v29 }
 0x76f   : > { %v12571_v45 = vpop.f32.mrb[106].mxu0 }
 0x770   : > { %12942 = vst [vmem:[#allocation23_spill] sm:$0xff] %v12571_v45  ;;  %v12573_v54 = vpop.f32.mrb[107].mxu0  ;;  %v12589_v45 = vrot.slane %v7445_v49, %v7103_v30  ;;  %v7536_v30 = vadd.f32 %v12452_v57, %v12586_v29 }
 0x771   : > { %12943 = vst [vmem:[#allocation24_spill] sm:$0xff] %v12573_v54 }
 0x772   : > { %v7538_v22 = vadd.f32 %v12454_v52, %v12589_v45 }
 0x773   : > { %v12578_v26 = vpop.f32.mrb[108].mxu0 }
 0x774   : > { %12944 = vst [vmem:[#allocation25_spill] sm:$0xff] %v12578_v26  ;;  %v12592_v1 = vpop.f32.mrb[109].mxu0 }
 0x775   : > { %12945 = vst [vmem:[#allocation26_spill] sm:$0xff] %v12592_v1 }
 0x777   : > { %v12595_v32 = vpop.f32.mrb[110].mxu0 }
 0x778   : > { %12946 = vst [vmem:[#allocation27_spill] sm:$0xff] %v12595_v32 }
 0x79a   : > { %v7221_v35 = vpop.f32.mrb[48].mxu1 }
 0x79b   : > { %v7222_v54 = vadd.f32 %v7221_v35, %v12581_v18  ;;  %v7223_v20 = vpop.f32.mrb[49].mxu1  ;;  %v12604_v35 = vpop.f32.mrb[111].mxu0 }
 0x79c   : > { %v7224_v15 = vadd.f32 %v7223_v20, %v12583_v48  ;;  %v7225_v26 = vpop.f32.mrb[50].mxu1  ;;  %v7532_v20 = vadd.f32 %v12450_v50, %v12589_v45 }
 0x79d   : > { %v7380_v37 = vmax.f32 %v7222_v54, 0.0  ;;  %v7226_v13 = vadd.f32 %v7225_v26, %v12581_v18  ;;  %v7227_v49 = vpop.f32.mrb[51].mxu1 }
 0x79e   : > { %v7381_v1 = vmax.f32 %v7224_v15, 0.0  ;;  %v7228_v32 = vadd.f32 %v7227_v49, %v12583_v48  ;;  %v7550_v49 = vadd.f32 %v12463_v40, %v12589_v45 }
 0x79f   : > { %v7720_v4 = vadd.f32 %v7530_v39, %v7380_v37  ;;  %v7382_v43 = vmax.f32 %v7226_v13, 0.0 }
 0x7a0   : > { %v7721_v54 = vadd.f32 %v7532_v20, %v7381_v1  ;;  %v7383_v34 = vmax.f32 %v7228_v32, 0.0 }
 0x7a1   : > { %v7784_v26 = vmax.f32 %v7720_v4, 0.0  ;;  %v7722_v28 = vadd.f32 %v7536_v30, %v7382_v43  ;;  %v7542_v43 = vadd.f32 %v12456_v58, %v12586_v29 }
 0x7a2   : > { %v7785_v53 = vmax.f32 %v7721_v54, 0.0  ;;  %v7723_v16 = vadd.f32 %v7538_v22, %v7383_v34  ;;  %v7231_v57 = vpop.f32.mrb[52].mxu1 }
 0x7a3   : > { %7848 = vst [vmem:[%s12611_s18] sm:$0xff] %v7784_v26  ;;  %v7786_v50 = vmax.f32 %v7722_v28, 0.0  ;;  %v7232_v15 = vadd.f32 %v7231_v57, %v12581_v18  ;;  %v7233_v52 = vpop.f32.mrb[53].mxu1  ;;  %v7548_v28 = vadd.f32 %v12461_v12, %v12586_v29 }
 0x7a4   : > { %7849 = vst [vmem:[%s12611_s18 + $0x8] sm:$0xff] %v7785_v53  ;;  %v7787_v13 = vmax.f32 %v7723_v16, 0.0  ;;  %v7234_v32 = vadd.f32 %v7233_v52, %v12583_v48  ;;  %v7235_v4 = vpop.f32.mrb[54].mxu1  ;;  %v7544_v53 = vadd.f32 %v12459_v60, %v12589_v45 }
 0x7a5   : > { %7850 = vst [vmem:[%s12611_s18 + $0x10] sm:$0xff] %v7786_v50  ;;  %v7384_v34 = vmax.f32 %v7232_v15, 0.0  ;;  %v7236_v1 = vadd.f32 %v7235_v4, %v12581_v18  ;;  %v7237_v39 = vpop.f32.mrb[55].mxu1  ;;  %v7554_v4 = vadd.f32 %v12465_v42, %v12586_v29 }
 0x7a6   : > { %7851 = vst [vmem:[%s12611_s18 + $0x18] sm:$0xff] %v7787_v13  ;;  %v7385_v16 = vmax.f32 %v7234_v32, 0.0  ;;  %v7238_v37 = vadd.f32 %v7237_v39, %v12583_v48  ;;  %v7560_v39 = vadd.f32 %v12470_v63, %v12586_v29 }
 0x7a7   : > { %v7724_v58 = vadd.f32 %v7542_v43, %v7384_v34  ;;  %v7386_v30 = vmax.f32 %v7236_v1, 0.0 }
 0x7a8   : > { %v7725_v20 = vadd.f32 %v7544_v53, %v7385_v16  ;;  %v7387_v22 = vmax.f32 %v7238_v37, 0.0  ;;  %v7562_v37 = vadd.f32 %v12472_v0, %v12589_v45 }
 0x7a9   : > { %v7788_v54 = vmax.f32 %v7724_v58, 0.0  ;;  %v7726_v26 = vadd.f32 %v7548_v28, %v7386_v30  ;;  %v7556_v28 = vadd.f32 %v12468_v41, %v12589_v45 }
 0x7aa   : > { %v7789_v57 = vmax.f32 %v7725_v20, 0.0  ;;  %v7727_v12 = vadd.f32 %v7550_v49, %v7387_v22  ;;  %v7241_v50 = vpop.f32.mrb[56].mxu1 }
 0x7ab   : > { %7852 = vst [vmem:[%s12611_s18 + $0x20] sm:$0xff] %v7788_v54  ;;  %v7790_v60 = vmax.f32 %v7726_v26, 0.0  ;;  %v7242_v15 = vadd.f32 %v7241_v50, %v12581_v18  ;;  %v7243_v52 = vpop.f32.mrb[57].mxu1 }
 0x7ac   : > { %7853 = vst [vmem:[%s12611_s18 + $0x28] sm:$0xff] %v7789_v57  ;;  %v7791_v13 = vmax.f32 %v7727_v12, 0.0  ;;  %v7244_v40 = vadd.f32 %v7243_v52, %v12583_v48  ;;  %v7245_v32 = vpop.f32.mrb[58].mxu1 }
 0x7ad   : > { %7854 = vst [vmem:[%s12611_s18 + $0x30] sm:$0xff] %v7790_v60  ;;  %v7388_v43 = vmax.f32 %v7242_v15, 0.0  ;;  %v7246_v34 = vadd.f32 %v7245_v32, %v12581_v18  ;;  %v7247_v1 = vpop.f32.mrb[59].mxu1  ;;  %v7566_v15 = vadd.f32 %v12474_v5, %v12586_v29  ;;  %v7572_v32 = vadd.f32 %v12479_v14, %v12586_v29 }
 0x7ae   : > { %7855 = vst [vmem:[%s12611_s18 + $0x38] sm:$0xff] %v7791_v13  ;;  %v7389_v53 = vmax.f32 %v7244_v40, 0.0  ;;  %v7248_v16 = vadd.f32 %v7247_v1, %v12583_v48  ;;  %v7574_v1 = vadd.f32 %v12481_v31, %v12589_v45 }
 0x7af   : > { %v7728_v42 = vadd.f32 %v7554_v4, %v7388_v43  ;;  %v7390_v49 = vmax.f32 %v7246_v34, 0.0  ;;  %v7568_v4 = vadd.f32 %v12477_v8, %v12589_v45 }
 0x7b0   : > { %v7729_v58 = vadd.f32 %v7556_v28, %v7389_v53  ;;  %v7391_v30 = vmax.f32 %v7248_v16, 0.0 }
 0x7b1   : > { %v7792_v20 = vmax.f32 %v7728_v42, 0.0  ;;  %v7730_v22 = vadd.f32 %v7560_v39, %v7390_v49 }
 0x7b2   : > { %v7793_v54 = vmax.f32 %v7729_v58, 0.0  ;;  %v7731_v63 = vadd.f32 %v7562_v37, %v7391_v30  ;;  %v7251_v26 = vpop.f32.mrb[60].mxu1 }
 0x7b3   : > { %7856 = vst [vmem:[%s12611_s18 + $0x40] sm:$0xff] %v7792_v20  ;;  %v7794_v41 = vmax.f32 %v7730_v22, 0.0  ;;  %v7252_v57 = vadd.f32 %v7251_v26, %v12581_v18  ;;  %v7253_v12 = vpop.f32.mrb[61].mxu1 }
 0x7b4   : > { %7857 = vst [vmem:[%s12611_s18 + $0x48] sm:$0xff] %v7793_v54  ;;  %v7795_v50 = vmax.f32 %v7731_v63, 0.0  ;;  %v7254_v0 = vadd.f32 %v7253_v12, %v12583_v48  ;;  %v7255_v60 = vpop.f32.mrb[62].mxu1  ;;  %v7578_v54 = vadd.f32 %v12483_v61, %v12586_v29  ;;  %v7580_v12 = vadd.f32 %v12485_v17, %v12589_v45 }
 0x7b5   : > { %7858 = vst [vmem:[%s12611_s18 + $0x50] sm:$0xff] %v7794_v41  ;;  %v7392_v52 = vmax.f32 %v7252_v57, 0.0  ;;  %v7256_v13 = vadd.f32 %v7255_v60, %v12581_v18  ;;  %v7257_v40 = vpop.f32.mrb[63].mxu1  ;;  %v7584_v57 = vadd.f32 %v12487_v36, %v12586_v29  ;;  %v7586_v60 = vadd.f32 %v12489_v46, %v12589_v45 }
 0x7b6   : > { %7859 = vst [vmem:[%s12611_s18 + $0x58] sm:$0xff] %v7795_v50  ;;  %v7393_v43 = vmax.f32 %v7254_v0, 0.0  ;;  %v7258_v34 = vadd.f32 %v7257_v40, %v12583_v48 }
 0x7b7   : > { %v7732_v5 = vadd.f32 %v7566_v15, %v7392_v52  ;;  %v7394_v39 = vmax.f32 %v7256_v13, 0.0 }
 0x7b8   : > { %v7733_v28 = vadd.f32 %v7568_v4, %v7393_v43  ;;  %v7395_v53 = vmax.f32 %v7258_v34, 0.0 }
 0x7b9   : > { %v7796_v16 = vmax.f32 %v7732_v5, 0.0  ;;  %v7734_v37 = vadd.f32 %v7572_v32, %v7394_v39 }
 0x7ba   : > { %v7797_v42 = vmax.f32 %v7733_v28, 0.0  ;;  %v7735_v14 = vadd.f32 %v7574_v1, %v7395_v53  ;;  %v7261_v49 = vpop.f32.mrb[64].mxu1  ;;  %v7590_v28 = vadd.f32 %v12491_v55, %v12586_v29 }
 0x7bb   : > { %7860 = vst [vmem:[%s12611_s18 + $0x60] sm:$0xff] %v7796_v16  ;;  %v7798_v8 = vmax.f32 %v7734_v37, 0.0  ;;  %v7262_v58 = vadd.f32 %v7261_v49, %v12581_v18  ;;  %v7263_v30 = vpop.f32.mrb[65].mxu1 }
 0x7bc   : > { %7861 = vst [vmem:[%s12611_s18 + $0x68] sm:$0xff] %v7797_v42  ;;  %v7799_v20 = vmax.f32 %v7735_v14, 0.0  ;;  %v7264_v31 = vadd.f32 %v7263_v30, %v12583_v48  ;;  %v7265_v22 = vpop.f32.mrb[66].mxu1  ;;  %v7596_v42 = vadd.f32 %v12495_v10, %v12586_v29  ;;  %v7592_v14 = vadd.f32 %v12493_v25, %v12589_v45 }
 0x7bd   : > { %7862 = vst [vmem:[%s12611_s18 + $0x70] sm:$0xff] %v7798_v8  ;;  %v7396_v63 = vmax.f32 %v7262_v58, 0.0  ;;  %v7266_v26 = vadd.f32 %v7265_v22, %v12581_v18  ;;  %v7267_v41 = vpop.f32.mrb[67].mxu1  ;;  %v7598_v58 = vadd.f32 %v12497_v27, %v12589_v45 }
 0x7be   : > { %7863 = vst [vmem:[%s12611_s18 + $0x78] sm:$0xff] %v7799_v20  ;;  %v7397_v50 = vmax.f32 %v7264_v31, 0.0  ;;  %v7268_v0 = vadd.f32 %v7267_v41, %v12583_v48 }
 0x7bf   : > { %v7736_v61 = vadd.f32 %v7578_v54, %v7396_v63  ;;  %v7398_v15 = vmax.f32 %v7266_v26, 0.0 }
 0x7c0   : > { %v7737_v52 = vadd.f32 %v7580_v12, %v7397_v50  ;;  %v7399_v13 = vmax.f32 %v7268_v0, 0.0  ;;  %v7602_v0 = vadd.f32 %v12499_v19, %v12586_v29 }
 0x7c1   : > { %v7800_v40 = vmax.f32 %v7736_v61, 0.0  ;;  %v7738_v32 = vadd.f32 %v7584_v57, %v7398_v15 }
 0x7c2   : > { %v7801_v4 = vmax.f32 %v7737_v52, 0.0  ;;  %v7739_v36 = vadd.f32 %v7586_v60, %v7399_v13  ;;  %v7271_v43 = vpop.f32.mrb[68].mxu1  ;;  %v7608_v52 = vadd.f32 %v12503_v38, %v12586_v29  ;;  %v7604_v13 = vadd.f32 %v12501_v21, %v12589_v45 }
 0x7c3   : > { %7864 = vst [vmem:[%s12611_s18 + $0x80] sm:$0xff] %v7800_v40  ;;  %v7802_v17 = vmax.f32 %v7738_v32, 0.0  ;;  %v7272_v34 = vadd.f32 %v7271_v43, %v12581_v18  ;;  %v7273_v1 = vpop.f32.mrb[69].mxu1 }
 0x7c4   : > { %7865 = vst [vmem:[%s12611_s18 + $0x88] sm:$0xff] %v7801_v4  ;;  %v7803_v5 = vmax.f32 %v7739_v36, 0.0  ;;  %v7274_v46 = vadd.f32 %v7273_v1, %v12583_v48  ;;  %v7275_v39 = vpop.f32.mrb[70].mxu1  ;;  %v7610_v4 = vadd.f32 %v12505_v62, %v12589_v45 }
 0x7c5   : > { %7866 = vst [vmem:[%s12611_s18 + $0x90] sm:$0xff] %v7802_v17  ;;  %v7400_v53 = vmax.f32 %v7272_v34, 0.0  ;;  %v7276_v16 = vadd.f32 %v7275_v39, %v12581_v18  ;;  %v7277_v37 = vpop.f32.mrb[71].mxu1 }
 0x7c6   : > { %7867 = vst [vmem:[%s12611_s18 + $0x98] sm:$0xff] %v7803_v5  ;;  %v7401_v49 = vmax.f32 %v7274_v46, 0.0  ;;  %v7278_v8 = vadd.f32 %v7277_v37, %v12583_v48  ;;  %v7614_v37 = vadd.f32 %v12507_v9, %v12586_v29 }
 0x7c7   : > { %v7740_v55 = vadd.f32 %v7590_v28, %v7400_v53  ;;  %v7402_v30 = vmax.f32 %v7276_v16, 0.0 }
 0x7c8   : > { %v7741_v20 = vadd.f32 %v7592_v14, %v7401_v49  ;;  %v7403_v31 = vmax.f32 %v7278_v8, 0.0  ;;  %v7620_v8 = vadd.f32 %v12511_v7, %v12586_v29 }
 0x7c9   : > { %v7804_v22 = vmax.f32 %v7740_v55, 0.0  ;;  %v7742_v54 = vadd.f32 %v7596_v42, %v7402_v30 }
 0x7ca   : > { %v7805_v63 = vmax.f32 %v7741_v20, 0.0  ;;  %v7743_v10 = vadd.f32 %v7598_v58, %v7403_v31  ;;  %v7281_v26 = vpop.f32.mrb[72].mxu1  ;;  %v7616_v58 = vadd.f32 %v12509_v2, %v12589_v45  ;;  %v7622_v20 = vadd.f32 %v12513_v56, %v12589_v45 }
 0x7cb   : > { %7868 = vst [vmem:[%s12611_s18 + $0xa0] sm:$0xff] %v7804_v22  ;;  %v7806_v25 = vmax.f32 %v7742_v54, 0.0  ;;  %v7282_v41 = vadd.f32 %v7281_v26, %v12581_v18  ;;  %v7283_v57 = vpop.f32.mrb[73].mxu1 }
 0x7cc   : > { %7869 = vst [vmem:[%s12611_s18 + $0xa8] sm:$0xff] %v7805_v63  ;;  %v7807_v12 = vmax.f32 %v7743_v10, 0.0  ;;  %v7284_v27 = vadd.f32 %v7283_v57, %v12583_v48  ;;  %v7285_v50 = vpop.f32.mrb[74].mxu1 }
 0x7cd   : > { %7870 = vst [vmem:[%s12611_s18 + $0xb0] sm:$0xff] %v7806_v25  ;;  %v7404_v60 = vmax.f32 %v7282_v41, 0.0  ;;  %v7286_v61 = vadd.f32 %v7285_v50, %v12581_v18  ;;  %v7287_v15 = vpop.f32.mrb[75].mxu1  ;;  %v7626_v50 = vadd.f32 %v12515_v51, %v12586_v29 }
 0x7ce   : > { %7871 = vst [vmem:[%s12611_s18 + $0xb8] sm:$0xff] %v7807_v12  ;;  %v7405_v40 = vmax.f32 %v7284_v27, 0.0  ;;  %v7288_v32 = vadd.f32 %v7287_v15, %v12583_v48  ;;  %v7632_v15 = vadd.f32 %v12519_v33, %v12586_v29 }
 0x7cf   : > { %v7744_v19 = vadd.f32 %v7602_v0, %v7404_v60  ;;  %v7406_v36 = vmax.f32 %v7286_v61, 0.0 }
 0x7d0   : > { %v7745_v43 = vadd.f32 %v7604_v13, %v7405_v40  ;;  %v7407_v17 = vmax.f32 %v7288_v32, 0.0  ;;  %v7634_v32 = vadd.f32 %v12521_v24, %v12589_v45 }
 0x7d1   : > { %v7808_v34 = vmax.f32 %v7744_v19, 0.0  ;;  %v7746_v1 = vadd.f32 %v7608_v52, %v7406_v36  ;;  %v7628_v52 = vadd.f32 %v12517_v59, %v12589_v45 }
 0x7d2   : > { %v7809_v5 = vmax.f32 %v7745_v43, 0.0  ;;  %v7747_v38 = vadd.f32 %v7610_v4, %v7407_v17  ;;  %v7291_v46 = vpop.f32.mrb[76].mxu1 }
 0x7d3   : > { %7872 = vst [vmem:[%s12611_s18 + $0xc0] sm:$0xff] %v7808_v34  ;;  %v7810_v21 = vmax.f32 %v7746_v1, 0.0  ;;  %v7292_v39 = vadd.f32 %v7291_v46, %v12581_v18  ;;  %v7293_v28 = vpop.f32.mrb[77].mxu1 }
 0x7d4   : > { %7873 = vst [vmem:[%s12611_s18 + $0xc8] sm:$0xff] %v7809_v5  ;;  %v7811_v53 = vmax.f32 %v7747_v38, 0.0  ;;  %v7294_v62 = vadd.f32 %v7293_v28, %v12583_v48  ;;  %v7295_v16 = vpop.f32.mrb[78].mxu1 }
 0x7d5   : > { %7874 = vst [vmem:[%s12611_s18 + $0xd0] sm:$0xff] %v7810_v21  ;;  %v7408_v42 = vmax.f32 %v7292_v39, 0.0  ;;  %v7296_v14 = vadd.f32 %v7295_v16, %v12581_v18  ;;  %v7297_v49 = vpop.f32.mrb[79].mxu1  ;;  %v7638_v39 = vadd.f32 %v12523_v6, %v12586_v29  ;;  %v7644_v16 = vadd.f32 %v12527_v3, %v12586_v29 }
 0x7d6   : > { %7875 = vst [vmem:[%s12611_s18 + $0xd8] sm:$0xff] %v7811_v53  ;;  %v7409_v55 = vmax.f32 %v7294_v62, 0.0  ;;  %v7298_v30 = vadd.f32 %v7297_v49, %v12583_v48  ;;  %v7646_v49 = vadd.f32 %v12529_v23, %v12589_v45 }
 0x7d7   : > { %v7748_v9 = vadd.f32 %v7614_v37, %v7408_v42  ;;  %v7410_v31 = vmax.f32 %v7296_v14, 0.0  ;;  %v7640_v37 = vadd.f32 %v12525_v11, %v12589_v45 }
 0x7d8   : > { %v7749_v22 = vadd.f32 %v7616_v58, %v7409_v55  ;;  %v7411_v54 = vmax.f32 %v7298_v30, 0.0 }
 0x7d9   : > { %v7812_v63 = vmax.f32 %v7748_v9, 0.0  ;;  %v7750_v10 = vadd.f32 %v7620_v8, %v7410_v31 }
 0x7da   : > { %v7813_v26 = vmax.f32 %v7749_v22, 0.0  ;;  %v7751_v7 = vadd.f32 %v7622_v20, %v7411_v54  ;;  %v7301_v25 = vpop.f32.mrb[80].mxu1 }
 0x7db   : > { %7876 = vst [vmem:[%s12611_s18 + $0xe0] sm:$0xff] %v7812_v63  ;;  %v7814_v2 = vmax.f32 %v7750_v10, 0.0  ;;  %v7302_v41 = vadd.f32 %v7301_v25, %v12581_v18  ;;  %v7303_v57 = vpop.f32.mrb[81].mxu1 }
 0x7dc   : > { %7877 = vst [vmem:[%s12611_s18 + $0xe8] sm:$0xff] %v7813_v26  ;;  %v7815_v12 = vmax.f32 %v7751_v7, 0.0  ;;  %v7304_v56 = vadd.f32 %v7303_v57, %v12583_v48  ;;  %v7305_v27 = vpop.f32.mrb[82].mxu1  ;;  %v7650_v26 = vadd.f32 %v12531_v47, %v12586_v29  ;;  %v12947_v57 = vld [vmem:[#allocation7_spill] sm:$0xff] }
 0x7dd   : > { %7878 = vst [vmem:[%s12611_s18 + $0xf0] sm:$0xff] %v7814_v2  ;;  %v7412_v0 = vmax.f32 %v7302_v41, 0.0  ;;  %v7306_v60 = vadd.f32 %v7305_v27, %v12581_v18  ;;  %v7307_v61 = vpop.f32.mrb[83].mxu1  ;;  %v7656_v41 = vadd.f32 %v12535_v44, %v12586_v29 }
 0x7de   : > { %7879 = vst [vmem:[%s12611_s18 + $0xf8] sm:$0xff] %v7815_v12  ;;  %v7413_v13 = vmax.f32 %v7304_v56, 0.0  ;;  %v7308_v40 = vadd.f32 %v7307_v61, %v12583_v48  ;;  %v7652_v12 = vadd.f32 %v12947_v57, %v12589_v45 }
 0x7df   : > { %v7752_v51 = vadd.f32 %v7626_v50, %v7412_v0  ;;  %v7414_v4 = vmax.f32 %v7306_v60, 0.0  ;;  %v12948_v50 = vld [vmem:[#allocation8_spill] sm:$0xff] }
 0x7e0   : > { %v7753_v19 = vadd.f32 %v7628_v52, %v7413_v13  ;;  %v7415_v36 = vmax.f32 %v7308_v40, 0.0  ;;  %v7658_v0 = vadd.f32 %v12948_v50, %v12589_v45 }
 0x7e1   : > { %v7816_v43 = vmax.f32 %v7752_v51, 0.0  ;;  %v7754_v17 = vadd.f32 %v7632_v15, %v7414_v4 }
 0x7e2   : > { %v7817_v34 = vmax.f32 %v7753_v19, 0.0  ;;  %v7755_v33 = vadd.f32 %v7634_v32, %v7415_v36  ;;  %v7311_v1 = vpop.f32.mrb[84].mxu1 }
 0x7e3   : > { %7880 = vst [vmem:[%s12611_s18 + $0x100] sm:$0xff] %v7816_v43  ;;  %v7818_v59 = vmax.f32 %v7754_v17, 0.0  ;;  %v7312_v5 = vadd.f32 %v7311_v1, %v12581_v18  ;;  %v7313_v38 = vpop.f32.mrb[85].mxu1 }
 0x7e4   : > { %7881 = vst [vmem:[%s12611_s18 + $0x108] sm:$0xff] %v7817_v34  ;;  %v7819_v46 = vmax.f32 %v7755_v33, 0.0  ;;  %v7314_v24 = vadd.f32 %v7313_v38, %v12583_v48  ;;  %v7315_v21 = vpop.f32.mrb[86].mxu1  ;;  %v12949_v34 = vld [vmem:[#allocation9_spill] sm:$0xff]  ;;  %v12950_v38 = vld [vmem:[#allocation11_spill] sm:$0xff] }
 0x7e5   : > { %7882 = vst [vmem:[%s12611_s18 + $0x110] sm:$0xff] %v7818_v59  ;;  %v7416_v28 = vmax.f32 %v7312_v5, 0.0  ;;  %v7316_v53 = vadd.f32 %v7315_v21, %v12581_v18  ;;  %v7317_v62 = vpop.f32.mrb[87].mxu1  ;;  %v7662_v33 = vadd.f32 %v12949_v34, %v12586_v29 }
 0x7e6   : > { %7883 = vst [vmem:[%s12611_s18 + $0x118] sm:$0xff] %v7819_v46  ;;  %v7417_v42 = vmax.f32 %v7314_v24, 0.0  ;;  %v7318_v14 = vadd.f32 %v7317_v62, %v12583_v48  ;;  %v7668_v46 = vadd.f32 %v12950_v38, %v12586_v29  ;;  %v12951_v24 = vld [vmem:[#allocation10_spill] sm:$0xff] }
 0x7e7   : > { %v7756_v6 = vadd.f32 %v7638_v39, %v7416_v28  ;;  %v7418_v8 = vmax.f32 %v7316_v53, 0.0  ;;  %v7664_v21 = vadd.f32 %v12951_v24, %v12589_v45  ;;  %v12952_v53 = vld [vmem:[#allocation12_spill] sm:$0xff] }
 0x7e8   : > { %v7757_v58 = vadd.f32 %v7640_v37, %v7417_v42  ;;  %v7419_v55 = vmax.f32 %v7318_v14, 0.0  ;;  %v7670_v62 = vadd.f32 %v12952_v53, %v12589_v45 }
 0x7e9   : > { %v7820_v30 = vmax.f32 %v7756_v6, 0.0  ;;  %v7758_v20 = vadd.f32 %v7644_v16, %v7418_v8 }
 0x7ea   : > { %v7821_v9 = vmax.f32 %v7757_v58, 0.0  ;;  %v7759_v3 = vadd.f32 %v7646_v49, %v7419_v55  ;;  %v7321_v31 = vpop.f32.mrb[88].mxu1 }
 0x7eb   : > { %7884 = vst [vmem:[%s12611_s18 + $0x120] sm:$0xff] %v7820_v30  ;;  %v7822_v11 = vmax.f32 %v7758_v20, 0.0  ;;  %v7322_v22 = vadd.f32 %v7321_v31, %v12581_v18  ;;  %v7323_v54 = vpop.f32.mrb[89].mxu1 }
 0x7ec   : > { %7885 = vst [vmem:[%s12611_s18 + $0x128] sm:$0xff] %v7821_v9  ;;  %v7823_v63 = vmax.f32 %v7759_v3, 0.0  ;;  %v7324_v23 = vadd.f32 %v7323_v54, %v12583_v48  ;;  %v7325_v10 = vpop.f32.mrb[90].mxu1 }
 0x7ed   : > { %7886 = vst [vmem:[%s12611_s18 + $0x130] sm:$0xff] %v7822_v11  ;;  %v7420_v7 = vmax.f32 %v7322_v22, 0.0  ;;  %v7326_v25 = vadd.f32 %v7325_v10, %v12581_v18  ;;  %v7327_v2 = vpop.f32.mrb[91].mxu1  ;;  %v12953_v22 = vld [vmem:[#allocation13_spill] sm:$0xff] }
 0x7ee   : > { %7887 = vst [vmem:[%s12611_s18 + $0x138] sm:$0xff] %v7823_v63  ;;  %v7421_v56 = vmax.f32 %v7324_v23, 0.0  ;;  %v7328_v27 = vadd.f32 %v7327_v2, %v12583_v48  ;;  %v7674_v54 = vadd.f32 %v12953_v22, %v12586_v29 }
 0x7ef   : > { %v7760_v47 = vadd.f32 %v7650_v26, %v7420_v7  ;;  %v7422_v60 = vmax.f32 %v7326_v25, 0.0  ;;  %v12954_v26 = vld [vmem:[#allocation15_spill] sm:$0xff]  ;;  %v12955_v25 = vld [vmem:[#allocation14_spill] sm:$0xff] }
 0x7f0   : > { %v7761_v61 = vadd.f32 %v7652_v12, %v7421_v56  ;;  %v7423_v15 = vmax.f32 %v7328_v27, 0.0  ;;  %v7680_v7 = vadd.f32 %v12954_v26, %v12586_v29  ;;  %v7676_v2 = vadd.f32 %v12955_v25, %v12589_v45  ;;  %v12956_v12 = vld [vmem:[#allocation16_spill] sm:$0xff] }
 0x7f1   : > { %v7824_v52 = vmax.f32 %v7760_v47, 0.0  ;;  %v7762_v13 = vadd.f32 %v7656_v41, %v7422_v60  ;;  %v7682_v56 = vadd.f32 %v12956_v12, %v12589_v45 }
 0x7f2   : > { %v7825_v40 = vmax.f32 %v7761_v61, 0.0  ;;  %v7763_v44 = vadd.f32 %v7658_v0, %v7423_v15  ;;  %v7331_v32 = vpop.f32.mrb[92].mxu1 }
 0x7f3   : > { %7888 = vst [vmem:[%s12611_s18 + $0x140] sm:$0xff] %v7824_v52  ;;  %v7826_v51 = vmax.f32 %v7762_v13, 0.0  ;;  %v7332_v4 = vadd.f32 %v7331_v32, %v12581_v18  ;;  %v7333_v19 = vpop.f32.mrb[93].mxu1 }
 0x7f4   : > { %7889 = vst [vmem:[%s12611_s18 + $0x148] sm:$0xff] %v7825_v40  ;;  %v7827_v36 = vmax.f32 %v7763_v44, 0.0  ;;  %v7334_v43 = vadd.f32 %v7333_v19, %v12583_v48  ;;  %v7335_v17 = vpop.f32.mrb[94].mxu1 }
 0x7f5   : > { %7890 = vst [vmem:[%s12611_s18 + $0x150] sm:$0xff] %v7826_v51  ;;  %v7424_v1 = vmax.f32 %v7332_v4, 0.0  ;;  %v7336_v59 = vadd.f32 %v7335_v17, %v12581_v18  ;;  %v7337_v5 = vpop.f32.mrb[95].mxu1 }
 0x7f6   : > { %7891 = vst [vmem:[%s12611_s18 + $0x158] sm:$0xff] %v7827_v36  ;;  %v7425_v39 = vmax.f32 %v7334_v43, 0.0  ;;  %v7338_v28 = vadd.f32 %v7337_v5, %v12583_v48  ;;  %v12957_v36 = vld [vmem:[#allocation17_spill] sm:$0xff]  ;;  %v12959_v5 = vld [vmem:[#allocation18_spill] sm:$0xff] }
 0x7f7   : > { %v7764_v16 = vadd.f32 %v7662_v33, %v7424_v1  ;;  %v7426_v37 = vmax.f32 %v7336_v59, 0.0  ;;  %v7686_v43 = vadd.f32 %v12957_v36, %v12586_v29  ;;  %v12958_v1 = vld [vmem:[#allocation19_spill] sm:$0xff]  ;;  %v7688_v38 = vadd.f32 %v12959_v5, %v12589_v45 }
 0x7f8   : > { %v7765_v42 = vadd.f32 %v7664_v21, %v7425_v39  ;;  %v7427_v14 = vmax.f32 %v7338_v28, 0.0  ;;  %v7692_v59 = vadd.f32 %v12958_v1, %v12586_v29  ;;  %v12960_v21 = vld [vmem:[#allocation20_spill] sm:$0xff] }
 0x7f9   : > { %v7828_v49 = vmax.f32 %v7764_v16, 0.0  ;;  %v7766_v6 = vadd.f32 %v7668_v46, %v7426_v37  ;;  %v7694_v39 = vadd.f32 %v12960_v21, %v12589_v45 }
 0x7fa   : > { %v7829_v8 = vmax.f32 %v7765_v42, 0.0  ;;  %v7767_v58 = vadd.f32 %v7670_v62, %v7427_v14  ;;  %v7341_v55 = vpop.f32.mrb[96].mxu1 }
 0x7fb   : > { %7892 = vst [vmem:[%s12611_s18 + $0x160] sm:$0xff] %v7828_v49  ;;  %v7830_v30 = vmax.f32 %v7766_v6, 0.0  ;;  %v7342_v20 = vadd.f32 %v7341_v55, %v12581_v18  ;;  %v7343_v9 = vpop.f32.mrb[97].mxu1 }
 0x7fc   : > { %7893 = vst [vmem:[%s12611_s18 + $0x168] sm:$0xff] %v7829_v8  ;;  %v7831_v3 = vmax.f32 %v7767_v58, 0.0  ;;  %v7344_v31 = vadd.f32 %v7343_v9, %v12583_v48  ;;  %v7345_v11 = vpop.f32.mrb[98].mxu1 }
 0x7fd   : > { %7894 = vst [vmem:[%s12611_s18 + $0x170] sm:$0xff] %v7830_v30  ;;  %v7428_v63 = vmax.f32 %v7342_v20, 0.0  ;;  %v7346_v23 = vadd.f32 %v7345_v11, %v12581_v18  ;;  %v7347_v10 = vpop.f32.mrb[99].mxu1 }
 0x7fe   : > { %7895 = vst [vmem:[%s12611_s18 + $0x178] sm:$0xff] %v7831_v3  ;;  %v7429_v41 = vmax.f32 %v7344_v31, 0.0  ;;  %v7348_v57 = vadd.f32 %v7347_v10, %v12583_v48  ;;  %v12961_v3 = vld [vmem:[#allocation21_spill] sm:$0xff]  ;;  %v12963_v10 = vld [vmem:[#allocation22_spill] sm:$0xff] }
 0x7ff   : > { %v7768_v27 = vadd.f32 %v7674_v54, %v7428_v63  ;;  %v7430_v50 = vmax.f32 %v7346_v23, 0.0  ;;  %v7698_v31 = vadd.f32 %v12961_v3, %v12586_v29  ;;  %v12962_v63 = vld [vmem:[#allocation23_spill] sm:$0xff]  ;;  %v7700_v26 = vadd.f32 %v12963_v10, %v12589_v45 }
 0x800   : > { %v7769_v0 = vadd.f32 %v7676_v2, %v7429_v41  ;;  %v7431_v47 = vmax.f32 %v7348_v57, 0.0  ;;  %v7704_v23 = vadd.f32 %v12962_v63, %v12586_v29  ;;  %v12964_v2 = vld [vmem:[#allocation24_spill] sm:$0xff] }
 0x801   : > { %v7832_v60 = vmax.f32 %v7768_v27, 0.0  ;;  %v7770_v61 = vadd.f32 %v7680_v7, %v7430_v50  ;;  %v7706_v41 = vadd.f32 %v12964_v2, %v12589_v45 }
 0x802   : > { %v7833_v15 = vmax.f32 %v7769_v0, 0.0  ;;  %v7771_v52 = vadd.f32 %v7682_v56, %v7431_v47  ;;  %v7351_v13 = vpop.f32.mrb[100].mxu1 }
 0x803   : > { %7896 = vst [vmem:[%s12611_s18 + $0x180] sm:$0xff] %v7832_v60  ;;  %v7834_v40 = vmax.f32 %v7770_v61, 0.0  ;;  %v7352_v44 = vadd.f32 %v7351_v13, %v12581_v18  ;;  %v7353_v32 = vpop.f32.mrb[101].mxu1 }
 0x804   : > { %7897 = vst [vmem:[%s12611_s18 + $0x188] sm:$0xff] %v7833_v15  ;;  %v7835_v51 = vmax.f32 %v7771_v52, 0.0  ;;  %v7354_v4 = vadd.f32 %v7353_v32, %v12583_v48  ;;  %v7355_v19 = vpop.f32.mrb[102].mxu1 }
 0x805   : > { %7898 = vst [vmem:[%s12611_s18 + $0x190] sm:$0xff] %v7834_v40  ;;  %v7432_v17 = vmax.f32 %v7352_v44, 0.0  ;;  %v7356_v34 = vadd.f32 %v7355_v19, %v12581_v18  ;;  %v7357_v33 = vpop.f32.mrb[103].mxu1 }
 0x806   : > { %7899 = vst [vmem:[%s12611_s18 + $0x198] sm:$0xff] %v7835_v51  ;;  %v7433_v46 = vmax.f32 %v7354_v4, 0.0  ;;  %v7358_v24 = vadd.f32 %v7357_v33, %v12583_v48  ;;  %v12965_v51 = vld [vmem:[#allocation25_spill] sm:$0xff]  ;;  %v12967_v33 = vld [vmem:[#allocation26_spill] sm:$0xff] }
 0x807   : > { %v7772_v28 = vadd.f32 %v7686_v43, %v7432_v17  ;;  %v7434_v53 = vmax.f32 %v7356_v34, 0.0  ;;  %v7710_v4 = vadd.f32 %v12965_v51, %v12586_v29  ;;  %v12966_v17 = vld [vmem:[#allocation27_spill] sm:$0xff]  ;;  %v7712_v1 = vadd.f32 %v12967_v33, %v12589_v45 }
 0x808   : > { %v7773_v62 = vadd.f32 %v7688_v38, %v7433_v46  ;;  %v7435_v16 = vmax.f32 %v7358_v24, 0.0  ;;  %v7716_v34 = vadd.f32 %v12966_v17, %v12586_v29  ;;  %v7718_v38 = vadd.f32 %v12604_v35, %v12589_v45 }
 0x809   : > { %v7836_v37 = vmax.f32 %v7772_v28, 0.0  ;;  %v7774_v42 = vadd.f32 %v7692_v59, %v7434_v53 }
 0x80a   : > { %v7837_v14 = vmax.f32 %v7773_v62, 0.0  ;;  %v7775_v49 = vadd.f32 %v7694_v39, %v7435_v16  ;;  %v7361_v6 = vpop.f32.mrb[104].mxu1 }
 0x80b   : > { %7900 = vst [vmem:[%s12611_s18 + $0x1a0] sm:$0xff] %v7836_v37  ;;  %v7838_v8 = vmax.f32 %v7774_v42, 0.0  ;;  %v7362_v58 = vadd.f32 %v7361_v6, %v12581_v18  ;;  %v7363_v55 = vpop.f32.mrb[105].mxu1 }
 0x80c   : > { %7901 = vst [vmem:[%s12611_s18 + $0x1a8] sm:$0xff] %v7837_v14  ;;  %v7839_v30 = vmax.f32 %v7775_v49, 0.0  ;;  %v7364_v20 = vadd.f32 %v7363_v55, %v12583_v48  ;;  %v7365_v9 = vpop.f32.mrb[106].mxu1 }
 0x80d   : > { %7902 = vst [vmem:[%s12611_s18 + $0x1b0] sm:$0xff] %v7838_v8  ;;  %v7436_v11 = vmax.f32 %v7362_v58, 0.0  ;;  %v7366_v22 = vadd.f32 %v7365_v9, %v12581_v18  ;;  %v7367_v54 = vpop.f32.mrb[107].mxu1 }
 0x80e   : > { %7903 = vst [vmem:[%s12611_s18 + $0x1b8] sm:$0xff] %v7839_v30  ;;  %v7437_v7 = vmax.f32 %v7364_v20, 0.0  ;;  %v7368_v25 = vadd.f32 %v7367_v54, %v12583_v48 }
 0x80f   : > { %v7776_v57 = vadd.f32 %v7698_v31, %v7436_v11  ;;  %v7438_v12 = vmax.f32 %v7366_v22, 0.0 }
 0x810   : > { %v7777_v56 = vadd.f32 %v7700_v26, %v7437_v7  ;;  %v7439_v27 = vmax.f32 %v7368_v25, 0.0 }
 0x811   : > { %v7840_v50 = vmax.f32 %v7776_v57, 0.0  ;;  %v7778_v0 = vadd.f32 %v7704_v23, %v7438_v12 }
 0x812   : > { %v7841_v47 = vmax.f32 %v7777_v56, 0.0  ;;  %v7779_v60 = vadd.f32 %v7706_v41, %v7439_v27  ;;  %v7371_v61 = vpop.f32.mrb[108].mxu1 }
 0x813   : > { %7904 = vst [vmem:[%s12611_s18 + $0x1c0] sm:$0xff] %v7840_v50  ;;  %v7842_v15 = vmax.f32 %v7778_v0, 0.0  ;;  %v7372_v52 = vadd.f32 %v7371_v61, %v12581_v18  ;;  %v7373_v13 = vpop.f32.mrb[109].mxu1 }
 0x814   : > { %7905 = vst [vmem:[%s12611_s18 + $0x1c8] sm:$0xff] %v7841_v47  ;;  %v7843_v40 = vmax.f32 %v7779_v60, 0.0  ;;  %v7374_v44 = vadd.f32 %v7373_v13, %v12583_v48  ;;  %v7375_v32 = vpop.f32.mrb[110].mxu1 }
 0x815   : > { %7906 = vst [vmem:[%s12611_s18 + $0x1d0] sm:$0xff] %v7842_v15  ;;  %v7440_v19 = vmax.f32 %v7372_v52, 0.0  ;;  %v7376_v36 = vadd.f32 %v7375_v32, %v12581_v18  ;;  %v7377_v43 = vpop.f32.mrb[111].mxu1 }
 0x816   : > { %7907 = vst [vmem:[%s12611_s18 + $0x1d8] sm:$0xff] %v7843_v40  ;;  %v7441_v59 = vmax.f32 %v7374_v44, 0.0  ;;  %v7378_v5 = vadd.f32 %v7377_v43, %v12583_v48 }
 0x817   : > { %v7780_v46 = vadd.f32 %v7710_v4, %v7440_v19  ;;  %v7442_v24 = vmax.f32 %v7376_v36, 0.0 }
 0x818   : > { %v7781_v18 = vadd.f32 %v7712_v1, %v7441_v59  ;;  %v7443_v21 = vmax.f32 %v7378_v5, 0.0 }
 0x819   : > { %v7844_v29 = vmax.f32 %v7780_v46, 0.0  ;;  %v7782_v39 = vadd.f32 %v7716_v34, %v7442_v24 }
 0x81a   : > { %v7845_v28 = vmax.f32 %v7781_v18, 0.0  ;;  %v7783_v53 = vadd.f32 %v7718_v38, %v7443_v21 }
 0x81b   : > { %7908 = vst [vmem:[%s12611_s18 + $0x1e0] sm:$0xff] %v7844_v29  ;;  %v7846_v48 = vmax.f32 %v7782_v39, 0.0 }
 0x81c   : > { %7909 = vst [vmem:[%s12611_s18 + $0x1e8] sm:$0xff] %v7845_v28  ;;  %v7847_v45 = vmax.f32 %v7783_v53, 0.0 }
 0x81d   : > { %7910 = vst [vmem:[%s12611_s18 + $0x1f0] sm:$0xff] %v7846_v48 }
 0x81e   : > { %7911 = vst [vmem:[%s12611_s18 + $0x1f8] sm:$0xff] %v7847_v45 }
 0x81f   : > { %10439 = shalt.err (!%p10436_p3)
}
 0x820   : > { %s10440_s16 = scalar_lea.hbm %s12859_s26, 8192  ;;  %s10444_s29 = scalar_lea.hbm %s12921_s12, 16384 }
 0x821   : > { %p10441_p4 = scmp.ne.s32.totalorder %s12859_s26, %s10440_s16  ;;  %p10445_p9 = scmp.lt.u32.totalorder %s12859_s26, %s12921_s12 }
 0x822   : > { %p10446_p10 = scmp.lt.u32.totalorder %s10444_s29, %s10440_s16  ;;  %p10448_p12 = scmp.lt.u32.totalorder %s10440_s16, %s12859_s26 }
 0x823   : > { %p10442_p7 = pnand %p10441_p4, %p10598_p5 }
 0x824   : > { %p10447_p11 = por %p10446_p10, %p10445_p9 }
 0x825   : > { %p10443_p8 = pneg %p10442_p7 }
 0x826   : > { %p10449_p13 = por %p10448_p12, %p10447_p11 }
 0x828   : > { %p10450_p0 = pnand %p10449_p13, %p10443_p8 }
 0x82a   : > { %10453 = shalt.err (!%p10450_p0)
}
 0x82b   : > { %s10493_s28 = smov 256   ;;  %s10494_s19 = smov 16  }
 0x82c   : > { %10252 = dma.vmem_to_hbm [thread:$0]  (%p10598_p5), %s12861_s20, 8192, %s12859_s26, %s12868_s25, %s10493_s28, %s10493_s28, %s10494_s19  }
 0x82d PF: > { %p10258_p1 = scmp.ge.s32.totalorder %s10488_s24, 2  ;;  %s7941_s18 = sand.u32 1, %s10476_s21  }
 0x82e   : > { %s7942_s16 = scalar_lea.sflag [#allocation5], %s7941_s18 }
 0x82f   : > { %p10255_p2 = pnand %p10258_p1, %p10602_p6 }
 0x831   : > { %10471 = dma.done.wait (!%p10255_p2), %s7942_s16, 8192  }
 0x832   : > { %10473 = vsyncadd (!%p10255_p2), %s7942_s16, 4294959104  ;;  %p22_p3 = scmp.ge.s32.totalorder %s10585_s27, 4   ;;  %s12968_s21 = smov %s10480_s22 }
 0x833   : > { %s12969_s22 = smov %s10484_s23  ;;  %s12970_s23 = smov %s10596_s30 }
 0x834   : > { %s12971_s24 = smov %s10585_s27  ;;  %24 = sbr.rel (!%p22_p3) target bundleno = 5 (0x5), region = 123 }
 0x83b   :  { %7947 = vsyncpa [#allocation5], 1 }
 0x83c   :  { %7949 = vsyncpa [#allocation5 + $0x1], 1 }

</bundles_post_ra>
